<compile_context>
chip_gen: v6e
topology: v6e:2x2x1
jax: 0.10.0
libtpu: 0.0.40
codegen_flags: <defaults>
</compile_context>

<pallas_src>
import functools

import jax
import jax.numpy as jnp
from jax.experimental import pallas as pl
from jax.experimental.pallas import tpu as pltpu


def reid_kernel(x_ref, wconv_ref, bconv_ref, scale_ref, shift_ref, out_ref,
                sum_acc, max_acc, *, hw_valid, needs_mask):
    # x_ref:     (B_TILE, HW_CHUNK, Cin)  bf16 (batch block, spatial chunk)
    # wconv_ref: (Cin, Cf)   bf16        synthetic backbone 1x1 conv weight
    # bconv_ref: (1, Cf)     f32         conv bias
    # scale_ref: (1, 2*Cf)   f32         folded BN scale = gamma / sqrt(var + eps)
    # shift_ref: (1, 2*Cf)   f32         folded BN shift = beta - mean * scale
    # out_ref:   (B_TILE, 2*Cf)
    # sum_acc:   (B_TILE, Cf) f32        running spatial sum (avg-pool accumulator)
    # max_acc:   (B_TILE, Cf) f32        running spatial max (max-pool accumulator)
    k = pl.program_id(1)

    @pl.when(k == 0)
    def _init():
        sum_acc[...] = jnp.zeros_like(sum_acc)
        # feat is post-ReLU (>= 0), so 0.0 is an exact identity for the running max and
        # stays exact for zero-masked tail rows.
        max_acc[...] = jnp.zeros_like(max_acc)

    bt, hwc, cin = x_ref.shape
    cf = wconv_ref.shape[1]

    # "model_base.features": 1x1 pointwise conv == one channel matmul on the MXU for the
    # whole (B_TILE * HW_CHUNK) pixel block; Cf lands on the (dense) lane axis.
    x2d = x_ref[...].reshape(bt * hwc, cin)
    feat = jnp.dot(x2d, wconv_ref[...], preferred_element_type=jnp.float32)
    feat = jnp.maximum(feat + bconv_ref[...], 0.0)          # conv bias + F.relu
    feat3 = feat.reshape(bt, hwc, cf)                       # split of major dim: cheap

    if needs_mask:
        # Zero out padded spatial rows (only traced when HW was padded).
        pos = jax.lax.broadcasted_iota(jnp.int32, feat3.shape, 1) + k * hwc
        feat3 = jnp.where(pos < hw_valid, feat3, 0.0)

    # Fused single-pass global avg + max pooling over this HW chunk — one unmasked,
    # (8,128)-aligned accumulator update per grid step (no per-sample Python loop).
    sum_acc[...] += jnp.sum(feat3, axis=1)
    max_acc[...] = jnp.maximum(max_acc[...], jnp.max(feat3, axis=1))

    @pl.when(k == pl.num_programs(1) - 1)
    def _finalize():
        pooled = sum_acc[...] * (1.0 / hw_valid) + max_acc[...]   # gap(x) + gmp(x)
        cat = jnp.concatenate([pooled, pooled], axis=-1)          # torch.cat([x, x], dim=1)
        out_ref[...] = (cat * scale_ref[...] + shift_ref[...]).astype(out_ref.dtype)


def _round_up(a, b):
    return -(-a // b) * b


def densenet_reid_forward(x_nchw, wconv, bconv, bn_gamma, bn_beta, bn_mean, bn_var,
                          *, eps=1e-5, b_tile=None, hw_chunk=None,
                          compute_dtype=jnp.bfloat16):
    """x_nchw: (N, Cin, H, W). Returns eval-mode BatchNorm1d output (N, 2*Cf) in f32."""
    N, Cin, H, W = x_nchw.shape
    HW = H * W
    Cf = wconv.shape[1]
    Dout = 2 * Cf

    # --- batch tiling --------------------------------------------------------
    if b_tile is None:
        b_tile = 8
        # v7x has 2 TensorCores: keep >= 2 steps on the 'parallel' batch axis when possible.
        while b_tile > 1 and -(-N // b_tile) < 2:
            b_tile //= 2
    N_pad = _round_up(N, b_tile)

    # --- VMEM-budget-aware HW chunking (v5e/v6e: 128 MiB, v7x: 64 MiB) --------
    try:
        vmem_cap = int(pltpu.get_tpu_info().vmem_capacity_bytes)
    except Exception:
        vmem_cap = 64 * 1024 * 1024  # conservative fallback (v7x per-core VMEM)
    vmem_limit = min(int(0.75 * vmem_cap), 96 * 1024 * 1024)   # ~48 MiB v7x, ~96 MiB v5e/v6e

    if hw_chunk is None:
        lane = lambda c: _round_up(c, 128)
        in_bytes = jnp.dtype(compute_dtype).itemsize
        # Padded VMEM bytes per spatial row: x block (lane-padded Cin, double-buffered)
        # plus f32 feat temporaries (~2x for intermediates).
        bytes_per_row = (b_tile * lane(Cin) * in_bytes * 2
                         + 2 * b_tile * lane(Cf) * 4)
        budget = vmem_limit // 2                     # headroom for output/weights/regalloc
        cap = max(128, (budget // bytes_per_row) // 128 * 128)
        cap = min(cap, 1024)                         # per-step overhead well amortized by here
        hw_chunk = min(cap, _round_up(HW, 128))
    HW_pad = _round_up(HW, hw_chunk)
    needs_mask = HW_pad != HW

    # --- one-time layout / padding in XLA ------------------------------------
    # NCHW -> (N, HW, Cin) so every in-kernel matmul is plain (M,K)x(K,N) with Cf / 2*Cf
    # on the lane axis and no in-kernel transposes are needed.
    x = jnp.transpose(x_nchw, (0, 2, 3, 1)).reshape(N, HW, Cin)
    if N_pad != N or HW_pad != HW:
        x = jnp.pad(x, ((0, N_pad - N), (0, HW_pad - HW), (0, 0)))
    x = x.astype(compute_dtype)
    wconv_c = wconv.astype(compute_dtype)
    bconv2d = bconv.reshape(1, Cf).astype(jnp.float32)

    # Fold inference-mode BatchNorm1d into a per-channel affine (scale, shift).
    inv_std = 1.0 / jnp.sqrt(bn_var.astype(jnp.float32) + eps)
    scale_1d = bn_gamma.astype(jnp.float32) * inv_std
    shift_1d = bn_beta.astype(jnp.float32) - bn_mean.astype(jnp.float32) * scale_1d
    scale = scale_1d.reshape(1, Dout)
    shift = shift_1d.reshape(1, Dout)

    grid = (N_pad // b_tile, HW_pad // hw_chunk)
    kernel = functools.partial(reid_kernel, hw_valid=HW, needs_mask=needs_mask)

    out = pl.pallas_call(
        kernel,
        out_shape=jax.ShapeDtypeStruct((N_pad, Dout), jnp.float32),
        grid_spec=pltpu.PrefetchScalarGridSpec(
            num_scalar_prefetch=0,
            grid=grid,
            in_specs=[
                pl.BlockSpec((b_tile, hw_chunk, Cin), lambda b, k: (b, k, 0)),
                pl.BlockSpec((Cin, Cf), lambda b, k: (0, 0)),
                pl.BlockSpec((1, Cf), lambda b, k: (0, 0)),
                pl.BlockSpec((1, Dout), lambda b, k: (0, 0)),
                pl.BlockSpec((1, Dout), lambda b, k: (0, 0)),
            ],
            out_specs=pl.BlockSpec((b_tile, Dout), lambda b, k: (b, 0)),
            scratch_shapes=[
                pltpu.VMEM((b_tile, Cf), jnp.float32),   # running spatial sum
                pltpu.VMEM((b_tile, Cf), jnp.float32),   # running spatial max
            ],
        ),
        compiler_params=pltpu.CompilerParams(
            dimension_semantics=("parallel", "arbitrary"),
            vmem_limit_bytes=vmem_limit,
        ),
    )(x, wconv_c, bconv2d, scale, shift)

    return out[:N] if N_pad != N else out


def reference_forward(x_nchw, wconv, bconv, bn_gamma, bn_beta, bn_mean, bn_var, *, eps=1e-5):
    """Plain-JAX reference mirroring the PyTorch forward (eval-mode BatchNorm1d)."""
    N, Cin, H, W = x_nchw.shape
    x = jnp.transpose(x_nchw, (0, 2, 3, 1)).reshape(N, H * W, Cin)
    feat = jnp.maximum(x @ wconv + bconv[None, None, :], 0.0)    # (N, HW, Cf)
    pooled = jnp.mean(feat, axis=1) + jnp.max(feat, axis=1)      # gap + gmp -> (N, Cf)
    cat = jnp.concatenate([pooled, pooled], axis=-1)             # (N, 2*Cf)
    return (cat - bn_mean) / jnp.sqrt(bn_var + eps) * bn_gamma + bn_beta


if __name__ == "__main__":
    # Small, module-consistent shapes: input (N=16, Cin=4, H=16, W=16); synthetic backbone
    # features Cf=64 so the BatchNorm1d width is 2*Cf=128 (scaled-down analogue of
    # BatchNorm1d(2048)). Auto-tiling gives b_tile=8 (two parallel batch steps) and a
    # VMEM-budgeted hw_chunk covering HW=256, exercising both grid axes with lane-dense,
    # (8,128)-aligned blocks.
    N, Cin, H, W = 16, 4, 16, 16
    Cf = 64

    key = jax.random.PRNGKey(0)
    k_x, k_wc, k_bc, k_g, k_b, k_m, k_v = jax.random.split(key, 7)

    x = jax.random.normal(k_x, (N, Cin, H, W), dtype=jnp.float32)
    wconv = jax.random.normal(k_wc, (Cin, Cf), dtype=jnp.float32) * 0.1
    bconv = jax.random.normal(k_bc, (Cf,), dtype=jnp.float32) * 0.1
    bn_gamma = 1.0 + 0.1 * jax.random.normal(k_g, (2 * Cf,), dtype=jnp.float32)
    bn_beta = 0.1 * jax.random.normal(k_b, (2 * Cf,), dtype=jnp.float32)
    bn_mean = 0.1 * jax.random.normal(k_m, (2 * Cf,), dtype=jnp.float32)
    bn_var = 0.5 + jax.random.uniform(k_v, (2 * Cf,), dtype=jnp.float32)

    out = densenet_reid_forward(x, wconv, bconv, bn_gamma, bn_beta, bn_mean, bn_var)
    out = jax.block_until_ready(out)

    # Reference with the same bf16 rounding of x / wconv the kernel streams (f32 math).
    x_q = x.astype(jnp.bfloat16).astype(jnp.float32)
    w_q = wconv.astype(jnp.bfloat16).astype(jnp.float32)
    ref = reference_forward(x_q, w_q, bconv, bn_gamma, bn_beta, bn_mean, bn_var)

    assert out.shape == (N, 2 * Cf), out.shape
    assert jnp.allclose(out, ref, atol=1e-3, rtol=1e-3), (
        float(jnp.max(jnp.abs(out - ref)))
    )
    print("KERNEL_OK")
</pallas_src>

<mosaic_0001>
module attributes {stable_mosaic.version = 11 : i64} {
  func.func @reid_kernel(%arg0: i32, %arg1: i32, %arg2: memref<8x256x4xbf16, #tpu.memory_space<vmem>>, %arg3: memref<4x64xbf16, #tpu.memory_space<vmem>>, %arg4: memref<1x64xf32, #tpu.memory_space<vmem>>, %arg5: memref<1x128xf32, #tpu.memory_space<vmem>>, %arg6: memref<1x128xf32, #tpu.memory_space<vmem>>, %arg7: memref<8x128xf32, #tpu.memory_space<vmem>>, %arg8: memref<8x64xf32, #tpu.memory_space<vmem>>, %arg9: memref<8x64xf32, #tpu.memory_space<vmem>>) attributes {dimension_semantics = [#tpu.dimension_semantics<parallel>, #tpu.dimension_semantics<arbitrary>], iteration_bounds = array<i64: 2, 1>, scalar_prefetch = 0 : i64, scratch_operands = 2 : i64, tpu.core_type = #tpu.core_type<tc>, window_params = [{transform_indices = @transform_0, window_bounds = array<i64: 8, 256, 4>}, {pipeline_mode = #tpu.pipeline_mode<synchronous>, transform_indices = @transform_1, window_bounds = array<i64: 4, 64>}, {pipeline_mode = #tpu.pipeline_mode<synchronous>, transform_indices = @transform_2, window_bounds = array<i64: 1, 64>}, {pipeline_mode = #tpu.pipeline_mode<synchronous>, transform_indices = @transform_3, window_bounds = array<i64: 1, 128>}, {pipeline_mode = #tpu.pipeline_mode<synchronous>, transform_indices = @transform_4, window_bounds = array<i64: 1, 128>}, {transform_indices = @transform_5, window_bounds = array<i64: 8, 128>}]} {
    %c0_i32 = arith.constant 0 : i32
    %0 = arith.cmpi eq, %arg1, %c0_i32 : i32
    %1 = arith.extui %0 : i1 to i32
    %c0_i32_0 = arith.constant 0 : i32
    %2 = arith.cmpi ne, %1, %c0_i32_0 : i32
    scf.if %2 {
      %cst_20 = arith.constant 0.000000e+00 : f32
      %24 = vector.broadcast %cst_20 : f32 to vector<8x64xf32>
      %c0_21 = arith.constant 0 : index
      %c0_22 = arith.constant 0 : index
      %25 = vector.load %arg8[%c0_21, %c0_22] : memref<8x64xf32, #tpu.memory_space<vmem>>, vector<8x64xf32>
      tpu.vector_store %arg8[%c0_21, %c0_22], %24 {strides = array<i32>} : memref<8x64xf32, #tpu.memory_space<vmem>>, vector<8x64xf32>,
      %cst_23 = arith.constant 0.000000e+00 : f32
      %26 = vector.broadcast %cst_23 : f32 to vector<8x64xf32>
      %c0_24 = arith.constant 0 : index
      %c0_25 = arith.constant 0 : index
      %27 = vector.load %arg9[%c0_24, %c0_25] : memref<8x64xf32, #tpu.memory_space<vmem>>, vector<8x64xf32>
      tpu.vector_store %arg9[%c0_24, %c0_25], %26 {strides = array<i32>} : memref<8x64xf32, #tpu.memory_space<vmem>>, vector<8x64xf32>,
    } else {
    }
    %c0 = arith.constant 0 : index
    %c0_1 = arith.constant 0 : index
    %c0_2 = arith.constant 0 : index
    %3 = vector.load %arg2[%c0, %c0_1, %c0_2] : memref<8x256x4xbf16, #tpu.memory_space<vmem>>, vector<8x256x4xbf16>
    %4 = vector.shape_cast %3 : vector<8x256x4xbf16> to vector<2048x4xbf16>
    %c0_3 = arith.constant 0 : index
    %c0_4 = arith.constant 0 : index
    %5 = vector.load %arg3[%c0_3, %c0_4] : memref<4x64xbf16, #tpu.memory_space<vmem>>, vector<4x64xbf16>
    %cst = arith.constant dense<0.000000e+00> : vector<2048x64xf32>
    %6 = tpu.matmul %4, %5, %cst {dimension_numbers = #tpu.dot_dimension_numbers<[1], [0], [0], [1], [0, 0, 1, 1], [], []>} : vector<2048x4xbf16>, vector<4x64xbf16>, vector<2048x64xf32> -> vector<2048x64xf32>
    %c0_5 = arith.constant 0 : index
    %c0_6 = arith.constant 0 : index
    %7 = vector.load %arg4[%c0_5, %c0_6] : memref<1x64xf32, #tpu.memory_space<vmem>>, vector<1x64xf32>
    %8 = vector.broadcast %7 : vector<1x64xf32> to vector<2048x64xf32>
    %9 = arith.addf %6, %8 : vector<2048x64xf32>
    %cst_7 = arith.constant 0.000000e+00 : f32
    %10 = vector.broadcast %cst_7 : f32 to vector<2048x64xf32>
    %11 = arith.maximumf %9, %10 : vector<2048x64xf32>
    %12 = vector.shape_cast %11 : vector<2048x64xf32> to vector<8x256x64xf32>
    %c0_8 = arith.constant 0 : index
    %c0_9 = arith.constant 0 : index
    %13 = vector.load %arg8[%c0_8, %c0_9] : memref<8x64xf32, #tpu.memory_space<vmem>>, vector<8x64xf32>
    %cst_10 = arith.constant dense<0.000000e+00> : vector<8x64xf32>
    %14 = vector.multi_reduction <add>, %12, %cst_10 [1] : vector<8x256x64xf32> to vector<8x64xf32>
    %15 = arith.addf %13, %14 : vector<8x64xf32>
    %c0_11 = arith.constant 0 : index
    %c0_12 = arith.constant 0 : index
    %16 = vector.load %arg8[%c0_11, %c0_12] : memref<8x64xf32, #tpu.memory_space<vmem>>, vector<8x64xf32>
    tpu.vector_store %arg8[%c0_11, %c0_12], %15 {strides = array<i32>} : memref<8x64xf32, #tpu.memory_space<vmem>>, vector<8x64xf32>,
    %c0_13 = arith.constant 0 : index
    %c0_14 = arith.constant 0 : index
    %17 = vector.load %arg9[%c0_13, %c0_14] : memref<8x64xf32, #tpu.memory_space<vmem>>, vector<8x64xf32>
    %cst_15 = arith.constant dense<0xFF800000> : vector<8x64xf32>
    %18 = vector.multi_reduction <maximumf>, %12, %cst_15 [1] : vector<8x256x64xf32> to vector<8x64xf32>
    %19 = arith.maximumf %17, %18 : vector<8x64xf32>
    %c0_16 = arith.constant 0 : index
    %c0_17 = arith.constant 0 : index
    %20 = vector.load %arg9[%c0_16, %c0_17] : memref<8x64xf32, #tpu.memory_space<vmem>>, vector<8x64xf32>
    tpu.vector_store %arg9[%c0_16, %c0_17], %19 {strides = array<i32>} : memref<8x64xf32, #tpu.memory_space<vmem>>, vector<8x64xf32>,
    %c0_i32_18 = arith.constant 0 : i32
    %21 = arith.cmpi eq, %arg1, %c0_i32_18 : i32
    %22 = arith.extui %21 : i1 to i32
    %c0_i32_19 = arith.constant 0 : i32
    %23 = arith.cmpi ne, %22, %c0_i32_19 : i32
    scf.if %23 {
      %c0_20 = arith.constant 0 : index
      %c0_21 = arith.constant 0 : index
      %24 = vector.load %arg8[%c0_20, %c0_21] : memref<8x64xf32, #tpu.memory_space<vmem>>, vector<8x64xf32>
      %cst_22 = arith.constant 3.906250e-03 : f32
      %25 = vector.broadcast %cst_22 : f32 to vector<8x64xf32>
      %26 = arith.mulf %24, %25 : vector<8x64xf32>
      %c0_23 = arith.constant 0 : index
      %c0_24 = arith.constant 0 : index
      %27 = vector.load %arg9[%c0_23, %c0_24] : memref<8x64xf32, #tpu.memory_space<vmem>>, vector<8x64xf32>
      %28 = arith.addf %26, %27 : vector<8x64xf32>
      %29 = tpu.concatenate %28, %28 in 1 : vector<8x64xf32>, vector<8x64xf32> -> vector<8x128xf32>
      %c0_25 = arith.constant 0 : index
      %c0_26 = arith.constant 0 : index
      %30 = vector.load %arg5[%c0_25, %c0_26] : memref<1x128xf32, #tpu.memory_space<vmem>>, vector<1x128xf32>
      %31 = vector.broadcast %30 : vector<1x128xf32> to vector<8x128xf32>
      %32 = arith.mulf %29, %31 : vector<8x128xf32>
      %c0_27 = arith.constant 0 : index
      %c0_28 = arith.constant 0 : index
      %33 = vector.load %arg6[%c0_27, %c0_28] : memref<1x128xf32, #tpu.memory_space<vmem>>, vector<1x128xf32>
      %34 = vector.broadcast %33 : vector<1x128xf32> to vector<8x128xf32>
      %35 = arith.addf %32, %34 : vector<8x128xf32>
      %c0_29 = arith.constant 0 : index
      %c0_30 = arith.constant 0 : index
      %36 = vector.load %arg7[%c0_29, %c0_30] : memref<8x128xf32, #tpu.memory_space<vmem>>, vector<8x128xf32>
      tpu.vector_store %arg7[%c0_29, %c0_30], %35 {strides = array<i32>} : memref<8x128xf32, #tpu.memory_space<vmem>>, vector<8x128xf32>,
    } else {
    }
    return
  }
  func.func @transform_0(%arg0: i32, %arg1: i32) -> (i32, i32, i32) {
    %c0_i32 = arith.constant 0 : i32
    %c0_i32_0 = arith.constant 0 : i32
    return %arg0, %arg1, %c0_i32 : i32, i32, i32
  }
  func.func @transform_1(%arg0: i32, %arg1: i32) -> (i32, i32) {
    %c0_i32 = arith.constant 0 : i32
    %c0_i32_0 = arith.constant 0 : i32
    %c0_i32_1 = arith.constant 0 : i32
    return %c0_i32, %c0_i32_0 : i32, i32
  }
  func.func @transform_2(%arg0: i32, %arg1: i32) -> (i32, i32) {
    %c0_i32 = arith.constant 0 : i32
    %c0_i32_0 = arith.constant 0 : i32
    %c0_i32_1 = arith.constant 0 : i32
    return %c0_i32, %c0_i32_0 : i32, i32
  }
  func.func @transform_3(%arg0: i32, %arg1: i32) -> (i32, i32) {
    %c0_i32 = arith.constant 0 : i32
    %c0_i32_0 = arith.constant 0 : i32
    %c0_i32_1 = arith.constant 0 : i32
    return %c0_i32, %c0_i32_0 : i32, i32
  }
  func.func @transform_4(%arg0: i32, %arg1: i32) -> (i32, i32) {
    %c0_i32 = arith.constant 0 : i32
    %c0_i32_0 = arith.constant 0 : i32
    %c0_i32_1 = arith.constant 0 : i32
    return %c0_i32, %c0_i32_0 : i32, i32
  }
  func.func @transform_5(%arg0: i32, %arg1: i32) -> (i32, i32) {
    %c0_i32 = arith.constant 0 : i32
    %c0_i32_0 = arith.constant 0 : i32
    return %arg0, %c0_i32 : i32, i32
  }
}

</mosaic_0001>

<bundles_post_ra>
// kernel: tpu_custom_call.1
= control target key start
LH: loop header
LB: loop body
LE: loop exit
PB: predicated region body
PF: predicated region fallthrough
CT: control target
= control target key end

     0   :  { %10 = vsyncpa [#allocation5], 0  ;;  %s7023_s0 = inlined_call_operand.vmem [shape: bf16[16,256,4], index: 0, kind: input, shape index: {}]   ;;  %s7024_s1 = inlined_call_operand.vmem [shape: bf16[4,64], index: 1, kind: input, shape index: {}]   ;;  %s7025_s2 = inlined_call_operand.vmem [shape: f32[1,64], index: 2, kind: input, shape index: {}]   ;;  %s7026_s3 = inlined_call_operand.vmem [shape: f32[1,128], index: 3, kind: input, shape index: {}]   ;;  %s7027_s4 = inlined_call_operand.vmem [shape: f32[1,128], index: 4, kind: input, shape index: {}]   ;;  %s7028_s5 = inlined_call_operand.hbm [shape: f32[16,128], index: 5, kind: output, shape index: {}]  }
   0x1   :  { %12 = vsyncpa [#allocation5 + $0x1], 0  ;;  %s5099_s18 = smov 0   ;;  %s5101_s19 = smov 0  }
   0x2   :  { %s5103_s20 = smov 0   ;;  %s5105_s21 = smov 0  }
   0x3   :  { %s5107_s22 = smov 0   ;;  %s5109_s23 = smov 0  }
   0x4 LB: > { %s4136_s24 = sadd.s32 4294967295, %s5064_s23   ;;  %s4137_s25 = sadd.s32 4294967294, %s5064_s23   ;;  %s5064_s23 = sphi %s5109_s23, %s18_s23   ;;  %s5060_s22 = sphi %s5107_s22, %s7064_s22   ;;  %s5056_s21 = sphi %s5105_s21, %s7063_s21   ;;  %s5052_s20 = sphi %s5103_s20, %s7062_s20   ;;  %s5048_s19 = sphi %s5101_s19, %s7061_s19   ;;  %s5044_s18 = sphi %s5099_s18, %s7060_s18  }
   0x5   : > { %s30_s26 = sadd.s32 1, %s5060_s22  ;;  %s149_s27 = sadd.s32 1, %s5052_s20 }
   0x6   : > { %p32_p0 = scmp.ge.s32.totalorder %s30_s26, 2  ;;  %p159_p1 = scmp.ne.s32.totalorder %s5052_s20, %s5048_s19 }
   0x7   : > { %p160_p2 = scmp.eq.s32.totalorder %s4136_s24, 1  ;;  %p165_p3 = scmp.ne.s32.totalorder %s5048_s19, %s5044_s18 }
   0x8   : > { %s7066_s26 = smov (%p32_p0, %s30_s26), 0  ;;  %p166_p5 = scmp.eq.s32.totalorder %s4137_s25, 1 }
   0x9   : > { %p5139_p4 = por %p160_p2, %p159_p1  ;;  %s146_s29 = ssub.s32 %s5060_s22, %s7066_s26 }
   0xa   : > { %p4140_p6 = scmp.ge.s32.totalorder %s5064_s23, 1  ;;  %p147_p7 = scmp.eq.s32.totalorder %s146_s29, 0 }
   0xb   : > { %p5146_p8 = por %p166_p5, %p165_p3  ;;  %p211_p9 = scmp.lt.s32.totalorder %s5064_s23, 3 }
   0xc   : > { %s5152_s6 = scalar_select %p147_p7, %s5052_s20, %s149_s27  }
   0xd   : > { %p212_p10 = pnand %p4140_p6, %p211_p9 }
   0xf   : > { %215 = sbr.rel (%p212_p10) target bundleno = 783 (0x30f), region = 40 }
  0x14   : > { %v520_v0 = vld [vmem:[%s7024_s1] sm:$0x3]  ;;  %vm1553_vm0 = vcmask 1041408   ;;  %s4142_s9 = sshll.u32 %s5056_s21, 3  ;;  %vm1168_vm1 = vcmask 31744   ;;  %vm261_vm2 = vcmask 523264  }
  0x15   : > { %4798 = vmatprep.subr.msk.bf16.mxu0 %vm1553_vm0, %v520_v0  ;;  %4799 = vmatprep.subr.msk.bf16.mxu1 %vm1553_vm0, %v520_v0  ;;  %v1555_v1 = vsel %vm1553_vm0, %v520_v0, 0  ;;  %p246_p11 = scmp.lt.s32.totalorder %s4142_s9, 15  ;;  %vm3432_vm3 = vcmask 1041409   ;;  %vm3434_vm4 = vcmask 1042434   ;;  %vm3436_vm5 = vcmask 1043459   ;;  %s5067_s7 = smov 64  }
  0x16   : > { %4539 = vmatpush3.bf16.msra.mxu0 %v1555_v1  ;;  %4797 = vmatpush3.bf16.msra.mxu1 %v1555_v1  ;;  %vm3438_vm6 = vcmask 1044484   ;;  %vm3440_vm7 = vcmask 1045509   ;;  %vm3442_vm8 = vcmask 1046534   ;;  %vm3444_vm9 = vcmask 1047559   ;;  %s241_s8 = sand.u32 1, %s5048_s19   ;;  %s4405_s14 = sshll.u32 %s5056_s21, 7 }
  0x17   : > { %s7068_s9 = smov (!%p246_p11, %s4142_s9), 15  ;;  %s4061_s25 = scalar_lea.hbm %s7028_s5, %s4405_s14 }
  0x18   : > { %s4408_s10 = sshll.u32 %s7068_s9, 7  ;;  %s4141_s9 = sshll.u32 %s241_s8, 3 }
  0x19   : > { %s5161_s13 = scalar_lea.vmem %s7023_s0, %s4408_s10  ;;  %s243_s15 = scalar_lea.vmem [#allocation4], %s4141_s9 }
  0x1a   : > { %v4857_v2 = vld [vmem:[%s5161_s13] sm:$0xff]   ;;  %v4859_v4 = vld [vmem:[%s5161_s13 + $0x8] sm:$0xff]   ;;  %v4861_v6 = vld [vmem:[%s5161_s13 + $0x10] sm:$0xff]   ;;  %s4063_s16 = sshll.u32 %s243_s15, 4  ;;  %s4050_s27 = scalar_lea.sflag [#allocation5], %s241_s8  ;;  %s4064_s16 = int_to_ptr.vmem [resolvable:$true] %s4063_s16 }
  0x1b   : > { %v4858_v3 = vld [vmem:[%s5161_s13 + $0x200] sm:$0xff]   ;;  %4540 = vmatprep.mubr.msk.bf16.mxu0 %vm1168_vm1, %v4857_v2  ;;  %v4860_v5 = vld [vmem:[%s5161_s13 + $0x208] sm:$0xff]   ;;  %v4862_v7 = vld [vmem:[%s5161_s13 + $0x210] sm:$0xff]   ;;  %s4988_s29 = scalar_lea.vmem %s4064_s16, 128 }
  0x1c   : > { %4668 = vmatprep.mubr.msk.bf16.mxu1 %vm1168_vm1, %v4858_v3  ;;  %4541 = vmatmul.mubr.msk.bf16.vlgmr.msra.gmra.mxu0 %vm1168_vm1, %v4859_v4  ;;  %v4863_v8 = vld [vmem:[%s5161_s13 + $0x18] sm:$0xff]   ;;  %v4865_v10 = vld [vmem:[%s5161_s13 + $0x20] sm:$0xff]   ;;  %v4867_v12 = vld [vmem:[%s5161_s13 + $0x28] sm:$0xff]   ;;  %p4989_p12 = scmp.ne.s32.totalorder %s4064_s16, %s4988_s29 }
  0x1d   : > { %4669 = vmatmul.mubr.msk.bf16.vlgmr.msra.gmra.mxu1 %vm1168_vm1, %v4860_v5  ;;  %4544 = vmatprep.mubr.msk.bf16.mxu0 %vm1168_vm1, %v4861_v6  ;;  %v4864_v9 = vld [vmem:[%s5161_s13 + $0x218] sm:$0xff]   ;;  %v4866_v11 = vld [vmem:[%s5161_s13 + $0x220] sm:$0xff]   ;;  %v4868_v13 = vld [vmem:[%s5161_s13 + $0x228] sm:$0xff]  }
  0x1e   : > { %4672 = vmatprep.mubr.msk.bf16.mxu1 %vm1168_vm1, %v4862_v7  ;;  %v4869_v14 = vld [vmem:[%s5161_s13 + $0x30] sm:$0xff]   ;;  %v4871_v16 = vld [vmem:[%s5161_s13 + $0x38] sm:$0xff]   ;;  %v4873_v18 = vld [vmem:[%s5161_s13 + $0x40] sm:$0xff]   ;;  %p4990_p13 = pnand %p4989_p12, %p5139_p4 }
  0x1f   : > { %v4870_v15 = vld [vmem:[%s5161_s13 + $0x230] sm:$0xff]   ;;  %v4872_v17 = vld [vmem:[%s5161_s13 + $0x238] sm:$0xff]   ;;  %v4874_v19 = vld [vmem:[%s5161_s13 + $0x240] sm:$0xff]  }
  0x20   : > { %v4875_v20 = vld [vmem:[%s5161_s13 + $0x48] sm:$0xff]   ;;  %v4877_v22 = vld [vmem:[%s5161_s13 + $0x50] sm:$0xff]   ;;  %v4879_v24 = vld [vmem:[%s5161_s13 + $0x58] sm:$0xff]   ;;  %p4991_p0 = pneg %p4990_p13 }
  0x21   : > { %v4876_v21 = vld [vmem:[%s5161_s13 + $0x248] sm:$0xff]   ;;  %v4878_v23 = vld [vmem:[%s5161_s13 + $0x250] sm:$0xff]   ;;  %v4880_v25 = vld [vmem:[%s5161_s13 + $0x258] sm:$0xff]  }
  0x22   : > { %v4881_v26 = vld [vmem:[%s5161_s13 + $0x60] sm:$0xff]   ;;  %v4883_v28 = vld [vmem:[%s5161_s13 + $0x68] sm:$0xff]   ;;  %v4885_v30 = vld [vmem:[%s5161_s13 + $0x70] sm:$0xff]  }
  0x23   : > { %v4882_v27 = vld [vmem:[%s5161_s13 + $0x260] sm:$0xff]   ;;  %v4884_v29 = vld [vmem:[%s5161_s13 + $0x268] sm:$0xff]   ;;  %v4886_v31 = vld [vmem:[%s5161_s13 + $0x270] sm:$0xff]  }
  0x24   : > { %4545 = vmatmul.mubr.msk.bf16.gmra.mxu0 %vm1168_vm1, %v4863_v8  ;;  %v4887_v32 = vld [vmem:[%s5161_s13 + $0x78] sm:$0xff]   ;;  %v4889_v34 = vld [vmem:[%s5161_s13 + $0x80] sm:$0xff]   ;;  %v4891_v36 = vld [vmem:[%s5161_s13 + $0x88] sm:$0xff]  }
  0x25   : > { %4673 = vmatmul.mubr.msk.bf16.gmra.mxu1 %vm1168_vm1, %v4864_v9  ;;  %4548 = vmatprep.mubr.msk.bf16.mxu0 %vm1168_vm1, %v4865_v10  ;;  %v4888_v33 = vld [vmem:[%s5161_s13 + $0x278] sm:$0xff]   ;;  %v4890_v35 = vld [vmem:[%s5161_s13 + $0x280] sm:$0xff]   ;;  %v4892_v37 = vld [vmem:[%s5161_s13 + $0x288] sm:$0xff]  }
  0x26   : > { %4676 = vmatprep.mubr.msk.bf16.mxu1 %vm1168_vm1, %v4866_v11  ;;  %v4893_v38 = vld [vmem:[%s5161_s13 + $0x90] sm:$0xff]   ;;  %v4895_v40 = vld [vmem:[%s5161_s13 + $0x98] sm:$0xff]   ;;  %v4897_v42 = vld [vmem:[%s5161_s13 + $0xa0] sm:$0xff]  }
  0x27   : > { %v4894_v39 = vld [vmem:[%s5161_s13 + $0x290] sm:$0xff]   ;;  %v4896_v41 = vld [vmem:[%s5161_s13 + $0x298] sm:$0xff]   ;;  %v4898_v43 = vld [vmem:[%s5161_s13 + $0x2a0] sm:$0xff]  }
  0x28   : > { %v4899_v44 = vld [vmem:[%s5161_s13 + $0xa8] sm:$0xff]   ;;  %v4901_v46 = vld [vmem:[%s5161_s13 + $0xb0] sm:$0xff]   ;;  %v4903_v48 = vld [vmem:[%s5161_s13 + $0xb8] sm:$0xff]  }
  0x29   : > { %v4900_v45 = vld [vmem:[%s5161_s13 + $0x2a8] sm:$0xff]   ;;  %v4902_v47 = vld [vmem:[%s5161_s13 + $0x2b0] sm:$0xff]   ;;  %v4904_v49 = vld [vmem:[%s5161_s13 + $0x2b8] sm:$0xff]  }
  0x2a   : > { %v4905_v50 = vld [vmem:[%s5161_s13 + $0xc0] sm:$0xff]   ;;  %v4907_v52 = vld [vmem:[%s5161_s13 + $0xc8] sm:$0xff]   ;;  %v4909_v54 = vld [vmem:[%s5161_s13 + $0xd0] sm:$0xff]  }
  0x2b   : > { %v4906_v51 = vld [vmem:[%s5161_s13 + $0x2c0] sm:$0xff]   ;;  %v4908_v53 = vld [vmem:[%s5161_s13 + $0x2c8] sm:$0xff]   ;;  %v4910_v55 = vld [vmem:[%s5161_s13 + $0x2d0] sm:$0xff]  }
  0x2c   : > { %4549 = vmatmul.mubr.msk.bf16.gmra.mxu0 %vm1168_vm1, %v4867_v12  ;;  %v4911_v56 = vld [vmem:[%s5161_s13 + $0xd8] sm:$0xff]   ;;  %v4913_v58 = vld [vmem:[%s5161_s13 + $0xe0] sm:$0xff]   ;;  %v4915_v60 = vld [vmem:[%s5161_s13 + $0xe8] sm:$0xff]  }
  0x2d   : > { %4677 = vmatmul.mubr.msk.bf16.gmra.mxu1 %vm1168_vm1, %v4868_v13  ;;  %4552 = vmatprep.mubr.msk.bf16.mxu0 %vm1168_vm1, %v4869_v14  ;;  %v4912_v57 = vld [vmem:[%s5161_s13 + $0x2d8] sm:$0xff]   ;;  %v4914_v59 = vld [vmem:[%s5161_s13 + $0x2e0] sm:$0xff]   ;;  %v4916_v61 = vld [vmem:[%s5161_s13 + $0x2e8] sm:$0xff]  }
  0x2e   : > { %4680 = vmatprep.mubr.msk.bf16.mxu1 %vm1168_vm1, %v4870_v15  ;;  %v4917_v62 = vld [vmem:[%s5161_s13 + $0xf0] sm:$0xff]   ;;  %v4919_v0 = vld [vmem:[%s5161_s13 + $0xf8] sm:$0xff]   ;;  %v4921_v2 = vld [vmem:[%s5161_s13 + $0x100] sm:$0xff]  }
  0x2f   : > { %v4918_v63 = vld [vmem:[%s5161_s13 + $0x2f0] sm:$0xff]   ;;  %v4920_v1 = vld [vmem:[%s5161_s13 + $0x2f8] sm:$0xff]   ;;  %v4922_v3 = vld [vmem:[%s5161_s13 + $0x300] sm:$0xff]  }
  0x30   : > { %v4923_v4 = vld [vmem:[%s5161_s13 + $0x108] sm:$0xff]   ;;  %v4925_v6 = vld [vmem:[%s5161_s13 + $0x110] sm:$0xff]   ;;  %v4927_v8 = vld [vmem:[%s5161_s13 + $0x118] sm:$0xff]  }
  0x31   : > { %v4924_v5 = vld [vmem:[%s5161_s13 + $0x308] sm:$0xff]   ;;  %v4926_v7 = vld [vmem:[%s5161_s13 + $0x310] sm:$0xff]   ;;  %v4928_v9 = vld [vmem:[%s5161_s13 + $0x318] sm:$0xff]  }
  0x32   : > { %v4929_v10 = vld [vmem:[%s5161_s13 + $0x120] sm:$0xff]   ;;  %v4931_v12 = vld [vmem:[%s5161_s13 + $0x128] sm:$0xff]   ;;  %v4933_v14 = vld [vmem:[%s5161_s13 + $0x130] sm:$0xff]  }
  0x33   : > { %v4930_v11 = vld [vmem:[%s5161_s13 + $0x320] sm:$0xff]   ;;  %v4932_v13 = vld [vmem:[%s5161_s13 + $0x328] sm:$0xff]   ;;  %v4934_v15 = vld [vmem:[%s5161_s13 + $0x330] sm:$0xff]  }
  0x34   : > { %4553 = vmatmul.mubr.msk.bf16.gmra.mxu0 %vm1168_vm1, %v4871_v16  ;;  %v4935_v16 = vld [vmem:[%s5161_s13 + $0x138] sm:$0xff]  }
  0x35   : > { %4681 = vmatmul.mubr.msk.bf16.gmra.mxu1 %vm1168_vm1, %v4872_v17  ;;  %4556 = vmatprep.mubr.msk.bf16.mxu0 %vm1168_vm1, %v4873_v18  ;;  %v4936_v17 = vld [vmem:[%s5161_s13 + $0x338] sm:$0xff]   ;;  %v4937_v18 = vld [vmem:[%s5161_s13 + $0x140] sm:$0xff]  }
  0x36   : > { %4684 = vmatprep.mubr.msk.bf16.mxu1 %vm1168_vm1, %v4874_v19  ;;  %v4938_v19 = vld [vmem:[%s5161_s13 + $0x340] sm:$0xff]  }
  0x3c   : > { %4557 = vmatmul.mubr.msk.bf16.gmra.mxu0 %vm1168_vm1, %v4875_v20  ;;  %v4939_v20 = vld [vmem:[%s5161_s13 + $0x148] sm:$0xff]  }
  0x3d   : > { %4685 = vmatmul.mubr.msk.bf16.gmra.mxu1 %vm1168_vm1, %v4876_v21  ;;  %4560 = vmatprep.mubr.msk.bf16.mxu0 %vm1168_vm1, %v4877_v22  ;;  %v4940_v21 = vld [vmem:[%s5161_s13 + $0x348] sm:$0xff]   ;;  %v4941_v22 = vld [vmem:[%s5161_s13 + $0x150] sm:$0xff]  }
  0x3e   : > { %4688 = vmatprep.mubr.msk.bf16.mxu1 %vm1168_vm1, %v4878_v23  ;;  %v4942_v23 = vld [vmem:[%s5161_s13 + $0x350] sm:$0xff]  }
  0x44   : > { %4561 = vmatmul.mubr.msk.bf16.gmra.mxu0 %vm1168_vm1, %v4879_v24  ;;  %v4943_v24 = vld [vmem:[%s5161_s13 + $0x158] sm:$0xff]  }
  0x45   : > { %4689 = vmatmul.mubr.msk.bf16.gmra.mxu1 %vm1168_vm1, %v4880_v25  ;;  %4564 = vmatprep.mubr.msk.bf16.mxu0 %vm1168_vm1, %v4881_v26  ;;  %v4944_v25 = vld [vmem:[%s5161_s13 + $0x358] sm:$0xff]   ;;  %v4945_v26 = vld [vmem:[%s5161_s13 + $0x160] sm:$0xff]  }
  0x46   : > { %4692 = vmatprep.mubr.msk.bf16.mxu1 %vm1168_vm1, %v4882_v27  ;;  %v4946_v27 = vld [vmem:[%s5161_s13 + $0x360] sm:$0xff]  }
  0x4c   : > { %4565 = vmatmul.mubr.msk.bf16.gmra.mxu0 %vm1168_vm1, %v4883_v28  ;;  %v4947_v28 = vld [vmem:[%s5161_s13 + $0x168] sm:$0xff]  }
  0x4d   : > { %4693 = vmatmul.mubr.msk.bf16.gmra.mxu1 %vm1168_vm1, %v4884_v29  ;;  %4568 = vmatprep.mubr.msk.bf16.mxu0 %vm1168_vm1, %v4885_v30  ;;  %v4948_v29 = vld [vmem:[%s5161_s13 + $0x368] sm:$0xff]   ;;  %v4949_v30 = vld [vmem:[%s5161_s13 + $0x170] sm:$0xff]  }
  0x4e   : > { %4696 = vmatprep.mubr.msk.bf16.mxu1 %vm1168_vm1, %v4886_v31  ;;  %v4950_v31 = vld [vmem:[%s5161_s13 + $0x370] sm:$0xff]  }
  0x54   : > { %4569 = vmatmul.mubr.msk.bf16.gmra.mxu0 %vm1168_vm1, %v4887_v32  ;;  %v4951_v32 = vld [vmem:[%s5161_s13 + $0x178] sm:$0xff]  }
  0x55   : > { %4697 = vmatmul.mubr.msk.bf16.gmra.mxu1 %vm1168_vm1, %v4888_v33  ;;  %4572 = vmatprep.mubr.msk.bf16.mxu0 %vm1168_vm1, %v4889_v34  ;;  %v4952_v33 = vld [vmem:[%s5161_s13 + $0x378] sm:$0xff]   ;;  %v4953_v34 = vld [vmem:[%s5161_s13 + $0x180] sm:$0xff]  }
  0x56   : > { %4700 = vmatprep.mubr.msk.bf16.mxu1 %vm1168_vm1, %v4890_v35  ;;  %v4954_v35 = vld [vmem:[%s5161_s13 + $0x380] sm:$0xff]  }
  0x5c   : > { %4573 = vmatmul.mubr.msk.bf16.gmra.mxu0 %vm1168_vm1, %v4891_v36  ;;  %v4955_v36 = vld [vmem:[%s5161_s13 + $0x188] sm:$0xff]  }
  0x5d   : > { %4701 = vmatmul.mubr.msk.bf16.gmra.mxu1 %vm1168_vm1, %v4892_v37  ;;  %4576 = vmatprep.mubr.msk.bf16.mxu0 %vm1168_vm1, %v4893_v38  ;;  %v4956_v37 = vld [vmem:[%s5161_s13 + $0x388] sm:$0xff]   ;;  %v4957_v38 = vld [vmem:[%s5161_s13 + $0x190] sm:$0xff]  }
  0x5e   : > { %4704 = vmatprep.mubr.msk.bf16.mxu1 %vm1168_vm1, %v4894_v39  ;;  %v5365_v39 = vld [vmem:[%s7025_s2] ss:$0 sm:$0xff] }
  0x64   : > { %4577 = vmatmul.mubr.msk.bf16.gmra.mxu0 %vm1168_vm1, %v4895_v40  ;;  %v4958_v40 = vld [vmem:[%s5161_s13 + $0x390] sm:$0xff]  }
  0x65   : > { %4705 = vmatmul.mubr.msk.bf16.gmra.mxu1 %vm1168_vm1, %v4896_v41  ;;  %4580 = vmatprep.mubr.msk.bf16.mxu0 %vm1168_vm1, %v4897_v42 }
  0x66   : > { %4708 = vmatprep.mubr.msk.bf16.mxu1 %vm1168_vm1, %v4898_v43 }
  0x6c   : > { %4581 = vmatmul.mubr.msk.bf16.gmra.mxu0 %vm1168_vm1, %v4899_v44 }
  0x6d   : > { %4709 = vmatmul.mubr.msk.bf16.gmra.mxu1 %vm1168_vm1, %v4900_v45  ;;  %4584 = vmatprep.mubr.msk.bf16.mxu0 %vm1168_vm1, %v4901_v46 }
  0x6e   : > { %4712 = vmatprep.mubr.msk.bf16.mxu1 %vm1168_vm1, %v4902_v47 }
  0x74   : > { %4585 = vmatmul.mubr.msk.bf16.gmra.mxu0 %vm1168_vm1, %v4903_v48 }
  0x75   : > { %4713 = vmatmul.mubr.msk.bf16.gmra.mxu1 %vm1168_vm1, %v4904_v49  ;;  %4588 = vmatprep.mubr.msk.bf16.mxu0 %vm1168_vm1, %v4905_v50 }
  0x76   : > { %4716 = vmatprep.mubr.msk.bf16.mxu1 %vm1168_vm1, %v4906_v51 }
  0x7c   : > { %4589 = vmatmul.mubr.msk.bf16.gmra.mxu0 %vm1168_vm1, %v4907_v52  ;;  %v4959_v52 = vld [vmem:[%s5161_s13 + $0x198] sm:$0xff]  }
  0x7d   : > { %4717 = vmatmul.mubr.msk.bf16.gmra.mxu1 %vm1168_vm1, %v4908_v53  ;;  %4592 = vmatprep.mubr.msk.bf16.mxu0 %vm1168_vm1, %v4909_v54 }
  0x7e   : > { %4720 = vmatprep.mubr.msk.bf16.mxu1 %vm1168_vm1, %v4910_v55 }
  0x84   : > { %4593 = vmatmul.mubr.msk.bf16.gmra.mxu0 %vm1168_vm1, %v4911_v56  ;;  %v4960_v56 = vld [vmem:[%s5161_s13 + $0x398] sm:$0xff]  }
  0x85   : > { %4721 = vmatmul.mubr.msk.bf16.gmra.mxu1 %vm1168_vm1, %v4912_v57  ;;  %4596 = vmatprep.mubr.msk.bf16.mxu0 %vm1168_vm1, %v4913_v58  ;;  %v4961_v57 = vld [vmem:[%s5161_s13 + $0x1a0] sm:$0xff]  }
  0x86   : > { %4724 = vmatprep.mubr.msk.bf16.mxu1 %vm1168_vm1, %v4914_v59 }
  0x8c   : > { %4597 = vmatmul.mubr.msk.bf16.gmra.mxu0 %vm1168_vm1, %v4915_v60 }
  0x8d   : > { %4725 = vmatmul.mubr.msk.bf16.gmra.mxu1 %vm1168_vm1, %v4916_v61  ;;  %4600 = vmatprep.mubr.msk.bf16.mxu0 %vm1168_vm1, %v4917_v62  ;;  %v4962_v61 = vld [vmem:[%s5161_s13 + $0x3a0] sm:$0xff]  }
  0x8e   : > { %4728 = vmatprep.mubr.msk.bf16.mxu1 %vm1168_vm1, %v4918_v63 }
  0x94   : > { %4601 = vmatmul.mubr.msk.bf16.gmra.mxu0 %vm1168_vm1, %v4919_v0 }
  0x95   : > { %4729 = vmatmul.mubr.msk.bf16.gmra.mxu1 %vm1168_vm1, %v4920_v1  ;;  %4604 = vmatprep.mubr.msk.bf16.mxu0 %vm1168_vm1, %v4921_v2 }
  0x96   : > { %4732 = vmatprep.mubr.msk.bf16.mxu1 %vm1168_vm1, %v4922_v3 }
  0x9c   : > { %4605 = vmatmul.mubr.msk.bf16.gmra.mxu0 %vm1168_vm1, %v4923_v4 }
  0x9d   : > { %4733 = vmatmul.mubr.msk.bf16.gmra.mxu1 %vm1168_vm1, %v4924_v5  ;;  %4608 = vmatprep.mubr.msk.bf16.mxu0 %vm1168_vm1, %v4925_v6 }
  0x9e   : > { %4736 = vmatprep.mubr.msk.bf16.mxu1 %vm1168_vm1, %v4926_v7 }
  0xa4   : > { %4609 = vmatmul.mubr.msk.bf16.gmra.mxu0 %vm1168_vm1, %v4927_v8 }
  0xa5   : > { %4737 = vmatmul.mubr.msk.bf16.gmra.mxu1 %vm1168_vm1, %v4928_v9  ;;  %4612 = vmatprep.mubr.msk.bf16.mxu0 %vm1168_vm1, %v4929_v10 }
  0xa6   : > { %4740 = vmatprep.mubr.msk.bf16.mxu1 %vm1168_vm1, %v4930_v11 }
  0xac   : > { %4613 = vmatmul.mubr.msk.bf16.gmra.mxu0 %vm1168_vm1, %v4931_v12 }
  0xad   : > { %4741 = vmatmul.mubr.msk.bf16.gmra.mxu1 %vm1168_vm1, %v4932_v13  ;;  %4616 = vmatprep.mubr.msk.bf16.mxu0 %vm1168_vm1, %v4933_v14 }
  0xae   : > { %4744 = vmatprep.mubr.msk.bf16.mxu1 %vm1168_vm1, %v4934_v15 }
  0xb4   : > { %4617 = vmatmul.mubr.msk.bf16.gmra.mxu0 %vm1168_vm1, %v4935_v16 }
  0xb5   : > { %4745 = vmatmul.mubr.msk.bf16.gmra.mxu1 %vm1168_vm1, %v4936_v17  ;;  %4620 = vmatprep.mubr.msk.bf16.mxu0 %vm1168_vm1, %v4937_v18 }
  0xb6   : > { %4748 = vmatprep.mubr.msk.bf16.mxu1 %vm1168_vm1, %v4938_v19 }
  0xbc   : > { %4621 = vmatmul.mubr.msk.bf16.gmra.mxu0 %vm1168_vm1, %v4939_v20 }
  0xbd   : > { %4749 = vmatmul.mubr.msk.bf16.gmra.mxu1 %vm1168_vm1, %v4940_v21  ;;  %4624 = vmatprep.mubr.msk.bf16.mxu0 %vm1168_vm1, %v4941_v22 }
  0xbe   : > { %4752 = vmatprep.mubr.msk.bf16.mxu1 %vm1168_vm1, %v4942_v23 }
  0xc4   : > { %4625 = vmatmul.mubr.msk.bf16.gmra.mxu0 %vm1168_vm1, %v4943_v24 }
  0xc5   : > { %4753 = vmatmul.mubr.msk.bf16.gmra.mxu1 %vm1168_vm1, %v4944_v25  ;;  %4628 = vmatprep.mubr.msk.bf16.mxu0 %vm1168_vm1, %v4945_v26 }
  0xc6   : > { %4756 = vmatprep.mubr.msk.bf16.mxu1 %vm1168_vm1, %v4946_v27  ;;  %v4963_v27 = vld [vmem:[%s5161_s13 + $0x1a8] sm:$0xff]  }
  0xcc   : > { %4629 = vmatmul.mubr.msk.bf16.gmra.mxu0 %vm1168_vm1, %v4947_v28 }
  0xcd   : > { %4757 = vmatmul.mubr.msk.bf16.gmra.mxu1 %vm1168_vm1, %v4948_v29  ;;  %4632 = vmatprep.mubr.msk.bf16.mxu0 %vm1168_vm1, %v4949_v30 }
  0xce   : > { %4760 = vmatprep.mubr.msk.bf16.mxu1 %vm1168_vm1, %v4950_v31 }
  0xd4   : > { %4633 = vmatmul.mubr.msk.bf16.gmra.mxu0 %vm1168_vm1, %v4951_v32 }
  0xd5   : > { %4761 = vmatmul.mubr.msk.bf16.gmra.mxu1 %vm1168_vm1, %v4952_v33  ;;  %4636 = vmatprep.mubr.msk.bf16.mxu0 %vm1168_vm1, %v4953_v34  ;;  %v4964_v33 = vld [vmem:[%s5161_s13 + $0x3a8] sm:$0xff]   ;;  %v4965_v34 = vld [vmem:[%s5161_s13 + $0x1b0] sm:$0xff]  }
  0xd6   : > { %4764 = vmatprep.mubr.msk.bf16.mxu1 %vm1168_vm1, %v4954_v35 }
  0xdc   : > { %v4542_v41 = vpop.f32.mrf.mxu0  ;;  %4637 = vmatmul.mubr.msk.bf16.gmra.mxu0 %vm1168_vm1, %v4955_v36 }
  0xdd   : > { %v1600_v42 = vadd.f32 %v4542_v41, %v5365_v39  ;;  %v4670_v43 = vpop.f32.mrf.mxu1  ;;  %4765 = vmatmul.mubr.msk.bf16.gmra.mxu1 %vm1168_vm1, %v4956_v37  ;;  %4640 = vmatprep.mubr.msk.bf16.mxu0 %vm1168_vm1, %v4957_v38  ;;  %v4966_v41 = vld [vmem:[%s5161_s13 + $0x3b0] sm:$0xff]  }
  0xde   : > { %v2112_v44 = vadd.f32 %v4670_v43, %v5365_v39  ;;  %v1591_v45 = vpop.f32.mrf.mxu0  ;;  %4768 = vmatprep.mubr.msk.bf16.mxu1 %vm1168_vm1, %v4958_v40 }
  0xdf   : > { %v2616_v46 = vmax.f32 %v1600_v42, 0.0  ;;  %v1592_v47 = vadd.f32 %v5365_v39, %v1591_v45  ;;  %v2103_v48 = vpop.f32.mrf.mxu1 }
  0xe0   : > { %v2744_v49 = vmax.f32 %v2112_v44, 0.0  ;;  %v2104_v50 = vadd.f32 %v5365_v39, %v2103_v48  ;;  %v4543_v51 = vpop.f32.mrf.mxu0 }
  0xe1   : > { %v2614_v53 = vmax.f32 %v1592_v47, 0.0  ;;  %v1603_v54 = vadd.f32 %v4543_v51, %v5365_v39  ;;  %v4671_v55 = vpop.f32.mrf.mxu1  ;;  %v2875_v62 = vsel %vm261_vm2, %v2616_v46, 0.0  ;;  %v3453_v63 = vsel %vm261_vm2, %v2616_v46, -inf }
  0xe2   : > { %v2742_v58 = vmax.f32 %v2104_v50, 0.0  ;;  %v2115_v59 = vadd.f32 %v4671_v55, %v5365_v39  ;;  %v1594_v60 = vpop.f32.mrf.mxu0  ;;  %v3151_v2 = vsel %vm261_vm2, %v2744_v49, 0.0  ;;  %v3729_v3 = vsel %vm261_vm2, %v2744_v49, -inf }
  0xe3   : > { %v1595_v0 = vadd.f32 %v5365_v39, %v1594_v60  ;;  %v2106_v1 = vpop.f32.mrf.mxu1  ;;  %v2872_v4 = vsel %vm261_vm2, %v2614_v53, 0.0  ;;  %v3450_v7 = vsel %vm261_vm2, %v2614_v53, -inf  ;;  %v2617_v9 = vmax.f32 %v1603_v54, 0.0 }
  0xe4   : > { %v2107_v5 = vadd.f32 %v5365_v39, %v2106_v1  ;;  %v4546_v6 = vpop.f32.mrf.mxu0  ;;  %4641 = vmatmul.mubr.msk.bf16.gmra.mxu0 %vm1168_vm1, %v4959_v52  ;;  %v3148_v8 = vsel %vm261_vm2, %v2742_v58, 0.0  ;;  %v3726_v12 = vsel %vm261_vm2, %v2742_v58, -inf  ;;  %v2745_v13 = vmax.f32 %v2115_v59, 0.0 }
  0xe5   : > { %v2615_v10 = vmax.f32 %v1595_v0, 0.0  ;;  %v4674_v11 = vpop.f32.mrf.mxu1  ;;  %4769 = vmatmul.mubr.msk.bf16.gmra.mxu1 %vm1168_vm1, %v4960_v56  ;;  %4644 = vmatprep.mubr.msk.bf16.mxu0 %vm1168_vm1, %v4961_v57  ;;  %v1616_v15 = vadd.f32 %v4546_v6, %v5365_v39  ;;  %v2877_v28 = vsel %vm261_vm2, %v2617_v9, 0.0  ;;  %v3455_v29 = vsel %vm261_vm2, %v2617_v9, -inf }
  0xe6   : > { %v2743_v14 = vmax.f32 %v2107_v5, 0.0  ;;  %v1607_v16 = vpop.f32.mrf.mxu0  ;;  %4772 = vmatprep.mubr.msk.bf16.mxu1 %vm1168_vm1, %v4962_v61  ;;  %v5400_v19 = vadd.f32 %v4674_v11, %v5365_v39  ;;  %v3153_v35 = vsel %vm261_vm2, %v2745_v13, 0.0  ;;  %v3731_v42 = vsel %vm261_vm2, %v2745_v13, -inf }
  0xe7   : > { %v2873_v17 = vsel %vm261_vm2, %v2615_v10, 0.0  ;;  %v3451_v18 = vsel %vm261_vm2, %v2615_v10, -inf  ;;  %v1608_v20 = vadd.f32 %v5365_v39, %v1607_v16  ;;  %v2119_v21 = vpop.f32.mrf.mxu1  ;;  %v2620_v47 = vmax.f32 %v1616_v15, 0.0  ;;  %v4969_v15 = vld [vmem:[%s5161_s13 + $0x1c0] sm:$0xff]  }
  0xe8   : > { %v2874_v22 = vadd.f32 %v2873_v17, %v2872_v4  ;;  %v3452_v23 = vmax.f32 %v3450_v7, %v3451_v18  ;;  %v3149_v24 = vsel %vm261_vm2, %v2743_v14, 0.0  ;;  %v3727_v25 = vsel %vm261_vm2, %v2743_v14, -inf  ;;  %v4547_v26 = vpop.f32.mrf.mxu0  ;;  %v4968_v14 = vld [vmem:[%s5161_s13 + $0x3b8] sm:$0xff]  }
  0xe9   : > { %v3150_v30 = vadd.f32 %v3149_v24, %v3148_v8  ;;  %v3728_v31 = vmax.f32 %v3726_v12, %v3727_v25  ;;  %v4675_v32 = vpop.f32.mrf.mxu1  ;;  %v2618_v38 = vmax.f32 %v1608_v20, 0.0  ;;  %v2120_v45 = vadd.f32 %v5365_v39, %v2119_v21  ;;  %v4967_v8 = vld [vmem:[%s5161_s13 + $0x1b8] sm:$0xff]   ;;  %v4970_v21 = vld [vmem:[%s5161_s13 + $0x3c0] sm:$0xff]  }
  0xea   : > { %v2876_v36 = vadd.f32 %v2875_v62, %v2874_v22  ;;  %v3454_v37 = vmax.f32 %v3452_v23, %v3453_v63  ;;  %v1610_v40 = vpop.f32.mrf.mxu0  ;;  %v2748_v48 = vmax.f32 %v5400_v19, 0.0  ;;  %v1619_v50 = vadd.f32 %v4547_v26, %v5365_v39 }
  0xeb   : > { %v3152_v43 = vadd.f32 %v3151_v2, %v3150_v30  ;;  %v3730_v44 = vmax.f32 %v3728_v31, %v3729_v3  ;;  %v2122_v46 = vpop.f32.mrf.mxu1  ;;  %v2879_v52 = vsel %vm261_vm2, %v2618_v38, 0.0  ;;  %v2746_v54 = vmax.f32 %v2120_v45, 0.0 }
  0xec   : > { %v2878_v49 = vadd.f32 %v2877_v28, %v2876_v36  ;;  %v4550_v51 = vpop.f32.mrf.mxu0  ;;  %4645 = vmatmul.mubr.msk.bf16.gmra.mxu0 %vm1168_vm1, %v4963_v27  ;;  %v3456_v53 = vmax.f32 %v3454_v37, %v3455_v29  ;;  %v3457_v58 = vsel %vm261_vm2, %v2618_v38, -inf  ;;  %v2131_v60 = vadd.f32 %v4675_v32, %v5365_v39 }
  0xed   : > { %v3154_v55 = vadd.f32 %v3153_v35, %v3152_v43  ;;  %v4678_v56 = vpop.f32.mrf.mxu1  ;;  %4773 = vmatmul.mubr.msk.bf16.gmra.mxu1 %vm1168_vm1, %v4964_v33  ;;  %4648 = vmatprep.mubr.msk.bf16.mxu0 %vm1168_vm1, %v4965_v34  ;;  %v3732_v59 = vmax.f32 %v3730_v44, %v3731_v42  ;;  %v3155_v63 = vsel %vm261_vm2, %v2746_v54, 0.0  ;;  %v3733_v0 = vsel %vm261_vm2, %v2746_v54, -inf }
  0xee   : > { %v2880_v57 = vadd.f32 %v2879_v52, %v2878_v49  ;;  %v1623_v61 = vpop.f32.mrf.mxu0  ;;  %4776 = vmatprep.mubr.msk.bf16.mxu1 %vm1168_vm1, %v4966_v41  ;;  %v3458_v62 = vmax.f32 %v3456_v53, %v3457_v58  ;;  %v1611_v1 = vadd.f32 %v5365_v39, %v1610_v40  ;;  %v2883_v3 = vsel %vm261_vm2, %v2620_v47, 0.0  ;;  %v4971_v53 = vld [vmem:[%s5161_s13 + $0x1c8] sm:$0xff]  }
  0xef   : > { %v2135_v2 = vpop.f32.mrf.mxu1  ;;  %v3461_v4 = vsel %vm261_vm2, %v2620_v47, -inf  ;;  %v3156_v5 = vadd.f32 %v3155_v63, %v3154_v55  ;;  %v3734_v6 = vmax.f32 %v3732_v59, %v3733_v0  ;;  %v3159_v9 = vsel %vm261_vm2, %v2748_v48, 0.0  ;;  %v4972_v59 = vld [vmem:[%s5161_s13 + $0x3c8] sm:$0xff]  }
  0xf0   : > { %v4551_v7 = vpop.f32.mrf.mxu0  ;;  %v2621_v10 = vmax.f32 %v1619_v50, 0.0  ;;  %v2619_v11 = vmax.f32 %v1611_v1, 0.0  ;;  %v2123_v12 = vadd.f32 %v5365_v39, %v2122_v46  ;;  %v3737_v16 = vsel %vm261_vm2, %v2748_v48, -inf  ;;  %v4973_v1 = vld [vmem:[%s5161_s13 + $0x1d0] sm:$0xff]  }
  0xf1   : > { %v5431_v13 = vpop.f32.mrf.mxu1  ;;  %v2749_v17 = vmax.f32 %v2131_v60, 0.0  ;;  %v1624_v18 = vadd.f32 %v5365_v39, %v1623_v61  ;;  %v2136_v19 = vadd.f32 %v5365_v39, %v2135_v2  ;;  %v1632_v24 = vadd.f32 %v4550_v51, %v5365_v39  ;;  %v4974_v2 = vld [vmem:[%s5161_s13 + $0x3d0] sm:$0xff]  }
  0xf2   : > { %v1626_v20 = vpop.f32.mrf.mxu0  ;;  %v2881_v22 = vsel %vm261_vm2, %v2619_v11, 0.0  ;;  %v3459_v23 = vsel %vm261_vm2, %v2619_v11, -inf  ;;  %v5443_v25 = vadd.f32 %v4678_v56, %v5365_v39  ;;  %v2747_v29 = vmax.f32 %v2123_v12, 0.0 }
  0xf3   : > { %v2138_v26 = vpop.f32.mrf.mxu1  ;;  %v2882_v27 = vadd.f32 %v2881_v22, %v2880_v57  ;;  %v3460_v28 = vmax.f32 %v3458_v62, %v3459_v23  ;;  %v5446_v30 = vadd.f32 %v4551_v7, %v5365_v39  ;;  %v2885_v32 = vsel %vm261_vm2, %v2621_v10, 0.0 }
  0xf4   : > { %v4554_v31 = vpop.f32.mrf.mxu0  ;;  %4649 = vmatmul.mubr.msk.bf16.gmra.mxu0 %vm1168_vm1, %v4967_v8  ;;  %v3463_v33 = vsel %vm261_vm2, %v2621_v10, -inf  ;;  %v2622_v34 = vmax.f32 %v1624_v18, 0.0  ;;  %v2750_v35 = vmax.f32 %v2136_v19, 0.0  ;;  %v3157_v40 = vsel %vm261_vm2, %v2747_v29, 0.0 }
  0xf5   : > { %v4682_v36 = vpop.f32.mrf.mxu1  ;;  %4777 = vmatmul.mubr.msk.bf16.gmra.mxu1 %vm1168_vm1, %v4968_v14  ;;  %4652 = vmatprep.mubr.msk.bf16.mxu0 %vm1168_vm1, %v4969_v15  ;;  %v2884_v37 = vadd.f32 %v2883_v3, %v2882_v27  ;;  %v3462_v38 = vmax.f32 %v3460_v28, %v3461_v4  ;;  %v3735_v41 = vsel %vm261_vm2, %v2747_v29, -inf  ;;  %v3161_v43 = vsel %vm261_vm2, %v2749_v17, 0.0 }
  0xf6   : > { %v1639_v42 = vpop.f32.mrf.mxu0  ;;  %4780 = vmatprep.mubr.msk.bf16.mxu1 %vm1168_vm1, %v4970_v21  ;;  %v3158_v44 = vadd.f32 %v3157_v40, %v3156_v5  ;;  %v3736_v45 = vmax.f32 %v3734_v6, %v3735_v41  ;;  %v2624_v46 = vmax.f32 %v1632_v24, 0.0  ;;  %v3739_v48 = vsel %vm261_vm2, %v2749_v17, -inf  ;;  %v4976_v40 = vld [vmem:[%s5161_s13 + $0x3d8] sm:$0xff]   ;;  %v4977_v41 = vld [vmem:[%s5161_s13 + $0x1e0] sm:$0xff]  }
  0xf7   : > { %v2151_v47 = vpop.f32.mrf.mxu1  ;;  %v2752_v49 = vmax.f32 %v5443_v25, 0.0  ;;  %v2886_v50 = vadd.f32 %v2885_v32, %v2884_v37  ;;  %v2625_v51 = vmax.f32 %v5446_v30, 0.0  ;;  %v2887_v56 = vsel %vm261_vm2, %v2622_v34, 0.0 }
  0xf8   : > { %v5460_v52 = vpop.f32.mrf.mxu0  ;;  %v3160_v54 = vadd.f32 %v3159_v9, %v3158_v44  ;;  %v3738_v55 = vmax.f32 %v3736_v45, %v3737_v16  ;;  %v3464_v57 = vmax.f32 %v3462_v38, %v3463_v33  ;;  %v3465_v61 = vsel %vm261_vm2, %v2622_v34, -inf  ;;  %v4975_v33 = vld [vmem:[%s5161_s13 + $0x1d8] sm:$0xff]  }
  0xf9   : > { %v5464_v58 = vpop.f32.mrf.mxu1  ;;  %v2888_v60 = vadd.f32 %v2887_v56, %v2886_v50  ;;  %v3163_v62 = vsel %vm261_vm2, %v2750_v35, 0.0  ;;  %v3741_v63 = vsel %vm261_vm2, %v2750_v35, -inf  ;;  %v2891_v3 = vsel %vm261_vm2, %v2624_v46, 0.0 }
  0xfa   : > { %v5470_v0 = vpop.f32.mrf.mxu0  ;;  %v3466_v4 = vmax.f32 %v3464_v57, %v3465_v61  ;;  %v3162_v5 = vadd.f32 %v3161_v43, %v3160_v54  ;;  %v3740_v6 = vmax.f32 %v3738_v55, %v3739_v48  ;;  %v3469_v8 = vsel %vm261_vm2, %v2624_v46, -inf }
  0xfb   : > { %v5475_v7 = vpop.f32.mrf.mxu1  ;;  %v2147_v9 = vadd.f32 %v5431_v13, %v5365_v39  ;;  %v1627_v10 = vadd.f32 %v5365_v39, %v1626_v20  ;;  %v2139_v11 = vadd.f32 %v5365_v39, %v2138_v26  ;;  %v3167_v14 = vsel %vm261_vm2, %v2752_v49, 0.0 }
  0xfc   : > { %v5482_v12 = vpop.f32.mrf.mxu0  ;;  %4653 = vmatmul.mubr.msk.bf16.gmra.mxu0 %vm1168_vm1, %v4971_v53  ;;  %v3164_v15 = vadd.f32 %v3163_v62, %v3162_v5  ;;  %v3742_v16 = vmax.f32 %v3740_v6, %v3741_v63  ;;  %v1640_v17 = vadd.f32 %v5365_v39, %v1639_v42  ;;  %v1648_v20 = vadd.f32 %v4554_v31, %v5365_v39 }
  0xfd   : > { %v5487_v18 = vpop.f32.mrf.mxu1  ;;  %4781 = vmatmul.mubr.msk.bf16.gmra.mxu1 %vm1168_vm1, %v4972_v59  ;;  %v2623_v19 = vmax.f32 %v1627_v10, 0.0  ;;  %v2751_v13 = vmax.f32 %v2139_v11, 0.0  ;;  %v5492_v21 = vadd.f32 %v4682_v36, %v5365_v39  ;;  %4656 = vmatprep.mubr.msk.bf16.mxu0 %vm1168_vm1, %v4973_v1  ;;  %v3745_v23 = vsel %vm261_vm2, %v2752_v49, -inf }
  0xfe   : > { %v5494_v22 = vpop.f32.mrf.mxu0  ;;  %4784 = vmatprep.mubr.msk.bf16.mxu1 %vm1168_vm1, %v4974_v2  ;;  %v2893_v24 = vsel %vm261_vm2, %v2625_v51, 0.0  ;;  %v3471_v25 = vsel %vm261_vm2, %v2625_v51, -inf  ;;  %v2753_v26 = vmax.f32 %v2147_v9, 0.0  ;;  %v2626_v30 = vmax.f32 %v1640_v17, 0.0  ;;  %v4979_v17 = vld [vmem:[%s5161_s13 + $0x1e8] sm:$0xff]  }
  0xff   : > { %v5501_v27 = vpop.f32.mrf.mxu1  ;;  %v2889_v28 = vsel %vm261_vm2, %v2623_v19, 0.0  ;;  %v3467_v29 = vsel %vm261_vm2, %v2623_v19, -inf  ;;  %v2152_v31 = vadd.f32 %v5365_v39, %v2151_v47  ;;  %v3165_v36 = vsel %vm261_vm2, %v2751_v13, 0.0  ;;  %v4978_v47 = vld [vmem:[%s5161_s13 + $0x3e0] sm:$0xff]  }
 0x100   : > { %v5506_v32 = vpop.f32.mrf.mxu0  ;;  %v2890_v34 = vadd.f32 %v2889_v28, %v2888_v60  ;;  %v3468_v35 = vmax.f32 %v3466_v4, %v3467_v29  ;;  %v3743_v37 = vsel %vm261_vm2, %v2751_v13, -inf  ;;  %v3166_v42 = vadd.f32 %v3165_v36, %v3164_v15 }
 0x101   : > { %v5511_v38 = vpop.f32.mrf.mxu1  ;;  %v3744_v43 = vmax.f32 %v3742_v16, %v3743_v37  ;;  %v2628_v44 = vmax.f32 %v1648_v20, 0.0  ;;  %v2756_v45 = vmax.f32 %v5492_v21, 0.0  ;;  %v3169_v48 = vsel %vm261_vm2, %v2753_v26, 0.0 }
 0x102   : > { %v5516_v46 = vpop.f32.mrf.mxu0  ;;  %v2892_v49 = vadd.f32 %v2891_v3, %v2890_v34  ;;  %v3470_v50 = vmax.f32 %v3468_v35, %v3469_v8  ;;  %v1651_v51 = vadd.f32 %v5460_v52, %v5365_v39  ;;  %v3747_v54 = vsel %vm261_vm2, %v2753_v26, -inf }
 0x103   : > { %v5522_v53 = vpop.f32.mrf.mxu1  ;;  %v3168_v55 = vadd.f32 %v3167_v14, %v3166_v42  ;;  %v3746_v56 = vmax.f32 %v3744_v43, %v3745_v23  ;;  %v2895_v57 = vsel %vm261_vm2, %v2626_v30, 0.0  ;;  %v3473_v62 = vsel %vm261_vm2, %v2626_v30, -inf }
 0x104   : > { %v5526_v59 = vpop.f32.mrf.mxu0  ;;  %4657 = vmatmul.mubr.msk.bf16.gmra.mxu0 %vm1168_vm1, %v4975_v33  ;;  %v2894_v60 = vadd.f32 %v2893_v24, %v2892_v49  ;;  %v3472_v61 = vmax.f32 %v3470_v50, %v3471_v25  ;;  %v2754_v63 = vmax.f32 %v2152_v31, 0.0  ;;  %v2163_v3 = vadd.f32 %v5464_v58, %v5365_v39  ;;  %v4980_v24 = vld [vmem:[%s5161_s13 + $0x3e8] sm:$0xff]   ;;  %v4981_v25 = vld [vmem:[%s5161_s13 + $0x1f0] sm:$0xff]  }
 0x105   : > { %v5530_v1 = vpop.f32.mrf.mxu1  ;;  %4785 = vmatmul.mubr.msk.bf16.gmra.mxu1 %vm1168_vm1, %v4976_v40  ;;  %4660 = vmatprep.mubr.msk.bf16.mxu0 %vm1168_vm1, %v4977_v41  ;;  %v3170_v52 = vadd.f32 %v3169_v48, %v3168_v55  ;;  %v3748_v2 = vmax.f32 %v3746_v56, %v3747_v54  ;;  %v1643_v4 = vadd.f32 %v5365_v39, %v5470_v0  ;;  %v2899_v14 = vsel %vm261_vm2, %v2628_v44, 0.0  ;;  %v4982_v33 = vld [vmem:[%s5161_s13 + $0x3f0] sm:$0xff]  }
 0x106   : > { %v5538_v5 = vpop.f32.mrf.mxu0  ;;  %4788 = vmatprep.mubr.msk.bf16.mxu1 %vm1168_vm1, %v4978_v47  ;;  %v2896_v6 = vadd.f32 %v2895_v57, %v2894_v60  ;;  %v3474_v8 = vmax.f32 %v3472_v61, %v3473_v62  ;;  %v3171_v9 = vsel %vm261_vm2, %v2754_v63, 0.0  ;;  %v3749_v10 = vsel %vm261_vm2, %v2754_v63, -inf }
 0x107   : > { %v5543_v11 = vpop.f32.mrf.mxu1  ;;  %v3477_v58 = vsel %vm261_vm2, %v2628_v44, -inf  ;;  %v3172_v15 = vadd.f32 %v3171_v9, %v3170_v52  ;;  %v3750_v0 = vmax.f32 %v3748_v2, %v3749_v10  ;;  %v3175_v19 = vsel %vm261_vm2, %v2756_v45, 0.0  ;;  %v4983_v2 = vld [vmem:[%s5161_s13 + $0x1f8] sm:$0xff]  }
 0x108   : > { %v5547_v16 = vpop.f32.mrf.mxu0  ;;  %v2629_v13 = vmax.f32 %v1651_v51, 0.0  ;;  %v2627_v20 = vmax.f32 %v1643_v4, 0.0  ;;  %v2155_v21 = vadd.f32 %v5365_v39, %v5475_v7  ;;  %v3753_v26 = vsel %vm261_vm2, %v2756_v45, -inf  ;;  %v4984_v10 = vld [vmem:[%s5161_s13 + $0x3f8] sm:$0xff]  }
 0x109   : > { %v5553_v23 = vpop.f32.mrf.mxu1  ;;  %v2757_v28 = vmax.f32 %v2163_v3, 0.0  ;;  %v1656_v29 = vadd.f32 %v5365_v39, %v5494_v22  ;;  %v2168_v30 = vadd.f32 %v5365_v39, %v5501_v27  ;;  %v1664_v35 = vadd.f32 %v5482_v12, %v5365_v39 }
 0x10a   : > { %v5562_v31 = vpop.f32.mrf.mxu0  ;;  %v2897_v34 = vsel %vm261_vm2, %v2627_v20, 0.0  ;;  %v3475_v7 = vsel %vm261_vm2, %v2627_v20, -inf  ;;  %v5571_v36 = vadd.f32 %v5487_v18, %v5365_v39  ;;  %v2755_v41 = vmax.f32 %v2155_v21, 0.0 }
 0x10b   : > { %v5573_v37 = vpop.f32.mrf.mxu1  ;;  %v2898_v22 = vadd.f32 %v2897_v34, %v2896_v6  ;;  %v3476_v40 = vmax.f32 %v3474_v8, %v3475_v7  ;;  %v5577_v27 = vadd.f32 %v5506_v32, %v5365_v39  ;;  %v2901_v43 = vsel %vm261_vm2, %v2629_v13, 0.0 }
 0x10c   : > { %v5579_v42 = vpop.f32.mrf.mxu0  ;;  %4661 = vmatmul.mubr.msk.bf16.gmra.mxu0 %vm1168_vm1, %v4979_v17  ;;  %v3479_v12 = vsel %vm261_vm2, %v2629_v13, -inf  ;;  %v2630_v44 = vmax.f32 %v1656_v29, 0.0  ;;  %v2758_v18 = vmax.f32 %v2168_v30, 0.0  ;;  %v3173_v48 = vsel %vm261_vm2, %v2755_v41, 0.0 }
 0x10d   : > { %v5584_v45 = vpop.f32.mrf.mxu1  ;;  %4789 = vmatmul.mubr.msk.bf16.gmra.mxu1 %vm1168_vm1, %v4980_v24  ;;  %4664 = vmatprep.mubr.msk.bf16.mxu0 %vm1168_vm1, %v4981_v25  ;;  %v2900_v47 = vadd.f32 %v2899_v14, %v2898_v22  ;;  %v3478_v32 = vmax.f32 %v3476_v40, %v3477_v58  ;;  %v3751_v49 = vsel %vm261_vm2, %v2755_v41, -inf  ;;  %v3177_v51 = vsel %vm261_vm2, %v2757_v28, 0.0 }
 0x10e   : > { %v5590_v50 = vpop.f32.mrf.mxu0  ;;  %4792 = vmatprep.mubr.msk.bf16.mxu1 %vm1168_vm1, %v4982_v33  ;;  %v3174_v54 = vadd.f32 %v3173_v48, %v3172_v15  ;;  %v3752_v55 = vmax.f32 %v3750_v0, %v3751_v49  ;;  %v2632_v56 = vmax.f32 %v1664_v35, 0.0  ;;  %v3755_v60 = vsel %vm261_vm2, %v2757_v28, -inf }
 0x10f   : > { %v5594_v57 = vpop.f32.mrf.mxu1  ;;  %v2760_v61 = vmax.f32 %v5571_v36, 0.0  ;;  %v2902_v62 = vadd.f32 %v2901_v43, %v2900_v47  ;;  %v2633_v63 = vmax.f32 %v5577_v27, 0.0  ;;  %v2903_v6 = vsel %vm261_vm2, %v2630_v44, 0.0 }
 0x110   : > { %v5599_v52 = vpop.f32.mrf.mxu0  ;;  %v3176_v3 = vadd.f32 %v3175_v19, %v3174_v54  ;;  %v3754_v4 = vmax.f32 %v3752_v55, %v3753_v26  ;;  %v3480_v8 = vmax.f32 %v3478_v32, %v3479_v12  ;;  %v3481_v58 = vsel %vm261_vm2, %v2630_v44, -inf }
 0x111   : > { %v5603_v9 = vpop.f32.mrf.mxu1  ;;  %v2904_v14 = vadd.f32 %v2903_v6, %v2902_v62  ;;  %v3179_v15 = vsel %vm261_vm2, %v2758_v18, 0.0  ;;  %v3757_v0 = vsel %vm261_vm2, %v2758_v18, -inf  ;;  %v2907_v13 = vsel %vm261_vm2, %v2632_v56, 0.0 }
 0x112   : > { %v5609_v17 = vpop.f32.mrf.mxu0  ;;  %v3482_v20 = vmax.f32 %v3480_v8, %v3481_v58  ;;  %v3178_v19 = vadd.f32 %v3177_v51, %v3176_v3  ;;  %v3756_v21 = vmax.f32 %v3754_v4, %v3755_v60  ;;  %v3485_v25 = vsel %vm261_vm2, %v2632_v56, -inf }
 0x113   : > { %v5612_v24 = vpop.f32.mrf.mxu1  ;;  %v2179_v26 = vadd.f32 %v5511_v38, %v5365_v39  ;;  %v1659_v28 = vadd.f32 %v5365_v39, %v5516_v46  ;;  %v2171_v29 = vadd.f32 %v5365_v39, %v5522_v53  ;;  %v3183_v33 = vsel %vm261_vm2, %v2760_v61, 0.0 }
 0x114   : > { %v5621_v30 = vpop.f32.mrf.mxu0  ;;  %4665 = vmatmul.mubr.msk.bf16.gmra.mxu0 %vm1168_vm1, %v4983_v2  ;;  %v3180_v34 = vadd.f32 %v3179_v15, %v3178_v19  ;;  %v3758_v7 = vmax.f32 %v3756_v21, %v3757_v0  ;;  %v1672_v35 = vadd.f32 %v5365_v39, %v5538_v5  ;;  %v1680_v53 = vadd.f32 %v5526_v59, %v5365_v39 }
 0x115   : > { %v5627_v36 = vpop.f32.mrf.mxu1  ;;  %4793 = vmatmul.mubr.msk.bf16.gmra.mxu1 %vm1168_vm1, %v4984_v10  ;;  %v2631_v38 = vmax.f32 %v1659_v28, 0.0  ;;  %v2759_v46 = vmax.f32 %v2171_v29, 0.0  ;;  %v2192_v22 = vadd.f32 %v5530_v1, %v5365_v39  ;;  %v3761_v41 = vsel %vm261_vm2, %v2760_v61, -inf }
 0x116   : > { %v5634_v40 = vpop.f32.mrf.mxu0  ;;  %v2909_v27 = vsel %vm261_vm2, %v2633_v63, 0.0  ;;  %v3487_v5 = vsel %vm261_vm2, %v2633_v63, -inf  ;;  %v2761_v43 = vmax.f32 %v2179_v26, 0.0  ;;  %v2634_v47 = vmax.f32 %v1672_v35, 0.0 }
 0x117   : > { %v5639_v12 = vpop.f32.mrf.mxu1  ;;  %v2905_v44 = vsel %vm261_vm2, %v2631_v38, 0.0  ;;  %v3483_v18 = vsel %vm261_vm2, %v2631_v38, -inf  ;;  %v2184_v59 = vadd.f32 %v5365_v39, %v5543_v11  ;;  %v3181_v49 = vsel %vm261_vm2, %v2759_v46, 0.0 }
 0x118   : > { %v5645_v1 = vpop.f32.mrf.mxu0  ;;  %v2906_v32 = vadd.f32 %v2905_v44, %v2904_v14  ;;  %v3484_v48 = vmax.f32 %v3482_v20, %v3483_v18  ;;  %v3759_v51 = vsel %vm261_vm2, %v2759_v46, -inf  ;;  %v3182_v55 = vadd.f32 %v3181_v49, %v3180_v34 }
 0x119   : > { %v5649_v54 = vpop.f32.mrf.mxu1  ;;  %v3760_v56 = vmax.f32 %v3758_v7, %v3759_v51  ;;  %v2636_v60 = vmax.f32 %v1680_v53, 0.0  ;;  %v2764_v61 = vmax.f32 %v2192_v22, 0.0  ;;  %v3185_v63 = vsel %vm261_vm2, %v2761_v43, 0.0 }
 0x11a   : > { %v5651_v62 = vpop.f32.mrf.mxu0  ;;  %v2908_v2 = vadd.f32 %v2907_v13, %v2906_v32  ;;  %v3486_v11 = vmax.f32 %v3484_v48, %v3485_v25  ;;  %v1683_v3 = vadd.f32 %v5547_v16, %v5365_v39  ;;  %v3763_v6 = vsel %vm261_vm2, %v2761_v43, -inf }
 0x11b   : > { %v5656_v4 = vpop.f32.mrf.mxu1  ;;  %v3184_v8 = vadd.f32 %v3183_v33, %v3182_v55  ;;  %v3762_v10 = vmax.f32 %v3760_v56, %v3761_v41  ;;  %v2911_v14 = vsel %vm261_vm2, %v2634_v47, 0.0  ;;  %v3489_v20 = vsel %vm261_vm2, %v2634_v47, -inf }
 0x11c   : > { %v5660_v58 = vpop.f32.mrf.mxu0  ;;  %v2910_v15 = vadd.f32 %v2909_v27, %v2908_v2  ;;  %v3488_v0 = vmax.f32 %v3486_v11, %v3487_v5  ;;  %v2762_v19 = vmax.f32 %v2184_v59, 0.0  ;;  %v2195_v16 = vadd.f32 %v5553_v23, %v5365_v39 }
 0x11d   : > { %v5663_v13 = vpop.f32.mrf.mxu1  ;;  %v3186_v21 = vadd.f32 %v3185_v63, %v3184_v8  ;;  %v3764_v25 = vmax.f32 %v3762_v10, %v3763_v6  ;;  %v1675_v26 = vadd.f32 %v5365_v39, %v5562_v31  ;;  %v2915_v38 = vsel %vm261_vm2, %v2636_v60, 0.0 }
 0x11e   : > { %v5669_v28 = vpop.f32.mrf.mxu0  ;;  %v2912_v29 = vadd.f32 %v2911_v14, %v2910_v15  ;;  %v3490_v33 = vmax.f32 %v3488_v0, %v3489_v20  ;;  %v3187_v34 = vsel %vm261_vm2, %v2762_v19, 0.0  ;;  %v3765_v7 = vsel %vm261_vm2, %v2762_v19, -inf }
 0x11f   : > { %v5673_v35 = vpop.f32.mrf.mxu1  ;;  %v3188_v46 = vadd.f32 %v3187_v34, %v3186_v21  ;;  %v3766_v53 = vmax.f32 %v3764_v25, %v3765_v7  ;;  %v3493_v23 = vsel %vm261_vm2, %v2636_v60, -inf  ;;  %v2637_v41 = vmax.f32 %v1683_v3, 0.0 }
 0x120   : > { %v5676_v22 = vpop.f32.mrf.mxu0  ;;  %v2635_v31 = vmax.f32 %v1675_v26, 0.0  ;;  %v2187_v27 = vadd.f32 %v5365_v39, %v5573_v37  ;;  %v3191_v43 = vsel %vm261_vm2, %v2764_v61, 0.0  ;;  %v3769_v44 = vsel %vm261_vm2, %v2764_v61, -inf }
 0x121   : > { %v5681_v5 = vpop.f32.mrf.mxu1  ;;  %v1688_v18 = vadd.f32 %v5365_v39, %v5590_v50  ;;  %v2200_v47 = vadd.f32 %v5365_v39, %v5594_v57  ;;  %v2765_v32 = vmax.f32 %v2195_v16, 0.0  ;;  %v1696_v37 = vadd.f32 %v5579_v42, %v5365_v39 }
 0x122   : > { %v5689_v59 = vpop.f32.mrf.mxu0  ;;  %v2913_v48 = vsel %vm261_vm2, %v2635_v31, 0.0  ;;  %v3491_v49 = vsel %vm261_vm2, %v2635_v31, -inf  ;;  %v2763_v60 = vmax.f32 %v2187_v27, 0.0  ;;  %v2208_v50 = vadd.f32 %v5584_v45, %v5365_v39 }
 0x123   : > { %v5695_v51 = vpop.f32.mrf.mxu1  ;;  %v2914_v55 = vadd.f32 %v2913_v48, %v2912_v29  ;;  %v3492_v56 = vmax.f32 %v3490_v33, %v3491_v49  ;;  %v2917_v57 = vsel %vm261_vm2, %v2637_v41, 0.0  ;;  %v3495_v63 = vsel %vm261_vm2, %v2637_v41, -inf }
 0x124   : > { %v5699_v61 = vpop.f32.mrf.mxu0  ;;  %v2638_v2 = vmax.f32 %v1688_v18, 0.0  ;;  %v2766_v11 = vmax.f32 %v2200_v47, 0.0  ;;  %v3189_v8 = vsel %vm261_vm2, %v2763_v60, 0.0  ;;  %v3767_v10 = vsel %vm261_vm2, %v2763_v60, -inf }
 0x125   : > { %v5703_v3 = vpop.f32.mrf.mxu1  ;;  %v2916_v6 = vadd.f32 %v2915_v38, %v2914_v55  ;;  %v3494_v42 = vmax.f32 %v3492_v56, %v3493_v23  ;;  %v3193_v45 = vsel %vm261_vm2, %v2765_v32, 0.0  ;;  %v3190_v15 = vadd.f32 %v3189_v8, %v3188_v46 }
 0x126   : > { %v5707_v14 = vpop.f32.mrf.mxu0  ;;  %v3768_v0 = vmax.f32 %v3766_v53, %v3767_v10  ;;  %v1699_v20 = vadd.f32 %v5599_v52, %v5365_v39  ;;  %v3771_v21 = vsel %vm261_vm2, %v2765_v32, -inf  ;;  %v2640_v25 = vmax.f32 %v1696_v37, 0.0 }
 0x127   : > { %v5712_v19 = vpop.f32.mrf.mxu1  ;;  %v2768_v16 = vmax.f32 %v2208_v50, 0.0  ;;  %v2918_v26 = vadd.f32 %v2917_v57, %v2916_v6  ;;  %v3192_v33 = vadd.f32 %v3191_v43, %v3190_v15  ;;  %v2919_v7 = vsel %vm261_vm2, %v2638_v2, 0.0 }
 0x128   : > { %v5715_v29 = vpop.f32.mrf.mxu0  ;;  %v3770_v34 = vmax.f32 %v3768_v0, %v3769_v44  ;;  %v3496_v38 = vmax.f32 %v3494_v42, %v3495_v63  ;;  %v3497_v53 = vsel %vm261_vm2, %v2638_v2, -inf  ;;  %v3195_v52 = vsel %vm261_vm2, %v2766_v11, 0.0 }
 0x129   : > { %v5718_v23 = vpop.f32.mrf.mxu1  ;;  %v2920_v46 = vadd.f32 %v2919_v7, %v2918_v26  ;;  %v3773_v41 = vsel %vm261_vm2, %v2766_v11, -inf  ;;  %v3194_v18 = vadd.f32 %v3193_v45, %v3192_v33  ;;  %v2641_v32 = vmax.f32 %v1699_v20, 0.0 }
 0x12a   : > { %v5723_v31 = vpop.f32.mrf.mxu0  ;;  %v3498_v27 = vmax.f32 %v3496_v38, %v3497_v53  ;;  %v3772_v47 = vmax.f32 %v3770_v34, %v3771_v21  ;;  %v2211_v44 = vadd.f32 %v5603_v9, %v5365_v39  ;;  %v1691_v48 = vadd.f32 %v5365_v39, %v5609_v17 }
 0x12b   : > { %v5725_v43 = vpop.f32.mrf.mxu1  ;;  %v2203_v49 = vadd.f32 %v5365_v39, %v5612_v24  ;;  %v3196_v55 = vadd.f32 %v3195_v52, %v3194_v18  ;;  %v1704_v60 = vadd.f32 %v5365_v39, %v5634_v40  ;;  %v2923_v57 = vsel %vm261_vm2, %v2640_v25, 0.0 }
 0x12c   : > { %v5733_v37 = vpop.f32.mrf.mxu0  ;;  %v3774_v56 = vmax.f32 %v3772_v47, %v3773_v41  ;;  %v3501_v63 = vsel %vm261_vm2, %v2640_v25, -inf  ;;  %v2639_v9 = vmax.f32 %v1691_v48, 0.0  ;;  %v3199_v17 = vsel %vm261_vm2, %v2768_v16, 0.0 }
 0x12d   : > { %v5737_v50 = vpop.f32.mrf.mxu1  ;;  %v2767_v2 = vmax.f32 %v2203_v49, 0.0  ;;  %v3777_v24 = vsel %vm261_vm2, %v2768_v16, -inf  ;;  %v2925_v6 = vsel %vm261_vm2, %v2641_v32, 0.0  ;;  %v2769_v42 = vmax.f32 %v2211_v44, 0.0 }
 0x12e   : > { %v5741_v11 = vpop.f32.mrf.mxu0  ;;  %v2921_v40 = vsel %vm261_vm2, %v2639_v9, 0.0  ;;  %v3499_v10 = vsel %vm261_vm2, %v2639_v9, -inf  ;;  %v2642_v45 = vmax.f32 %v1704_v60, 0.0  ;;  %v2216_v15 = vadd.f32 %v5365_v39, %v5639_v12 }
 0x12f   : > { %v5746_v8 = vpop.f32.mrf.mxu1  ;;  %v2922_v20 = vadd.f32 %v2921_v40, %v2920_v46  ;;  %v3500_v21 = vmax.f32 %v3498_v27, %v3499_v10  ;;  %v3197_v25 = vsel %vm261_vm2, %v2767_v2, 0.0  ;;  %v3775_v16 = vsel %vm261_vm2, %v2767_v2, -inf }
 0x130   : > { %v5752_v0 = vpop.f32.mrf.mxu0  ;;  %v3503_v33 = vsel %vm261_vm2, %v2641_v32, -inf  ;;  %v3198_v34 = vadd.f32 %v3197_v25, %v3196_v55  ;;  %v3776_v7 = vmax.f32 %v3774_v56, %v3775_v16  ;;  %v1712_v38 = vadd.f32 %v5621_v30, %v5365_v39 }
 0x131   : > { %v5756_v26 = vpop.f32.mrf.mxu1  ;;  %v2924_v12 = vadd.f32 %v2923_v57, %v2922_v20  ;;  %v3502_v52 = vmax.f32 %v3500_v21, %v3501_v63  ;;  %v2224_v46 = vadd.f32 %v5627_v36, %v5365_v39  ;;  %v1715_v41 = vadd.f32 %v5645_v1, %v5365_v39 }
 0x132   : > { %v5761_v53 = vpop.f32.mrf.mxu0  ;;  %v3201_v18 = vsel %vm261_vm2, %v2769_v42, 0.0  ;;  %v3779_v47 = vsel %vm261_vm2, %v2769_v42, -inf  ;;  %v3200_v32 = vadd.f32 %v3199_v17, %v3198_v34  ;;  %v3778_v44 = vmax.f32 %v3776_v7, %v3777_v24 }
 0x133   : > { %v5767_v27 = vpop.f32.mrf.mxu1  ;;  %v2926_v30 = vadd.f32 %v2925_v6, %v2924_v12  ;;  %v2927_v49 = vsel %vm261_vm2, %v2642_v45, 0.0  ;;  %v3504_v55 = vmax.f32 %v3502_v52, %v3503_v33  ;;  %v2770_v56 = vmax.f32 %v2216_v15, 0.0 }
 0x134   : > { %v5771_v48 = vpop.f32.mrf.mxu0  ;;  %v3505_v36 = vsel %vm261_vm2, %v2642_v45, -inf  ;;  %v3202_v1 = vadd.f32 %v3201_v18, %v3200_v32  ;;  %v3780_v57 = vmax.f32 %v3778_v44, %v3779_v47  ;;  %v1707_v63 = vadd.f32 %v5365_v39, %v5651_v62 }
 0x135   : > { %v5774_v60 = vpop.f32.mrf.mxu1  ;;  %v2928_v2 = vadd.f32 %v2927_v49, %v2926_v30  ;;  %v3506_v17 = vmax.f32 %v3504_v55, %v3505_v36  ;;  %v3203_v24 = vsel %vm261_vm2, %v2770_v56, 0.0  ;;  %v3781_v6 = vsel %vm261_vm2, %v2770_v56, -inf }
 0x136   : > { %v5779_v9 = vpop.f32.mrf.mxu0  ;;  %v2644_v40 = vmax.f32 %v1712_v38, 0.0  ;;  %v3204_v10 = vadd.f32 %v3203_v24, %v3202_v1  ;;  %v3782_v15 = vmax.f32 %v3780_v57, %v3781_v6  ;;  %v2772_v45 = vmax.f32 %v2224_v46, 0.0 }
 0x137   : > { %v5783_v42 = vpop.f32.mrf.mxu1  ;;  %v2227_v21 = vadd.f32 %v5649_v54, %v5365_v39  ;;  %v2643_v62 = vmax.f32 %v1707_v63, 0.0  ;;  %v2219_v25 = vadd.f32 %v5365_v39, %v5656_v4  ;;  %v2645_v34 = vmax.f32 %v1715_v41, 0.0 }
 0x138   : > { %v5785_v20 = vpop.f32.mrf.mxu0  ;;  %v2931_v52 = vsel %vm261_vm2, %v2644_v40, 0.0  ;;  %v3509_v39 = vsel %vm261_vm2, %v2644_v40, -inf  ;;  %v3207_v4 = vsel %vm261_vm2, %v2772_v45, 0.0  ;;  %v3785_v32 = vsel %vm261_vm2, %v2772_v45, -inf  ;;  %v5820_v40 = vld [vmem:[%s7025_s2] ss:$0 sm:$0xff] }
 0x139   : > { %v5791_v16 = vpop.f32.mrf.mxu1  ;;  %v2929_v7 = vsel %vm261_vm2, %v2643_v62, 0.0  ;;  %v3507_v38 = vsel %vm261_vm2, %v2643_v62, -inf  ;;  %v2771_v54 = vmax.f32 %v2219_v25, 0.0  ;;  %v2773_v41 = vmax.f32 %v2227_v21, 0.0 }
 0x13a   : > { %v5793_v33 = vpop.f32.mrf.mxu0  ;;  %v2930_v46 = vadd.f32 %v2929_v7, %v2928_v2  ;;  %v3508_v18 = vmax.f32 %v3506_v17, %v3507_v38  ;;  %v2933_v1 = vsel %vm261_vm2, %v2645_v34, 0.0  ;;  %v3511_v57 = vsel %vm261_vm2, %v2645_v34, -inf }
 0x13b   : > { %v5797_v12 = vpop.f32.mrf.mxu1  ;;  %v3205_v55 = vsel %vm261_vm2, %v2771_v54, 0.0  ;;  %v3783_v56 = vsel %vm261_vm2, %v2771_v54, -inf  ;;  %v1728_v45 = vadd.f32 %v5820_v40, %v5660_v58  ;;  %v2240_v21 = vadd.f32 %v5820_v40, %v5663_v13 }
 0x13c   : > { %v5800_v47 = vpop.f32.mrf.mxu0  ;;  %v2932_v30 = vadd.f32 %v2931_v52, %v2930_v46  ;;  %v3510_v49 = vmax.f32 %v3508_v18, %v3509_v39  ;;  %v3206_v63 = vadd.f32 %v3205_v55, %v3204_v10  ;;  %v3784_v2 = vmax.f32 %v3782_v15, %v3783_v56 }
 0x13d   : > { %v5805_v44 = vpop.f32.mrf.mxu1  ;;  %v1720_v25 = vadd.f32 %v5820_v40, %v5669_v28  ;;  %v3209_v7 = vsel %vm261_vm2, %v2773_v41, 0.0  ;;  %v3787_v38 = vsel %vm261_vm2, %v2773_v41, -inf  ;;  %v2232_v13 = vadd.f32 %v5820_v40, %v5673_v35 }
 0x13e   : > { %v5809_v36 = vpop.f32.mrf.mxu0  ;;  %v2934_v24 = vadd.f32 %v2933_v1, %v2932_v30  ;;  %v5815_v6 = vmax.f32 %v3510_v49, %v3511_v57  ;;  %v3208_v10 = vadd.f32 %v3207_v4, %v3206_v63  ;;  %v3786_v15 = vmax.f32 %v3784_v2, %v3785_v32 }
 0x13f   : > { %v5813_v17 = vpop.f32.mrf.mxu1  ;;  %v2648_v54 = vmax.f32 %v1728_v45, 0.0  ;;  %v2776_v39 = vmax.f32 %v2240_v21, 0.0  ;;  %v1731_v28 = vadd.f32 %v5820_v40, %v5676_v22  ;;  %v1723_v4 = vadd.f32 %v5820_v40, %v5689_v59 }
 0x140   : > { %v5826_v62 = vpop.f32.mrf.mxu0  ;;  %v5836_v46 = vadd.f32 %v3209_v7, %v3208_v10  ;;  %v5838_v58 = vmax.f32 %v3786_v15, %v3787_v38  ;;  %v2646_v41 = vmax.f32 %v1720_v25, 0.0  ;;  %v2235_v30 = vadd.f32 %v5820_v40, %v5695_v51 }
 0x141   : > { %v5830_v34 = vpop.f32.mrf.mxu1  ;;  %v2647_v55 = vmax.f32 %v1723_v4, 0.0  ;;  %v2774_v56 = vmax.f32 %v2232_v13, 0.0  ;;  %v2243_v1 = vadd.f32 %v5820_v40, %v5681_v5  ;;  %v2944_v59 = vsel %vm261_vm2, %v2648_v54, 0.0 }
 0x142   : > { %v5834_v52 = vpop.f32.mrf.mxu0  ;;  %7033 = vst [vmem:[#allocation7_spill] sm:$0xff] %v5836_v46  ;;  %7034 = vst [vmem:[#allocation8_spill] sm:$0xff] %v5838_v58  ;;  %v2775_v57 = vmax.f32 %v2235_v30, 0.0  ;;  %v3522_v63 = vsel %vm261_vm2, %v2648_v54, -inf  ;;  %v3220_v2 = vsel %vm261_vm2, %v2776_v39, 0.0  ;;  %v2649_v45 = vmax.f32 %v1731_v28, 0.0 }
 0x143   : > { %v5842_v18 = vpop.f32.mrf.mxu1  ;;  %v2941_v21 = vsel %vm261_vm2, %v2646_v41, 0.0  ;;  %v3519_v10 = vsel %vm261_vm2, %v2646_v41, -inf  ;;  %v2942_v15 = vsel %vm261_vm2, %v2647_v55, 0.0  ;;  %v3520_v5 = vsel %vm261_vm2, %v2647_v55, -inf }
 0x144   : > { %v5848_v32 = vpop.f32.mrf.mxu0  ;;  %v2935_v7 = vrot.slane %v2934_v24, 4  ;;  %v3798_v38 = vsel %vm261_vm2, %v2776_v39, -inf  ;;  %v2943_v13 = vadd.f32 %v2942_v15, %v2941_v21  ;;  %v3521_v54 = vmax.f32 %v3519_v10, %v3520_v5 }
 0x145   : > { %v5852_v49 = vpop.f32.mrf.mxu1  ;;  %v2777_v28 = vmax.f32 %v2243_v1, 0.0  ;;  %v3218_v30 = vsel %vm261_vm2, %v2775_v57, 0.0  ;;  %v3796_v58 = vsel %vm261_vm2, %v2775_v57, -inf  ;;  %v1744_v41 = vadd.f32 %v5820_v40, %v5699_v61 }
 0x146   : > { %v5854_v35 = vpop.f32.mrf.mxu0  ;;  %v3217_v55 = vsel %vm261_vm2, %v2774_v56, 0.0  ;;  %v3523_v39 = vmax.f32 %v3521_v54, %v3522_v63  ;;  %v3513_v10 = vrot.slane %v5815_v6, 4  ;;  %v2946_v1 = vsel %vm261_vm2, %v2649_v45, 0.0 }
 0x147   : > { %v5858_v22 = vpop.f32.mrf.mxu1  ;;  %v3219_v15 = vadd.f32 %v3218_v30, %v3217_v55  ;;  %v3524_v61 = vsel %vm261_vm2, %v2649_v45, -inf  ;;  %v3222_v63 = vsel %vm261_vm2, %v2777_v28, 0.0  ;;  %v2652_v30 = vmax.f32 %v1744_v41, 0.0 }
 0x148   : > { %v5863_v51 = vpop.f32.mrf.mxu0  ;;  %v3525_v45 = vmax.f32 %v3523_v39, %v3524_v61 }
 0x149   : > { %7035 = vst [vmem:[#allocation9_spill] sm:$0xff] %v5863_v51  ;;  %v5869_v25 = vpop.f32.mrf.mxu1  ;;  %v2945_v51 = vadd.f32 %v2944_v59, %v2943_v13  ;;  %v3221_v13 = vadd.f32 %v3220_v2, %v3219_v15  ;;  %v2251_v15 = vadd.f32 %v5820_v40, %v5725_v43  ;;  %v1760_v43 = vadd.f32 %v5820_v40, %v5733_v37 }
 0x14a   : > { %7036 = vst [vmem:[#allocation10_spill] sm:$0xff] %v5869_v25  ;;  %v5872_v4 = vpop.f32.mrf.mxu0  ;;  %v3795_v25 = vsel %vm261_vm2, %v2774_v56, -inf  ;;  %v1736_v56 = vadd.f32 %v5820_v40, %v5707_v14  ;;  %v2248_v14 = vadd.f32 %v5820_v40, %v5712_v19  ;;  %v2952_v19 = vsel %vm261_vm2, %v2652_v30, 0.0 }
 0x14b   : > { %7037 = vst [vmem:[#allocation11_spill] sm:$0xff] %v5872_v4  ;;  %v5878_v46 = vpop.f32.mrf.mxu1  ;;  %v3797_v5 = vmax.f32 %v3795_v25, %v3796_v58  ;;  %v5888_v4 = vadd.f32 %v2935_v7, %v2934_v24  ;;  %v3800_v24 = vsel %vm261_vm2, %v2777_v28, -inf  ;;  %v2947_v7 = vadd.f32 %v2946_v1, %v2945_v51 }
 0x14c   : > { %7038 = vst [vmem:[#allocation12_spill] sm:$0xff] %v5878_v46  ;;  %v5882_v21 = vpop.f32.mrf.mxu0  ;;  %v2256_v46 = vadd.f32 %v5820_v40, %v5703_v3  ;;  %v2650_v25 = vmax.f32 %v1736_v56, 0.0  ;;  %v1747_v28 = vadd.f32 %v5820_v40, %v5715_v29  ;;  %v3530_v29 = vsel %vm261_vm2, %v2652_v30, -inf }
 0x14d   : > { %7039 = vst [vmem:[#allocation13_spill] sm:$0xff] %v5882_v21  ;;  %v5886_v57 = vpop.f32.mrf.mxu1  ;;  %v3799_v54 = vmax.f32 %v3797_v5, %v3798_v38 }
 0x14e   : > { %7040 = vst [vmem:[#allocation14_spill] sm:$0xff] %v5886_v57  ;;  %v5895_v59 = vpop.f32.mrf.mxu0  ;;  %v2780_v3 = vmax.f32 %v2256_v46, 0.0  ;;  %v3223_v57 = vadd.f32 %v3222_v63, %v3221_v13  ;;  %v2948_v2 = vsel %vm261_vm2, %v2650_v25, 0.0  ;;  %v3526_v38 = vsel %vm261_vm2, %v2650_v25, -inf }
 0x14f   : > { %7041 = vst [vmem:[#allocation15_spill] sm:$0xff] %v5895_v59  ;;  %v5898_v58 = vpop.f32.mrf.mxu1  ;;  %v3801_v21 = vmax.f32 %v3799_v54, %v3800_v24  ;;  %v5906_v59 = vmax.f32 %v5815_v6, %v3513_v10  ;;  %v2949_v41 = vadd.f32 %v2948_v2, %v2947_v7  ;;  %v3527_v39 = vmax.f32 %v3525_v45, %v3526_v38 }
 0x150   : > { %v5901_v55 = vpop.f32.mrf.mxu0  ;;  %v2778_v46 = vmax.f32 %v2248_v14, 0.0  ;;  %v2259_v6 = vadd.f32 %v5820_v40, %v5718_v23  ;;  %v1739_v10 = vadd.f32 %v5820_v40, %v5723_v31  ;;  %v3228_v61 = vsel %vm261_vm2, %v2780_v3, 0.0 }
 0x151   : > { %v5913_v1 = vpop.f32.mrf.mxu1  ;;  %v2653_v24 = vmax.f32 %v1747_v28, 0.0  ;;  %v3806_v25 = vsel %vm261_vm2, %v2780_v3, -inf  ;;  %v2779_v31 = vmax.f32 %v2251_v15, 0.0  ;;  %v1752_v7 = vadd.f32 %v5820_v40, %v5741_v11 }
 0x152   : > { %v5922_v5 = vpop.f32.mrf.mxu0  ;;  %v3224_v56 = vsel %vm261_vm2, %v2778_v46, 0.0  ;;  %v3802_v63 = vsel %vm261_vm2, %v2778_v46, -inf  ;;  %v2651_v23 = vmax.f32 %v1739_v10, 0.0  ;;  %v2781_v45 = vmax.f32 %v2259_v6, 0.0 }
 0x153   : > { %v3225_v13 = vadd.f32 %v3224_v56, %v3223_v57  ;;  %v3803_v54 = vmax.f32 %v3801_v21, %v3802_v63  ;;  %v5933_v30 = vpop.f32.mrf.mxu1  ;;  %v2272_v21 = vadd.f32 %v5820_v40, %v5737_v50  ;;  %v3226_v28 = vsel %vm261_vm2, %v2779_v31, 0.0 }
 0x154   : > { %v2950_v14 = vsel %vm261_vm2, %v2651_v23, 0.0  ;;  %v3528_v2 = vsel %vm261_vm2, %v2651_v23, -inf  ;;  %v5939_v57 = vpop.f32.mrf.mxu0  ;;  %v3804_v37 = vsel %vm261_vm2, %v2779_v31, -inf  ;;  %v2954_v11 = vsel %vm261_vm2, %v2653_v24, 0.0 }
 0x155   : > { %v2951_v3 = vadd.f32 %v2950_v14, %v2949_v41  ;;  %v3529_v38 = vmax.f32 %v3527_v39, %v3528_v2  ;;  %v3532_v46 = vsel %vm261_vm2, %v2653_v24, -inf  ;;  %v3227_v6 = vadd.f32 %v3226_v28, %v3225_v13  ;;  %v5945_v51 = vpop.f32.mrf.mxu1 }
 0x156   : > { %v3805_v10 = vmax.f32 %v3803_v54, %v3804_v37  ;;  %v2656_v63 = vmax.f32 %v1760_v43, 0.0  ;;  %v2654_v23 = vmax.f32 %v1752_v7, 0.0  ;;  %v3230_v50 = vsel %vm261_vm2, %v2781_v45, 0.0  ;;  %v5950_v31 = vpop.f32.mrf.mxu0 }
 0x157   : > { %v2953_v15 = vadd.f32 %v2952_v19, %v2951_v3  ;;  %v3531_v56 = vmax.f32 %v3529_v38, %v3530_v29  ;;  %v3229_v41 = vadd.f32 %v3228_v61, %v3227_v6  ;;  %v2264_v14 = vadd.f32 %v5820_v40, %v5746_v8  ;;  %v5959_v38 = vpop.f32.mrf.mxu1 }
 0x158   : > { %v3807_v39 = vmax.f32 %v3805_v10, %v3806_v25  ;;  %v3808_v2 = vsel %vm261_vm2, %v2781_v45, -inf  ;;  %v2784_v24 = vmax.f32 %v2272_v21, 0.0  ;;  %v1763_v19 = vadd.f32 %v5820_v40, %v5752_v0  ;;  %v5965_v37 = vpop.f32.mrf.mxu0 }
 0x159   : > { %v2955_v13 = vadd.f32 %v2954_v11, %v2953_v15  ;;  %v2956_v29 = vsel %vm261_vm2, %v2654_v23, 0.0  ;;  %v3533_v54 = vmax.f32 %v3531_v56, %v3532_v46  ;;  %v2782_v43 = vmax.f32 %v2264_v14, 0.0  ;;  %v5977_v14 = vpop.f32.mrf.mxu1 }
 0x15a   : > { %v3231_v7 = vadd.f32 %v3230_v50, %v3229_v41  ;;  %v3534_v61 = vsel %vm261_vm2, %v2654_v23, -inf  ;;  %v3809_v25 = vmax.f32 %v3807_v39, %v3808_v2  ;;  %v2275_v8 = vadd.f32 %v5820_v40, %v5756_v26 }
 0x15b   : > { %v2957_v3 = vadd.f32 %v2956_v29, %v2955_v13  ;;  %v3535_v45 = vmax.f32 %v3533_v54, %v3534_v61  ;;  %v3232_v21 = vsel %vm261_vm2, %v2782_v43, 0.0  ;;  %v3810_v28 = vsel %vm261_vm2, %v2782_v43, -inf }
 0x15c   : > { %v1755_v0 = vadd.f32 %v5820_v40, %v5761_v53  ;;  %v2960_v11 = vsel %vm261_vm2, %v2656_v63, 0.0  ;;  %v3538_v46 = vsel %vm261_vm2, %v2656_v63, -inf  ;;  %v3233_v6 = vadd.f32 %v3232_v21, %v3231_v7  ;;  %v5993_v21 = vpop.f32.mrf.mxu1 }
 0x15d   : > { %v3811_v10 = vmax.f32 %v3809_v25, %v3810_v28  ;;  %v3236_v26 = vsel %vm261_vm2, %v2784_v24, 0.0  ;;  %v2657_v15 = vmax.f32 %v1763_v19, 0.0  ;;  %v2267_v23 = vadd.f32 %v5820_v40, %v5767_v27 }
 0x15e   : > { %v2655_v56 = vmax.f32 %v1755_v0, 0.0  ;;  %v3814_v50 = vsel %vm261_vm2, %v2784_v24, -inf  ;;  %v2785_v41 = vmax.f32 %v2275_v8, 0.0  ;;  %v1768_v53 = vadd.f32 %v5820_v40, %v5779_v9  ;;  %v5985_v24 = vpop.f32.mrf.mxu0 }
 0x15f   : > { %v2280_v39 = vadd.f32 %v5820_v40, %v5783_v42  ;;  %v1776_v13 = vadd.f32 %v5820_v40, %v5771_v48  ;;  %v2288_v27 = vadd.f32 %v5820_v40, %v5774_v60  ;;  %v2783_v9 = vmax.f32 %v2267_v23, 0.0 }
 0x160   : > { %v2958_v63 = vsel %vm261_vm2, %v2655_v56, 0.0  ;;  %v3536_v2 = vsel %vm261_vm2, %v2655_v56, -inf  ;;  %v1779_v42 = vadd.f32 %v5820_v40, %v5785_v20  ;;  %v2962_v54 = vsel %vm261_vm2, %v2657_v15, 0.0  ;;  %v5996_v20 = vpop.f32.mrf.mxu0 }
 0x161   : > { %v2959_v19 = vadd.f32 %v2958_v63, %v2957_v3  ;;  %v3537_v29 = vmax.f32 %v3535_v45, %v3536_v2  ;;  %v3540_v43 = vsel %vm261_vm2, %v2657_v15, -inf  ;;  %v2658_v7 = vmax.f32 %v1768_v53, 0.0 }
 0x162   : > { %v2786_v61 = vmax.f32 %v2280_v39, 0.0  ;;  %v3234_v48 = vsel %vm261_vm2, %v2783_v9, 0.0  ;;  %v3812_v60 = vsel %vm261_vm2, %v2783_v9, -inf  ;;  %v3238_v3 = vsel %vm261_vm2, %v2785_v41, 0.0 }
 0x163   : > { %v2961_v25 = vadd.f32 %v2960_v11, %v2959_v19  ;;  %v3539_v8 = vmax.f32 %v3537_v29, %v3538_v46  ;;  %v3235_v45 = vadd.f32 %v3234_v48, %v3233_v6  ;;  %v3813_v28 = vmax.f32 %v3811_v10, %v3812_v60  ;;  %v6003_v10 = vpop.f32.mrf.mxu1 }
 0x164   : > { %v2660_v0 = vmax.f32 %v1776_v13, 0.0  ;;  %v3816_v56 = vsel %vm261_vm2, %v2785_v41, -inf  ;;  %v2788_v15 = vmax.f32 %v2288_v27, 0.0  ;;  %v2661_v53 = vmax.f32 %v1779_v42, 0.0  ;;  %v6006_v42 = vpop.f32.mrf.mxu0 }
 0x165   : > { %v2963_v23 = vadd.f32 %v2962_v54, %v2961_v25  ;;  %v3237_v11 = vadd.f32 %v3236_v26, %v3235_v45  ;;  %v3815_v46 = vmax.f32 %v3813_v28, %v3814_v50  ;;  %v2964_v39 = vsel %vm261_vm2, %v2658_v7, 0.0  ;;  %v6022_v45 = vpop.f32.mrf.mxu1 }
 0x166   : > { %v3541_v63 = vmax.f32 %v3539_v8, %v3540_v43  ;;  %v3542_v19 = vsel %vm261_vm2, %v2658_v7, -inf  ;;  %v3240_v29 = vsel %vm261_vm2, %v2786_v61, 0.0  ;;  %v3818_v6 = vsel %vm261_vm2, %v2786_v61, -inf }
 0x167   : > { %v2965_v2 = vadd.f32 %v2964_v39, %v2963_v23  ;;  %v2968_v13 = vsel %vm261_vm2, %v2660_v0, 0.0  ;;  %v3239_v27 = vadd.f32 %v3238_v3, %v3237_v11  ;;  %v3817_v9 = vmax.f32 %v3815_v46, %v3816_v56  ;;  %v6027_v56 = vpop.f32.mrf.mxu0 }
 0x168   : > { %v3543_v41 = vmax.f32 %v3541_v63, %v3542_v19  ;;  %v3546_v26 = vsel %vm261_vm2, %v2660_v0, -inf  ;;  %v2291_v50 = vadd.f32 %v5820_v40, %v5791_v16  ;;  %v1771_v54 = vadd.f32 %v5820_v40, %v5793_v33 }
 0x169   : > { %v2283_v43 = vadd.f32 %v5820_v40, %v5797_v12  ;;  %v3244_v7 = vsel %vm261_vm2, %v2788_v15, 0.0  ;;  %v3241_v61 = vadd.f32 %v3240_v29, %v3239_v27  ;;  %v3819_v25 = vmax.f32 %v3817_v9, %v3818_v6  ;;  %v6035_v6 = vpop.f32.mrf.mxu1 }
 0x16a   : > { %v1784_v8 = vadd.f32 %v5820_v40, %v5809_v36  ;;  %v2659_v48 = vmax.f32 %v1771_v54, 0.0  ;;  %v1792_v3 = vadd.f32 %v5820_v40, %v5800_v47  ;;  %v2304_v16 = vadd.f32 %v5820_v40, %v5805_v44 }
 0x16b   : > { %v2787_v60 = vmax.f32 %v2283_v43, 0.0  ;;  %v3822_v33 = vsel %vm261_vm2, %v2788_v15, -inf  ;;  %v2970_v12 = vsel %vm261_vm2, %v2661_v53, 0.0  ;;  %v3548_v28 = vsel %vm261_vm2, %v2661_v53, -inf }
 0x16c   : > { %v2789_v0 = vmax.f32 %v2291_v50, 0.0  ;;  %v2966_v36 = vsel %vm261_vm2, %v2659_v48, 0.0  ;;  %v3544_v23 = vsel %vm261_vm2, %v2659_v48, -inf  ;;  %v2662_v11 = vmax.f32 %v1784_v8, 0.0 }
 0x16d   : > { %v2296_v47 = vadd.f32 %v5820_v40, %v5813_v17  ;;  %v2967_v44 = vadd.f32 %v2966_v36, %v2965_v2  ;;  %v3545_v46 = vmax.f32 %v3543_v41, %v3544_v23  ;;  %v3242_v39 = vsel %vm261_vm2, %v2787_v60, 0.0  ;;  %v6040_v17 = vpop.f32.mrf.mxu0 }
 0x16e   : > { %v3820_v15 = vsel %vm261_vm2, %v2787_v60, -inf  ;;  %v3243_v63 = vadd.f32 %v3242_v39, %v3241_v61  ;;  %v2664_v53 = vmax.f32 %v1792_v3, 0.0  ;;  %v2792_v29 = vmax.f32 %v2304_v16, 0.0 }
 0x16f   : > { %v3821_v19 = vmax.f32 %v3819_v25, %v3820_v15  ;;  %v3246_v27 = vsel %vm261_vm2, %v2789_v0, 0.0  ;;  %v2969_v9 = vadd.f32 %v2968_v13, %v2967_v44  ;;  %v3547_v50 = vmax.f32 %v3545_v46, %v3546_v26  ;;  %v6049_v26 = vpop.f32.mrf.mxu1 }
 0x170   : > { %v1795_v54 = vadd.f32 %v5820_v40, %v5826_v62  ;;  %v3824_v2 = vsel %vm261_vm2, %v2789_v0, -inf  ;;  %v3245_v41 = vadd.f32 %v3244_v7, %v3243_v63  ;;  %v2972_v61 = vsel %vm261_vm2, %v2662_v11, 0.0 }
 0x171   : > { %v3823_v43 = vmax.f32 %v3821_v19, %v3822_v33  ;;  %v2971_v25 = vadd.f32 %v2970_v12, %v2969_v9  ;;  %v3549_v8 = vmax.f32 %v3547_v50, %v3548_v28  ;;  %v3550_v48 = vsel %vm261_vm2, %v2662_v11, -inf  ;;  %v6053_v28 = vpop.f32.mrf.mxu0 }
 0x172   : > { %v2790_v60 = vmax.f32 %v2296_v47, 0.0  ;;  %v3247_v3 = vadd.f32 %v3246_v27, %v3245_v41  ;;  %v2307_v13 = vadd.f32 %v5820_v40, %v5830_v34  ;;  %v1787_v62 = vadd.f32 %v5820_v40, %v5834_v52  ;;  %v6066_v27 = vpop.f32.mrf.mxu1 }
 0x173   : > { %v3825_v16 = vmax.f32 %v3823_v43, %v3824_v2  ;;  %v2973_v0 = vadd.f32 %v2972_v61, %v2971_v25  ;;  %v3551_v7 = vmax.f32 %v3549_v8, %v3550_v48  ;;  %v2976_v23 = vsel %vm261_vm2, %v2664_v53, 0.0 }
 0x174   : > { %v3248_v33 = vsel %vm261_vm2, %v2790_v60, 0.0  ;;  %v3826_v12 = vsel %vm261_vm2, %v2790_v60, -inf  ;;  %v3554_v34 = vsel %vm261_vm2, %v2664_v53, -inf  ;;  %v2665_v44 = vmax.f32 %v1795_v54, 0.0  ;;  %v6072_v54 = vpop.f32.mrf.mxu0 }
 0x175   : > { %v3249_v11 = vadd.f32 %v3248_v33, %v3247_v3  ;;  %v3827_v47 = vmax.f32 %v3825_v16, %v3826_v12  ;;  %v2663_v52 = vmax.f32 %v1787_v62, 0.0  ;;  %v2299_v46 = vadd.f32 %v5820_v40, %v5842_v18  ;;  %v6080_v3 = vpop.f32.mrf.mxu1 }
 0x176   : > { %v3252_v39 = vsel %vm261_vm2, %v2792_v29, 0.0  ;;  %v3830_v15 = vsel %vm261_vm2, %v2792_v29, -inf  ;;  %v1800_v63 = vadd.f32 %v5820_v40, %v5854_v35  ;;  %v2312_v19 = vadd.f32 %v5820_v40, %v5858_v22 }
 0x177   : > { %v2793_v9 = vmax.f32 %v2307_v13, 0.0  ;;  %v2974_v53 = vsel %vm261_vm2, %v2663_v52, 0.0  ;;  %v3552_v50 = vsel %vm261_vm2, %v2663_v52, -inf  ;;  %v1808_v18 = vadd.f32 %v5820_v40, %v5848_v32 }
 0x178   : > { %v2975_v2 = vadd.f32 %v2974_v53, %v2973_v0  ;;  %v3553_v29 = vmax.f32 %v3551_v7, %v3552_v50  ;;  %v2791_v41 = vmax.f32 %v2299_v46, 0.0  ;;  %v2320_v35 = vadd.f32 %v5820_v40, %v5852_v49  ;;  %v7042_v0 = vld [vmem:[#allocation9_spill] sm:$0xff]  ;;  %v6085_v7 = vpop.f32.mrf.mxu0  ;;  %v6092_v50 = vpop.f32.mrf.mxu1 }
 0x179   : > { %v2978_v22 = vsel %vm261_vm2, %v2665_v44, 0.0  ;;  %v3556_v43 = vsel %vm261_vm2, %v2665_v44, -inf  ;;  %v2666_v61 = vmax.f32 %v1800_v63, 0.0  ;;  %v2794_v25 = vmax.f32 %v2312_v19, 0.0 }
 0x17a   : > { %v2977_v8 = vadd.f32 %v2976_v23, %v2975_v2  ;;  %v3555_v48 = vmax.f32 %v3553_v29, %v3554_v34  ;;  %v3250_v60 = vsel %vm261_vm2, %v2791_v41, 0.0  ;;  %v3828_v32 = vsel %vm261_vm2, %v2791_v41, -inf  ;;  %v6094_v41 = vpop.f32.mrf.mxu0 }
 0x17b   : > { %v3254_v16 = vsel %vm261_vm2, %v2793_v9, 0.0  ;;  %v3251_v13 = vadd.f32 %v3250_v60, %v3249_v11  ;;  %v3829_v62 = vmax.f32 %v3827_v47, %v3828_v32  ;;  %v1811_v49 = vadd.f32 %v5820_v40, %v7042_v0  ;;  %v7046_v32 = vld [vmem:[#allocation15_spill] sm:$0xff] }
 0x17c   : > { %v3832_v33 = vsel %vm261_vm2, %v2793_v9, -inf  ;;  %v2668_v12 = vmax.f32 %v1808_v18, 0.0  ;;  %v2796_v23 = vmax.f32 %v2320_v35, 0.0  ;;  %v2979_v34 = vadd.f32 %v2978_v22, %v2977_v8  ;;  %v7044_v22 = vld [vmem:[#allocation11_spill] sm:$0xff] }
 0x17d   : > { %v3253_v44 = vadd.f32 %v3252_v39, %v3251_v13  ;;  %v3831_v52 = vmax.f32 %v3829_v62, %v3830_v15  ;;  %v2980_v46 = vsel %vm261_vm2, %v2666_v61, 0.0  ;;  %v3557_v63 = vmax.f32 %v3555_v48, %v3556_v43  ;;  %v7043_v15 = vld [vmem:[#allocation10_spill] sm:$0xff] }
 0x17e   : > { %v2981_v19 = vadd.f32 %v2980_v46, %v2979_v34  ;;  %v3558_v53 = vsel %vm261_vm2, %v2666_v61, -inf  ;;  %v3256_v11 = vsel %vm261_vm2, %v2794_v25, 0.0  ;;  %v3834_v47 = vsel %vm261_vm2, %v2794_v25, -inf  ;;  %v7045_v61 = vld [vmem:[#allocation12_spill] sm:$0xff]  ;;  %v6109_v34 = vpop.f32.mrf.mxu1 }
 0x17f   : > { %v3559_v2 = vmax.f32 %v3557_v63, %v3558_v53  ;;  %v3255_v29 = vadd.f32 %v3254_v16, %v3253_v44  ;;  %v3833_v9 = vmax.f32 %v3831_v52, %v3832_v33  ;;  %v2669_v18 = vmax.f32 %v1811_v49, 0.0  ;;  %v7047_v49 = vld [vmem:[#allocation13_spill] sm:$0xff]  ;;  %v6115_v53 = vpop.f32.mrf.mxu0 }
 0x180   : > { %v2984_v39 = vsel %vm261_vm2, %v2668_v12, 0.0  ;;  %v2323_v35 = vadd.f32 %v5820_v40, %v7043_v15  ;;  %v1803_v43 = vadd.f32 %v5820_v40, %v7044_v22  ;;  %v2315_v8 = vadd.f32 %v5820_v40, %v7045_v61 }
 0x181   : > { %v3562_v25 = vsel %vm261_vm2, %v2668_v12, -inf  ;;  %v3257_v48 = vadd.f32 %v3256_v11, %v3255_v29  ;;  %v3835_v60 = vmax.f32 %v3833_v9, %v3834_v47  ;;  %v1816_v16 = vadd.f32 %v5820_v40, %v7046_v32  ;;  %v7048_v12 = vld [vmem:[#allocation14_spill] sm:$0xff] }
 0x182   : > { %v3260_v13 = vsel %vm261_vm2, %v2796_v23, 0.0  ;;  %v2667_v62 = vmax.f32 %v1803_v43, 0.0  ;;  %v2795_v0 = vmax.f32 %v2315_v8, 0.0  ;;  %v1824_v33 = vadd.f32 %v5820_v40, %v7047_v49  ;;  %v6124_v49 = vpop.f32.mrf.mxu1 }
 0x183   : > { %v3838_v44 = vsel %vm261_vm2, %v2796_v23, -inf  ;;  %v2986_v52 = vsel %vm261_vm2, %v2669_v18, 0.0  ;;  %v2797_v46 = vmax.f32 %v2323_v35, 0.0  ;;  %v2336_v63 = vadd.f32 %v5820_v40, %v7048_v12 }
 0x184   : > { %v2982_v11 = vsel %vm261_vm2, %v2667_v62, 0.0  ;;  %v3560_v47 = vsel %vm261_vm2, %v2667_v62, -inf  ;;  %v2670_v29 = vmax.f32 %v1816_v16, 0.0  ;;  %v2328_v9 = vadd.f32 %v5820_v40, %v5898_v58  ;;  %v6128_v58 = vpop.f32.mrf.mxu0 }
 0x185   : > { %v2983_v15 = vadd.f32 %v2982_v11, %v2981_v19  ;;  %v3561_v22 = vmax.f32 %v3559_v2, %v3560_v47  ;;  %v3258_v23 = vsel %vm261_vm2, %v2795_v0, 0.0  ;;  %v3836_v43 = vsel %vm261_vm2, %v2795_v0, -inf  ;;  %v6136_v47 = vpop.f32.mrf.mxu1 }
 0x186   : > { %v3564_v35 = vsel %vm261_vm2, %v2669_v18, -inf  ;;  %v3259_v61 = vadd.f32 %v3258_v23, %v3257_v48  ;;  %v3837_v8 = vmax.f32 %v3835_v60, %v3836_v43  ;;  %v2672_v32 = vmax.f32 %v1824_v33, 0.0 }
 0x187   : > { %v2985_v12 = vadd.f32 %v2984_v39, %v2983_v15  ;;  %v3563_v36 = vmax.f32 %v3561_v22, %v3562_v25  ;;  %v2800_v62 = vmax.f32 %v2336_v63, 0.0  ;;  %v1827_v16 = vadd.f32 %v5820_v40, %v5901_v55 }
 0x188   : > { %v3262_v19 = vsel %vm261_vm2, %v2797_v46, 0.0  ;;  %v3840_v2 = vsel %vm261_vm2, %v2797_v46, -inf  ;;  %v3261_v0 = vadd.f32 %v3260_v13, %v3259_v61  ;;  %v3839_v11 = vmax.f32 %v3837_v8, %v3838_v44  ;;  %v6140_v44 = vpop.f32.mrf.mxu0 }
 0x189   : > { %v2987_v18 = vadd.f32 %v2986_v52, %v2985_v12  ;;  %v2988_v48 = vsel %vm261_vm2, %v2670_v29, 0.0  ;;  %v3565_v60 = vmax.f32 %v3563_v36, %v3564_v35  ;;  %v2798_v33 = vmax.f32 %v2328_v9, 0.0 }
 0x18a   : > { %v3566_v39 = vsel %vm261_vm2, %v2670_v29, -inf  ;;  %v3263_v25 = vadd.f32 %v3262_v19, %v3261_v0  ;;  %v3841_v63 = vmax.f32 %v3839_v11, %v3840_v2  ;;  %v1819_v55 = vadd.f32 %v5820_v40, %v5922_v5 }
 0x18b   : > { %v2989_v15 = vadd.f32 %v2988_v48, %v2987_v18  ;;  %v3567_v22 = vmax.f32 %v3565_v60, %v3566_v39  ;;  %v3264_v46 = vsel %vm261_vm2, %v2798_v33, 0.0  ;;  %v3842_v13 = vsel %vm261_vm2, %v2798_v33, -inf }
 0x18c   : > { %v3265_v52 = vadd.f32 %v3264_v46, %v3263_v25  ;;  %v3843_v36 = vmax.f32 %v3841_v63, %v3842_v13  ;;  %v2339_v29 = vadd.f32 %v5820_v40, %v5913_v1  ;;  %v7049_v9 = vrot.slane %v5888_v4, 2 }
 0x18d   : > { %v2673_v5 = vmax.f32 %v1827_v16, 0.0  ;;  %v2671_v43 = vmax.f32 %v1819_v55, 0.0  ;;  %v2331_v35 = vadd.f32 %v5820_v40, %v5933_v30  ;;  %v7050_v61 = vrot.slane %v5906_v59, 2 }
 0x18e   : > { %v6147_v23 = vadd.f32 %v7049_v9, %v5888_v4  ;;  %v2992_v12 = vsel %vm261_vm2, %v2672_v32, 0.0  ;;  %v1832_v1 = vadd.f32 %v5820_v40, %v5950_v31  ;;  %v2344_v19 = vadd.f32 %v5820_v40, %v5959_v38  ;;  %v6161_v4 = vpop.f32.mrf.mxu1 }
 0x18f   : > { %v6154_v8 = vmax.f32 %v5906_v59, %v7050_v61  ;;  %v3570_v16 = vsel %vm261_vm2, %v2672_v32, -inf  ;;  %v3268_v2 = vsel %vm261_vm2, %v2800_v62, 0.0  ;;  %v2990_v30 = vsel %vm261_vm2, %v2671_v43, 0.0  ;;  %v6167_v59 = vpop.f32.mrf.mxu0 }
 0x190   : > { %v3568_v0 = vsel %vm261_vm2, %v2671_v43, -inf  ;;  %v2801_v11 = vmax.f32 %v2339_v29, 0.0  ;;  %v2991_v18 = vadd.f32 %v2990_v30, %v2989_v15  ;;  %v2799_v60 = vmax.f32 %v2331_v35, 0.0  ;;  %v6173_v46 = vpop.f32.mrf.mxu1 }
 0x191   : > { %v3569_v48 = vmax.f32 %v3567_v22, %v3568_v0  ;;  %v3846_v31 = vsel %vm261_vm2, %v2800_v62, -inf  ;;  %v2994_v38 = vsel %vm261_vm2, %v2673_v5, 0.0  ;;  %v2674_v33 = vmax.f32 %v1832_v1, 0.0  ;;  %v6178_v62 = vpop.f32.mrf.mxu0 }
 0x192   : > { %v2802_v39 = vmax.f32 %v2344_v19, 0.0  ;;  %v2993_v25 = vadd.f32 %v2992_v12, %v2991_v18  ;;  %v3266_v63 = vsel %vm261_vm2, %v2799_v60, 0.0  ;;  %v3844_v55 = vsel %vm261_vm2, %v2799_v60, -inf  ;;  %v6188_v30 = vpop.f32.mrf.mxu1 }
 0x193   : > { %v3571_v32 = vmax.f32 %v3569_v48, %v3570_v16  ;;  %v3572_v13 = vsel %vm261_vm2, %v2673_v5, -inf  ;;  %v3267_v29 = vadd.f32 %v3266_v63, %v3265_v52  ;;  %v3845_v15 = vmax.f32 %v3843_v36, %v3844_v55 }
 0x194   : > { %v1840_v22 = vadd.f32 %v5820_v40, %v5939_v57  ;;  %v3270_v9 = vsel %vm261_vm2, %v2801_v11, 0.0  ;;  %v3848_v43 = vsel %vm261_vm2, %v2801_v11, -inf  ;;  %v2352_v35 = vadd.f32 %v5820_v40, %v5945_v51  ;;  %v6198_v63 = vpop.f32.mrf.mxu1 }
 0x195   : > { %v2995_v61 = vadd.f32 %v2994_v38, %v2993_v25  ;;  %v3269_v12 = vadd.f32 %v3268_v2, %v3267_v29  ;;  %v3847_v1 = vmax.f32 %v3845_v15, %v3846_v31  ;;  %v2996_v19 = vsel %vm261_vm2, %v2674_v33, 0.0  ;;  %v6192_v2 = vpop.f32.mrf.mxu0 }
 0x196   : > { %v3573_v5 = vmax.f32 %v3571_v32, %v3572_v13  ;;  %v3574_v36 = vsel %vm261_vm2, %v2674_v33, -inf  ;;  %v3272_v57 = vsel %vm261_vm2, %v2802_v39, 0.0  ;;  %v3850_v16 = vsel %vm261_vm2, %v2802_v39, -inf  ;;  %v7051_v13 = vld [vmem:[#allocation7_spill] sm:$0xff] }
 0x197   : > { %v2997_v52 = vadd.f32 %v2996_v19, %v2995_v61  ;;  %v3271_v11 = vadd.f32 %v3270_v9, %v3269_v12  ;;  %v3849_v18 = vmax.f32 %v3847_v1, %v3848_v43  ;;  %v1843_v51 = vadd.f32 %v5820_v40, %v5965_v37 }
 0x198   : > { %v3575_v0 = vmax.f32 %v3573_v5, %v3574_v36  ;;  %v2676_v48 = vmax.f32 %v1840_v22, 0.0  ;;  %v1835_v60 = vadd.f32 %v5820_v40, %v5985_v24  ;;  %v2347_v31 = vadd.f32 %v5820_v40, %v5993_v21  ;;  %v6203_v22 = vpop.f32.mrf.mxu0 }
 0x199   : > { %v3273_v38 = vadd.f32 %v3272_v57, %v3271_v11  ;;  %v3851_v33 = vmax.f32 %v3849_v18, %v3850_v16  ;;  %v2804_v39 = vmax.f32 %v2352_v35, 0.0  ;;  %v2939_v55 = vrot.slane %v6147_v23, 1  ;;  %v6214_v16 = vpop.f32.mrf.mxu1 }
 0x19a   : > { %v2675_v25 = vmax.f32 %v1835_v60, 0.0  ;;  %v2803_v32 = vmax.f32 %v2347_v31, 0.0  ;;  %v3517_v37 = vrot.slane %v6154_v8, 1  ;;  %v3211_v29 = vrot.slane %v7051_v13, 4 }
 0x19b   : > { %v2677_v15 = vmax.f32 %v1843_v51, 0.0  ;;  %v3000_v24 = vsel %vm261_vm2, %v2676_v48, 0.0  ;;  %v3578_v21 = vsel %vm261_vm2, %v2676_v48, -inf  ;;  %v3276_v19 = vsel %vm261_vm2, %v2804_v39, 0.0 }
 0x19c   : > { %v2998_v9 = vsel %vm261_vm2, %v2675_v25, 0.0  ;;  %v3576_v43 = vsel %vm261_vm2, %v2675_v25, -inf  ;;  %v3274_v12 = vsel %vm261_vm2, %v2803_v32, 0.0  ;;  %v3852_v1 = vsel %vm261_vm2, %v2803_v32, -inf  ;;  %v7054_v25 = vld [vmem:[#allocation8_spill] sm:$0xff] }
 0x19d   : > { %v2999_v35 = vadd.f32 %v2998_v9, %v2997_v52  ;;  %v3577_v61 = vmax.f32 %v3575_v0, %v3576_v43  ;;  %v3275_v5 = vadd.f32 %v3274_v12, %v3273_v38  ;;  %v3853_v36 = vmax.f32 %v3851_v33, %v3852_v1  ;;  %v6219_v0 = vpop.f32.mrf.mxu0 }
 0x19e   : > { %v1856_v57 = vadd.f32 %v5820_v40, %v5996_v20  ;;  %v3854_v11 = vsel %vm261_vm2, %v2804_v39, -inf  ;;  %v2368_v52 = vadd.f32 %v5820_v40, %v6003_v10  ;;  %v3002_v48 = vsel %vm261_vm2, %v2677_v15, 0.0 }
 0x19f   : > { %v3001_v18 = vadd.f32 %v3000_v24, %v2999_v35  ;;  %v3579_v51 = vmax.f32 %v3577_v61, %v3578_v21  ;;  %v3580_v60 = vsel %vm261_vm2, %v2677_v15, -inf  ;;  %v6223_v31 = vadd.f32 %v3276_v19, %v3275_v5  ;;  %v6232_v21 = vpop.f32.mrf.mxu1  ;;  %v6237_v61 = vpop.f32.mrf.mxu0 }
 0x1a0   : > { %v6225_v38 = vmax.f32 %v3853_v36, %v3854_v11  ;;  %v1848_v39 = vadd.f32 %v5820_v40, %v6006_v42  ;;  %v2680_v24 = vmax.f32 %v1856_v57, 0.0  ;;  %v2360_v10 = vadd.f32 %v5820_v40, %v6022_v45 }
 0x1a1   : > { %7052 = vst [vmem:[#allocation9_spill] sm:$0xff] %v6223_v31  ;;  %v3003_v20 = vadd.f32 %v3002_v48, %v3001_v18  ;;  %v3581_v33 = vmax.f32 %v3579_v51, %v3580_v60  ;;  %v6235_v9 = vadd.f32 %v3211_v29, %v7051_v13  ;;  %v2808_v35 = vmax.f32 %v2368_v52, 0.0  ;;  %v6256_v11 = vpop.f32.mrf.mxu0 }
 0x1a2   : > { %7053 = vst [vmem:[#allocation10_spill] sm:$0xff] %v6225_v38  ;;  %v2940_v12 = vadd.f32 %v2939_v55, %v6147_v23  ;;  %v3518_v42 = vmax.f32 %v6154_v8, %v3517_v37  ;;  %v6243_v1 = vadd.f32 %v5820_v40, %v5977_v14  ;;  %v1859_v45 = vadd.f32 %v5820_v40, %v6027_v56  ;;  %v6252_v8 = vpop.f32.mrf.mxu1 }
 0x1a3   : > { %v3004_v15 = vrot.slane %v3003_v20, 4  ;;  %v3582_v43 = vrot.slane %v3581_v33, 4  ;;  %v2678_v13 = vmax.f32 %v1848_v39, 0.0  ;;  %v1851_v29 = vadd.f32 %v5820_v40, %v6040_v17 }
 0x1a4   : > { %7055 = vst [vmem:[#allocation11_spill] sm:$0xff] %v6243_v1  ;;  %v3013_v36 = vsel %vm261_vm2, %v2680_v24, 0.0  ;;  %v2806_v57 = vmax.f32 %v2360_v10, 0.0  ;;  %v2363_v23 = vadd.f32 %v5820_v40, %v6049_v26  ;;  %v3591_v37 = vsel %vm261_vm2, %v2680_v24, -inf }
 0x1a5   : > { %v3005_v19 = vadd.f32 %v3004_v15, %v3003_v20  ;;  %v3583_v5 = vmax.f32 %v3581_v33, %v3582_v43  ;;  %v3289_v56 = vsel %vm261_vm2, %v2808_v35, 0.0  ;;  %v3867_v18 = vsel %vm261_vm2, %v2808_v35, -inf  ;;  %v6266_v15 = vpop.f32.mrf.mxu1 }
 0x1a6   : > { %v2371_v17 = vadd.f32 %v5820_v40, %v6035_v6  ;;  %v2679_v51 = vmax.f32 %v1851_v29, 0.0  ;;  %v2807_v52 = vmax.f32 %v2363_v23, 0.0  ;;  %v3010_v26 = vsel %vm261_vm2, %v2678_v13, 0.0  ;;  %v6268_v23 = vpop.f32.mrf.mxu0 }
 0x1a7   : > { %v3006_v14 = vrot.slane %v3005_v19, 2  ;;  %v3584_v55 = vrot.slane %v3583_v5, 2  ;;  %v2681_v20 = vmax.f32 %v1859_v45, 0.0  ;;  %v3588_v33 = vsel %vm261_vm2, %v2678_v13, -inf }
 0x1a8   : > { %v3286_v39 = vsel %vm261_vm2, %v2806_v57, 0.0  ;;  %v3011_v24 = vsel %vm261_vm2, %v2679_v51, 0.0  ;;  %v3589_v10 = vsel %vm261_vm2, %v2679_v51, -inf  ;;  %v3287_v45 = vsel %vm261_vm2, %v2807_v52, 0.0 }
 0x1a9   : > { %v3007_v48 = vadd.f32 %v3006_v14, %v3005_v19  ;;  %v3585_v60 = vmax.f32 %v3583_v5, %v3584_v55  ;;  %v3012_v6 = vadd.f32 %v3011_v24, %v3010_v26  ;;  %v3590_v29 = vmax.f32 %v3588_v33, %v3589_v10  ;;  %v6277_v33 = vpop.f32.mrf.mxu1 }
 0x1aa   : > { %v3864_v19 = vsel %vm261_vm2, %v2806_v57, -inf  ;;  %v2809_v5 = vmax.f32 %v2371_v17, 0.0  ;;  %v3865_v13 = vsel %vm261_vm2, %v2807_v52, -inf  ;;  %v3288_v51 = vadd.f32 %v3287_v45, %v3286_v39 }
 0x1ab   : > { %v3008_v43 = vrot.slane %v3007_v48, 1  ;;  %v3586_v35 = vrot.slane %v3585_v60, 1  ;;  %v3014_v32 = vadd.f32 %v3013_v36, %v3012_v6  ;;  %v3592_v38 = vmax.f32 %v3590_v29, %v3591_v37  ;;  %v6287_v37 = vpop.f32.mrf.mxu0 }
 0x1ac   : > { %v3866_v31 = vmax.f32 %v3864_v19, %v3865_v13  ;;  %v1872_v1 = vadd.f32 %v5820_v40, %v6053_v28  ;;  %v2384_v26 = vadd.f32 %v5820_v40, %v6066_v27  ;;  %v3015_v52 = vsel %vm261_vm2, %v2681_v20, 0.0  ;;  %v6293_v40 = vld [vmem:[%s7025_s2] ss:$0 sm:$0xff] }
 0x1ad   : > { %v3009_v14 = vadd.f32 %v3008_v43, %v3007_v48  ;;  %v3587_v55 = vmax.f32 %v3585_v60, %v3586_v35  ;;  %v3593_v36 = vsel %vm261_vm2, %v2681_v20, -inf  ;;  %v3291_v48 = vsel %vm261_vm2, %v2809_v5, 0.0  ;;  %v6306_v29 = vpop.f32.mrf.mxu0 }
 0x1ae   : > { %v3290_v28 = vadd.f32 %v3289_v56, %v3288_v51  ;;  %v3868_v60 = vmax.f32 %v3866_v31, %v3867_v18  ;;  %v1864_v27 = vadd.f32 %v6293_v40, %v6072_v54  ;;  %v3594_v39 = vmax.f32 %v3592_v38, %v3593_v36  ;;  %v6300_v31 = vpop.f32.mrf.mxu1 }
 0x1af   : > { %v6280_v57 = vsel %vm3432_vm3, %v3009_v14, %v2940_v12  ;;  %v6283_v17 = vsel %vm3432_vm3, %v3587_v55, %v3518_v42  ;;  %v3869_v12 = vsel %vm261_vm2, %v2809_v5, -inf  ;;  %v3016_v42 = vadd.f32 %v3015_v52, %v3014_v32 }
 0x1b0   : > { %v2376_v20 = vadd.f32 %v6293_v40, %v6080_v3  ;;  %v2684_v24 = vmax.f32 %v1872_v1, 0.0  ;;  %v2812_v10 = vmax.f32 %v2384_v26, 0.0  ;;  %v2682_v43 = vmax.f32 %v1864_v27, 0.0  ;;  %v6318_v51 = vpop.f32.mrf.mxu1 }
 0x1b1   : > { %v3292_v56 = vadd.f32 %v3291_v48, %v3290_v28  ;;  %v3870_v35 = vmax.f32 %v3868_v60, %v3869_v12  ;;  %v1875_v6 = vadd.f32 %v6293_v40, %v6085_v7  ;;  %v2387_v54 = vadd.f32 %v6293_v40, %v6092_v50 }
 0x1b2   : > { %v2810_v18 = vmax.f32 %v2376_v20, 0.0  ;;  %v3017_v38 = vsel %vm261_vm2, %v2682_v43, 0.0  ;;  %v3595_v3 = vsel %vm261_vm2, %v2682_v43, -inf  ;;  %v1867_v32 = vadd.f32 %v6293_v40, %v6094_v41 }
 0x1b3   : > { %v2379_v1 = vadd.f32 %v6293_v40, %v6109_v34  ;;  %v3018_v19 = vadd.f32 %v3017_v38, %v3016_v42  ;;  %v3596_v5 = vmax.f32 %v3594_v39, %v3595_v3  ;;  %v3021_v50 = vsel %vm261_vm2, %v2684_v24, 0.0  ;;  %v6321_v34 = vpop.f32.mrf.mxu0 }
 0x1b4   : > { %v3293_v45 = vsel %vm261_vm2, %v2810_v18, 0.0  ;;  %v3871_v7 = vsel %vm261_vm2, %v2810_v18, -inf  ;;  %v3599_v13 = vsel %vm261_vm2, %v2684_v24, -inf  ;;  %v3297_v26 = vsel %vm261_vm2, %v2812_v10, 0.0 }
 0x1b5   : > { %v3294_v14 = vadd.f32 %v3293_v45, %v3292_v56  ;;  %v3872_v55 = vmax.f32 %v3870_v35, %v3871_v7  ;;  %v2685_v41 = vmax.f32 %v1875_v6, 0.0  ;;  %v2683_v52 = vmax.f32 %v1867_v32, 0.0 }
 0x1b6   : > { %v2811_v36 = vmax.f32 %v2379_v1, 0.0  ;;  %v3875_v48 = vsel %vm261_vm2, %v2812_v10, -inf  ;;  %v2813_v28 = vmax.f32 %v2387_v54, 0.0  ;;  %v1880_v60 = vadd.f32 %v6293_v40, %v6128_v58  ;;  %v6336_v58 = vpop.f32.mrf.mxu1  ;;  %v6340_v54 = vpop.f32.mrf.mxu0 }
 0x1b7   : > { %v2392_v27 = vadd.f32 %v6293_v40, %v6136_v47  ;;  %v3019_v12 = vsel %vm261_vm2, %v2683_v52, 0.0  ;;  %v3597_v42 = vsel %vm261_vm2, %v2683_v52, -inf  ;;  %v1888_v39 = vadd.f32 %v6293_v40, %v6115_v53 }
 0x1b8   : > { %v2400_v20 = vadd.f32 %v6293_v40, %v6124_v49  ;;  %v3020_v24 = vadd.f32 %v3019_v12, %v3018_v19  ;;  %v3598_v43 = vmax.f32 %v3596_v5, %v3597_v42  ;;  %v3295_v10 = vsel %vm261_vm2, %v2811_v36, 0.0 }
 0x1b9   : > { %v3873_v56 = vsel %vm261_vm2, %v2811_v36, -inf  ;;  %v3023_v47 = vsel %vm261_vm2, %v2685_v41, 0.0  ;;  %v3601_v18 = vsel %vm261_vm2, %v2685_v41, -inf  ;;  %v3296_v35 = vadd.f32 %v3295_v10, %v3294_v14  ;;  %v6346_v14 = vpop.f32.mrf.mxu1 }
 0x1ba   : > { %v3874_v6 = vmax.f32 %v3872_v55, %v3873_v56  ;;  %v3022_v53 = vadd.f32 %v3021_v50, %v3020_v24  ;;  %v3600_v38 = vmax.f32 %v3598_v43, %v3599_v13  ;;  %v2686_v3 = vmax.f32 %v1880_v60, 0.0  ;;  %v6350_v60 = vpop.f32.mrf.mxu0 }
 0x1bb   : > { %v2814_v49 = vmax.f32 %v2392_v27, 0.0  ;;  %v3299_v32 = vsel %vm261_vm2, %v2813_v28, 0.0  ;;  %v3298_v1 = vadd.f32 %v3297_v26, %v3296_v35  ;;  %v1891_v5 = vadd.f32 %v6293_v40, %v6140_v44  ;;  %v6362_v56 = vpop.f32.mrf.mxu1 }
 0x1bc   : > { %v3876_v19 = vmax.f32 %v3874_v6, %v3875_v48  ;;  %v3877_v45 = vsel %vm261_vm2, %v2813_v28, -inf  ;;  %v2688_v7 = vmax.f32 %v1888_v39, 0.0  ;;  %v2816_v52 = vmax.f32 %v2400_v20, 0.0 }
 0x1bd   : > { %v3024_v41 = vadd.f32 %v3023_v47, %v3022_v53  ;;  %v3025_v55 = vsel %vm261_vm2, %v2686_v3, 0.0  ;;  %v3602_v50 = vmax.f32 %v3600_v38, %v3601_v18  ;;  %v3300_v13 = vadd.f32 %v3299_v32, %v3298_v1 }
 0x1be   : > { %v3301_v36 = vsel %vm261_vm2, %v2814_v49, 0.0  ;;  %v3603_v48 = vsel %vm261_vm2, %v2686_v3, -inf  ;;  %v3878_v27 = vmax.f32 %v3876_v19, %v3877_v45  ;;  %v3879_v44 = vsel %vm261_vm2, %v2814_v49, -inf }
 0x1bf   : > { %v3026_v26 = vadd.f32 %v3025_v55, %v3024_v41  ;;  %v3604_v28 = vmax.f32 %v3602_v50, %v3603_v48  ;;  %v3302_v12 = vadd.f32 %v3301_v36, %v3300_v13  ;;  %v2403_v42 = vadd.f32 %v6293_v40, %v6161_v4  ;;  %v6366_v4 = vpop.f32.mrf.mxu0 }
 0x1c0   : > { %v1883_v39 = vadd.f32 %v6293_v40, %v6167_v59  ;;  %v3029_v20 = vsel %vm261_vm2, %v2688_v7, 0.0  ;;  %v3607_v24 = vsel %vm261_vm2, %v2688_v7, -inf  ;;  %v3880_v43 = vmax.f32 %v3878_v27, %v3879_v44 }
 0x1c1   : > { %v2395_v10 = vadd.f32 %v6293_v40, %v6173_v46  ;;  %v3305_v47 = vsel %vm261_vm2, %v2816_v52, 0.0  ;;  %v3883_v18 = vsel %vm261_vm2, %v2816_v52, -inf  ;;  %v2689_v35 = vmax.f32 %v1891_v5, 0.0  ;;  %v6384_v50 = vpop.f32.mrf.mxu0 }
 0x1c2   : > { %v2687_v6 = vmax.f32 %v1883_v39, 0.0  ;;  %v2817_v53 = vmax.f32 %v2403_v42, 0.0  ;;  %v1896_v38 = vadd.f32 %v6293_v40, %v6192_v2  ;;  %v2408_v3 = vadd.f32 %v6293_v40, %v6198_v63  ;;  %v6380_v2 = vpop.f32.mrf.mxu1 }
 0x1c3   : > { %v2815_v59 = vmax.f32 %v2395_v10, 0.0  ;;  %v1904_v32 = vadd.f32 %v6293_v40, %v6178_v62  ;;  %v2416_v1 = vadd.f32 %v6293_v40, %v6188_v30  ;;  %v3031_v63 = vsel %vm261_vm2, %v2689_v35, 0.0 }
 0x1c4   : > { %v3027_v46 = vsel %vm261_vm2, %v2687_v6, 0.0  ;;  %v3605_v49 = vsel %vm261_vm2, %v2687_v6, -inf  ;;  %v3609_v52 = vsel %vm261_vm2, %v2689_v35, -inf  ;;  %v2690_v36 = vmax.f32 %v1896_v38, 0.0  ;;  %v6394_v6 = vpop.f32.mrf.mxu0 }
 0x1c5   : > { %v3028_v19 = vadd.f32 %v3027_v46, %v3026_v26  ;;  %v3606_v5 = vmax.f32 %v3604_v28, %v3605_v49  ;;  %v3303_v45 = vsel %vm261_vm2, %v2815_v59, 0.0  ;;  %v3881_v7 = vsel %vm261_vm2, %v2815_v59, -inf }
 0x1c6   : > { %v3304_v41 = vadd.f32 %v3303_v45, %v3302_v12  ;;  %v3882_v55 = vmax.f32 %v3880_v43, %v3881_v7  ;;  %v2818_v30 = vmax.f32 %v2408_v3, 0.0  ;;  %v3307_v26 = vsel %vm261_vm2, %v2817_v53, 0.0  ;;  %v6390_v12 = vpop.f32.mrf.mxu1 }
 0x1c7   : > { %v3030_v62 = vadd.f32 %v3029_v20, %v3028_v19  ;;  %v3608_v13 = vmax.f32 %v3606_v5, %v3607_v24  ;;  %v1907_v44 = vadd.f32 %v6293_v40, %v6203_v22  ;;  %v3885_v28 = vsel %vm261_vm2, %v2817_v53, -inf }
 0x1c8   : > { %v3306_v48 = vadd.f32 %v3305_v47, %v3304_v41  ;;  %v3884_v27 = vmax.f32 %v3882_v55, %v3883_v18  ;;  %v2692_v42 = vmax.f32 %v1904_v32, 0.0  ;;  %v2820_v39 = vmax.f32 %v2416_v1, 0.0  ;;  %v6406_v5 = vpop.f32.mrf.mxu1 }
 0x1c9   : > { %v3032_v10 = vadd.f32 %v3031_v63, %v3030_v62  ;;  %v3033_v43 = vsel %vm261_vm2, %v2690_v36, 0.0  ;;  %v3610_v20 = vmax.f32 %v3608_v13, %v3609_v52  ;;  %v3309_v35 = vsel %vm261_vm2, %v2818_v30, 0.0 }
 0x1ca   : > { %v3308_v24 = vadd.f32 %v3307_v26, %v3306_v48  ;;  %v3611_v18 = vsel %vm261_vm2, %v2690_v36, -inf  ;;  %v3886_v59 = vmax.f32 %v3884_v27, %v3885_v28  ;;  %v3887_v22 = vsel %vm261_vm2, %v2818_v30, -inf }
 0x1cb   : > { %v3034_v47 = vadd.f32 %v3033_v43, %v3032_v10  ;;  %v3612_v53 = vmax.f32 %v3610_v20, %v3611_v18  ;;  %v2419_v3 = vadd.f32 %v6293_v40, %v6214_v16  ;;  %v1899_v46 = vadd.f32 %v6293_v40, %v6219_v0  ;;  %v6410_v16 = vpop.f32.mrf.mxu0 }
 0x1cc   : > { %v3310_v38 = vadd.f32 %v3309_v35, %v3308_v24  ;;  %v3037_v49 = vsel %vm261_vm2, %v2692_v42, 0.0  ;;  %v3615_v32 = vsel %vm261_vm2, %v2692_v42, -inf  ;;  %v3888_v1 = vmax.f32 %v3886_v59, %v3887_v22 }
 0x1cd   : > { %v2411_v19 = vadd.f32 %v6293_v40, %v6232_v21  ;;  %v3313_v45 = vsel %vm261_vm2, %v2820_v39, 0.0  ;;  %v3891_v7 = vsel %vm261_vm2, %v2820_v39, -inf  ;;  %v2693_v63 = vmax.f32 %v1907_v44, 0.0  ;;  %v6428_v10 = vpop.f32.mrf.mxu0 }
 0x1ce   : > { %v2691_v52 = vmax.f32 %v1899_v46, 0.0  ;;  %v2821_v41 = vmax.f32 %v2419_v3, 0.0  ;;  %v1912_v55 = vadd.f32 %v6293_v40, %v6256_v11  ;;  %v2424_v62 = vadd.f32 %v6293_v40, %v6266_v15  ;;  %v6424_v11 = vpop.f32.mrf.mxu1 }
 0x1cf   : > { %v2819_v0 = vmax.f32 %v2411_v19, 0.0  ;;  %v1920_v36 = vadd.f32 %v6293_v40, %v6237_v61  ;;  %v2432_v30 = vadd.f32 %v6293_v40, %v6252_v8  ;;  %v3039_v15 = vsel %vm261_vm2, %v2693_v63, 0.0  ;;  %v6438_v19 = vpop.f32.mrf.mxu0 }
 0x1d0   : > { %v3035_v21 = vsel %vm261_vm2, %v2691_v52, 0.0  ;;  %v3613_v13 = vsel %vm261_vm2, %v2691_v52, -inf  ;;  %v3617_v28 = vsel %vm261_vm2, %v2693_v63, -inf  ;;  %v2694_v20 = vmax.f32 %v1912_v55, 0.0 }
 0x1d1   : > { %v3036_v26 = vadd.f32 %v3035_v21, %v3034_v47  ;;  %v3614_v48 = vmax.f32 %v3612_v53, %v3613_v13  ;;  %v3311_v27 = vsel %vm261_vm2, %v2819_v0, 0.0  ;;  %v3889_v44 = vsel %vm261_vm2, %v2819_v0, -inf }
 0x1d2   : > { %v3312_v42 = vadd.f32 %v3311_v27, %v3310_v38  ;;  %v3890_v39 = vmax.f32 %v3888_v1, %v3889_v44  ;;  %v2822_v8 = vmax.f32 %v2424_v62, 0.0  ;;  %v3315_v24 = vsel %vm261_vm2, %v2821_v41, 0.0  ;;  %v6434_v38 = vpop.f32.mrf.mxu1 }
 0x1d3   : > { %v3038_v61 = vadd.f32 %v3037_v49, %v3036_v26  ;;  %v3616_v43 = vmax.f32 %v3614_v48, %v3615_v32  ;;  %v1923_v18 = vadd.f32 %v6293_v40, %v6268_v23  ;;  %v3893_v59 = vsel %vm261_vm2, %v2821_v41, -inf }
 0x1d4   : > { %v3314_v35 = vadd.f32 %v3313_v45, %v3312_v42  ;;  %v3892_v47 = vmax.f32 %v3890_v39, %v3891_v7  ;;  %v2696_v22 = vmax.f32 %v1920_v36, 0.0  ;;  %v2824_v53 = vmax.f32 %v2432_v30, 0.0  ;;  %v6450_v30 = vpop.f32.mrf.mxu1 }
 0x1d5   : > { %v3040_v3 = vadd.f32 %v3039_v15, %v3038_v61  ;;  %v3041_v46 = vsel %vm261_vm2, %v2694_v20, 0.0  ;;  %v3618_v49 = vmax.f32 %v3616_v43, %v3617_v28  ;;  %v3317_v1 = vsel %vm261_vm2, %v2822_v8, 0.0 }
 0x1d6   : > { %v3316_v32 = vadd.f32 %v3315_v24, %v3314_v35  ;;  %v3619_v7 = vsel %vm261_vm2, %v2694_v20, -inf  ;;  %v3894_v63 = vmax.f32 %v3892_v47, %v3893_v59  ;;  %v3895_v23 = vsel %vm261_vm2, %v2822_v8, -inf }
 0x1d7   : > { %v3042_v45 = vadd.f32 %v3041_v46, %v3040_v3  ;;  %v3620_v52 = vmax.f32 %v3618_v49, %v3619_v7  ;;  %v2435_v0 = vadd.f32 %v6293_v40, %v6277_v33  ;;  %v1915_v55 = vadd.f32 %v6293_v40, %v6287_v37  ;;  %v6454_v33 = vpop.f32.mrf.mxu0 }
 0x1d8   : > { %v3318_v41 = vadd.f32 %v3317_v1, %v3316_v32  ;;  %v3045_v62 = vsel %vm261_vm2, %v2696_v22, 0.0  ;;  %v3623_v21 = vsel %vm261_vm2, %v2696_v22, -inf  ;;  %v3896_v13 = vmax.f32 %v3894_v63, %v3895_v23 }
 0x1d9   : > { %v2427_v36 = vadd.f32 %v6293_v40, %v6300_v31  ;;  %v3321_v26 = vsel %vm261_vm2, %v2824_v53, 0.0  ;;  %v3899_v48 = vsel %vm261_vm2, %v2824_v53, -inf  ;;  %v2697_v27 = vmax.f32 %v1923_v18, 0.0  ;;  %v6472_v22 = vpop.f32.mrf.mxu0 }
 0x1da   : > { %v2695_v44 = vmax.f32 %v1915_v55, 0.0  ;;  %v2825_v15 = vmax.f32 %v2435_v0, 0.0  ;;  %v1928_v28 = vadd.f32 %v6293_v40, %v6321_v34  ;;  %v2440_v42 = vadd.f32 %v6293_v40, %v6336_v58  ;;  %v6468_v34 = vpop.f32.mrf.mxu1 }
 0x1db   : > { %v2823_v37 = vmax.f32 %v2427_v36, 0.0  ;;  %v1936_v61 = vadd.f32 %v6293_v40, %v6306_v29  ;;  %v2448_v43 = vadd.f32 %v6293_v40, %v6318_v51  ;;  %v3047_v58 = vsel %vm261_vm2, %v2697_v27, 0.0 }
 0x1dc   : > { %v3043_v31 = vsel %vm261_vm2, %v2695_v44, 0.0  ;;  %v3621_v39 = vsel %vm261_vm2, %v2695_v44, -inf  ;;  %v3625_v47 = vsel %vm261_vm2, %v2697_v27, -inf  ;;  %v2698_v3 = vmax.f32 %v1928_v28, 0.0 }
 0x1dd   : > { %v3044_v20 = vadd.f32 %v3043_v31, %v3042_v45  ;;  %v3622_v8 = vmax.f32 %v3620_v52, %v3621_v39  ;;  %v3319_v24 = vsel %vm261_vm2, %v2823_v37, 0.0  ;;  %v3897_v35 = vsel %vm261_vm2, %v2823_v37, -inf  ;;  %v6478_v52 = vpop.f32.mrf.mxu1 }
 0x1de   : > { %v3320_v18 = vadd.f32 %v3319_v24, %v3318_v41  ;;  %v3898_v59 = vmax.f32 %v3896_v13, %v3897_v35  ;;  %v2826_v51 = vmax.f32 %v2440_v42, 0.0  ;;  %v3323_v46 = vsel %vm261_vm2, %v2825_v15, 0.0 }
 0x1df   : > { %v3046_v29 = vadd.f32 %v3045_v62, %v3044_v20  ;;  %v3624_v53 = vmax.f32 %v3622_v8, %v3623_v21  ;;  %v1939_v1 = vadd.f32 %v6293_v40, %v6340_v54  ;;  %v3901_v45 = vsel %vm261_vm2, %v2825_v15, -inf  ;;  %v6482_v21 = vpop.f32.mrf.mxu0  ;;  %v6494_v39 = vpop.f32.mrf.mxu1 }
 0x1e0   : > { %v3322_v49 = vadd.f32 %v3321_v26, %v3320_v18  ;;  %v3900_v32 = vmax.f32 %v3898_v59, %v3899_v48  ;;  %v2700_v7 = vmax.f32 %v1936_v61, 0.0  ;;  %v2828_v63 = vmax.f32 %v2448_v43, 0.0 }
 0x1e1   : > { %v3048_v23 = vadd.f32 %v3047_v58, %v3046_v29  ;;  %v3049_v41 = vsel %vm261_vm2, %v2698_v3, 0.0  ;;  %v3626_v0 = vmax.f32 %v3624_v53, %v3625_v47  ;;  %v3325_v62 = vsel %vm261_vm2, %v2826_v51, 0.0 }
 0x1e2   : > { %v3324_v55 = vadd.f32 %v3323_v46, %v3322_v49  ;;  %v3627_v36 = vsel %vm261_vm2, %v2698_v3, -inf  ;;  %v3902_v26 = vmax.f32 %v3900_v32, %v3901_v45  ;;  %v3903_v54 = vsel %vm261_vm2, %v2826_v51, -inf }
 0x1e3   : > { %v3050_v13 = vadd.f32 %v3049_v41, %v3048_v23  ;;  %v3628_v48 = vmax.f32 %v3626_v0, %v3627_v36  ;;  %v2451_v44 = vadd.f32 %v6293_v40, %v6346_v14  ;;  %v1931_v15 = vadd.f32 %v6293_v40, %v6350_v60  ;;  %v6498_v14 = vpop.f32.mrf.mxu0 }
 0x1e4   : > { %v3326_v27 = vadd.f32 %v3325_v62, %v3324_v55  ;;  %v3053_v37 = vsel %vm261_vm2, %v2700_v7, 0.0  ;;  %v3631_v28 = vsel %vm261_vm2, %v2700_v7, -inf  ;;  %v3904_v42 = vmax.f32 %v3902_v26, %v3903_v54 }
 0x1e5   : > { %v2443_v31 = vadd.f32 %v6293_v40, %v6362_v56  ;;  %v3329_v61 = vsel %vm261_vm2, %v2828_v63, 0.0  ;;  %v3907_v43 = vsel %vm261_vm2, %v2828_v63, -inf  ;;  %v2701_v20 = vmax.f32 %v1939_v1, 0.0  ;;  %v6516_v1 = vpop.f32.mrf.mxu0 }
 0x1e6   : > { %v2699_v8 = vmax.f32 %v1931_v15, 0.0  ;;  %v2829_v24 = vmax.f32 %v2451_v44, 0.0  ;;  %v1944_v35 = vadd.f32 %v6293_v40, %v6384_v50  ;;  %v2456_v58 = vadd.f32 %v6293_v40, %v6390_v12  ;;  %v6512_v50 = vpop.f32.mrf.mxu1 }
 0x1e7   : > { %v2827_v60 = vmax.f32 %v2443_v31, 0.0  ;;  %v1952_v18 = vadd.f32 %v6293_v40, %v6366_v4  ;;  %v2464_v59 = vadd.f32 %v6293_v40, %v6380_v2  ;;  %v3055_v12 = vsel %vm261_vm2, %v2701_v20, 0.0  ;;  %v6526_v15 = vpop.f32.mrf.mxu0 }
 0x1e8   : > { %v3051_v56 = vsel %vm261_vm2, %v2699_v8, 0.0  ;;  %v3629_v47 = vsel %vm261_vm2, %v2699_v8, -inf  ;;  %v3633_v46 = vsel %vm261_vm2, %v2701_v20, -inf  ;;  %v2702_v7 = vmax.f32 %v1944_v35, 0.0  ;;  %v6522_v26 = vpop.f32.mrf.mxu1 }
 0x1e9   : > { %v3052_v29 = vadd.f32 %v3051_v56, %v3050_v13  ;;  %v3630_v53 = vmax.f32 %v3628_v48, %v3629_v47  ;;  %v3327_v3 = vsel %vm261_vm2, %v2827_v60, 0.0  ;;  %v3905_v51 = vsel %vm261_vm2, %v2827_v60, -inf  ;;  %v7057_v47 = vld [vmem:[#allocation11_spill] sm:$0xff] }
 0x1ea   : > { %v3328_v49 = vadd.f32 %v3327_v3, %v3326_v27  ;;  %v3906_v32 = vmax.f32 %v3904_v42, %v3905_v51  ;;  %v2830_v2 = vmax.f32 %v2456_v58, 0.0  ;;  %v3331_v63 = vsel %vm261_vm2, %v2829_v24, 0.0  ;;  %v6542_v56 = vpop.f32.mrf.mxu1 }
 0x1eb   : > { %v3054_v4 = vadd.f32 %v3053_v37, %v3052_v29  ;;  %v3632_v45 = vmax.f32 %v3630_v53, %v3631_v28  ;;  %v1955_v0 = vadd.f32 %v6293_v40, %v6394_v6  ;;  %v3909_v55 = vsel %vm261_vm2, %v2829_v24, -inf }
 0x1ec   : > { %v3330_v23 = vadd.f32 %v3329_v61, %v3328_v49  ;;  %v3908_v41 = vmax.f32 %v3906_v32, %v3907_v43  ;;  %v2704_v62 = vmax.f32 %v1952_v18, 0.0  ;;  %v2832_v13 = vmax.f32 %v2464_v59, 0.0 }
 0x1ed   : > { %v3056_v36 = vadd.f32 %v3055_v12, %v3054_v4  ;;  %v3057_v54 = vsel %vm261_vm2, %v2702_v7, 0.0  ;;  %v3634_v48 = vmax.f32 %v3632_v45, %v3633_v46  ;;  %v3333_v44 = vsel %vm261_vm2, %v2830_v2, 0.0 }
 0x1ee   : > { %v3332_v27 = vadd.f32 %v3331_v63, %v3330_v23  ;;  %v3635_v28 = vsel %vm261_vm2, %v2702_v7, -inf  ;;  %v3910_v42 = vmax.f32 %v3908_v41, %v3909_v55  ;;  %v3911_v6 = vsel %vm261_vm2, %v2830_v2, -inf  ;;  %v6558_v2 = vpop.f32.mrf.mxu1 }
 0x1ef   : > { %v3058_v37 = vadd.f32 %v3057_v54, %v3056_v36  ;;  %v3636_v31 = vmax.f32 %v3634_v48, %v3635_v28  ;;  %v2467_v43 = vadd.f32 %v6293_v40, %v6406_v5  ;;  %v1947_v20 = vadd.f32 %v6293_v40, %v6410_v16  ;;  %v6546_v16 = vpop.f32.mrf.mxu0 }
 0x1f0   : > { %v3334_v61 = vadd.f32 %v3333_v44, %v3332_v27  ;;  %v3213_v8 = vrot.slane %v6235_v9, 2  ;;  %v7056_v24 = vrot.slane %v7054_v25, 4  ;;  %v3912_v35 = vmax.f32 %v3910_v42, %v3911_v6  ;;  %v6571_v6 = vpop.f32.mrf.mxu1 }
 0x1f1   : > { %v2459_v58 = vadd.f32 %v6293_v40, %v6424_v11  ;;  %v2805_v18 = vmax.f32 %v7057_v47, 0.0  ;;  %v3061_v5 = vsel %vm261_vm2, %v2704_v62, 0.0  ;;  %v2705_v59 = vmax.f32 %v1955_v0, 0.0  ;;  %v6562_v41 = vpop.f32.mrf.mxu0 }
 0x1f2   : > { %v6538_v60 = vmax.f32 %v7054_v25, %v7056_v24  ;;  %v2703_v29 = vmax.f32 %v1947_v20, 0.0  ;;  %v3639_v53 = vsel %vm261_vm2, %v2704_v62, -inf  ;;  %v1960_v25 = vadd.f32 %v6293_v40, %v6438_v19 }
 0x1f3   : > { %v2831_v3 = vmax.f32 %v2459_v58, 0.0  ;;  %v2472_v51 = vadd.f32 %v6293_v40, %v6450_v30  ;;  %v3337_v11 = vsel %vm261_vm2, %v2832_v13, 0.0  ;;  %v2833_v12 = vmax.f32 %v2467_v43, 0.0  ;;  %v6575_v24 = vpop.f32.mrf.mxu0 }
 0x1f4   : > { %v3059_v46 = vsel %vm261_vm2, %v2703_v29, 0.0  ;;  %v3637_v49 = vsel %vm261_vm2, %v2703_v29, -inf  ;;  %v3915_v19 = vsel %vm261_vm2, %v2832_v13, -inf  ;;  %v3063_v63 = vsel %vm261_vm2, %v2705_v59, 0.0 }
 0x1f5   : > { %v3060_v32 = vadd.f32 %v3059_v46, %v3058_v37  ;;  %v3638_v4 = vmax.f32 %v3636_v31, %v3637_v49  ;;  %v3335_v45 = vsel %vm261_vm2, %v2831_v3, 0.0  ;;  %v3913_v7 = vsel %vm261_vm2, %v2831_v3, -inf }
 0x1f6   : > { %v3336_v30 = vadd.f32 %v3335_v45, %v3334_v61  ;;  %v3914_v23 = vmax.f32 %v3912_v35, %v3913_v7  ;;  %v2706_v62 = vmax.f32 %v1960_v25, 0.0  ;;  %v2834_v36 = vmax.f32 %v2472_v51, 0.0  ;;  %v7058_v7 = vld [vmem:[#allocation9_spill] sm:$0xff] }
 0x1f7   : > { %v3062_v0 = vadd.f32 %v3061_v5, %v3060_v32  ;;  %v3640_v55 = vmax.f32 %v3638_v4, %v3639_v53  ;;  %v3641_v54 = vsel %vm261_vm2, %v2705_v59, -inf  ;;  %v1968_v44 = vadd.f32 %v6293_v40, %v6428_v10  ;;  %v6585_v53 = vpop.f32.mrf.mxu1 }
 0x1f8   : > { %v3338_v48 = vadd.f32 %v3337_v11, %v3336_v30  ;;  %v3916_v27 = vmax.f32 %v3914_v23, %v3915_v19  ;;  %v3339_v37 = vsel %vm261_vm2, %v2833_v12, 0.0  ;;  %v3917_v13 = vsel %vm261_vm2, %v2833_v12, -inf  ;;  %v6589_v11 = vpop.f32.mrf.mxu0  ;;  %v7059_v23 = vld [vmem:[#allocation10_spill] sm:$0xff] }
 0x1f9   : > { %v3064_v28 = vadd.f32 %v3063_v63, %v3062_v0  ;;  %v1971_v42 = vadd.f32 %v6293_v40, %v6454_v33  ;;  %v3065_v31 = vsel %vm261_vm2, %v2706_v62, 0.0  ;;  %v3642_v61 = vmax.f32 %v3640_v55, %v3641_v54  ;;  %v6606_v30 = vpop.f32.mrf.mxu1 }
 0x1fa   : > { %v3340_v43 = vadd.f32 %v3339_v37, %v3338_v48  ;;  %v3341_v20 = vsel %vm261_vm2, %v2834_v36, 0.0  ;;  %v3643_v10 = vsel %vm261_vm2, %v2706_v62, -inf  ;;  %v3918_v58 = vmax.f32 %v3916_v27, %v3917_v13  ;;  %v6613_v62 = vpop.f32.mrf.mxu0 }
 0x1fb   : > { %v3066_v35 = vadd.f32 %v3065_v31, %v3064_v28  ;;  %v3919_v47 = vsel %vm261_vm2, %v2834_v36, -inf  ;;  %v3644_v5 = vmax.f32 %v3642_v61, %v3643_v10  ;;  %v1963_v33 = vadd.f32 %v6293_v40, %v6472_v22 }
 0x1fc   : > { %v6579_v59 = vadd.f32 %v3341_v20, %v3340_v43  ;;  %v6583_v29 = vmax.f32 %v3918_v58, %v3919_v47  ;;  %v2708_v3 = vmax.f32 %v1968_v44, 0.0  ;;  %v2480_v25 = vadd.f32 %v6293_v40, %v6434_v38  ;;  %v6633_v10 = vpop.f32.mrf.mxu0 }
 0x1fd   : > { %v2707_v51 = vmax.f32 %v1963_v33, 0.0  ;;  %v6592_v12 = vadd.f32 %v3213_v8, %v6235_v9  ;;  %v3791_v46 = vrot.slane %v6538_v60, 2  ;;  %v3278_v49 = vsel %vm261_vm2, %v2805_v18, 0.0 }
 0x1fe   : > { %v2709_v32 = vmax.f32 %v1971_v42, 0.0  ;;  %v3856_v22 = vsel %vm261_vm2, %v2805_v18, -inf  ;;  %v2483_v4 = vadd.f32 %v6293_v40, %v6468_v34  ;;  %v6602_v19 = vadd.f32 %v3278_v49, %v7058_v7 }
 0x1ff   : > { %v3067_v45 = vsel %vm261_vm2, %v2707_v51, 0.0  ;;  %v3645_v38 = vsel %vm261_vm2, %v2707_v51, -inf  ;;  %v2475_v8 = vadd.f32 %v6293_v40, %v6478_v52  ;;  %v6609_v0 = vmax.f32 %v7059_v23, %v3856_v22 }
 0x200   : > { %v3068_v63 = vadd.f32 %v3067_v45, %v3066_v35  ;;  %v3646_v9 = vmax.f32 %v3644_v5, %v3645_v38  ;;  %v3069_v18 = vsel %vm261_vm2, %v2708_v3, 0.0  ;;  %v3647_v34 = vsel %vm261_vm2, %v2708_v3, -inf  ;;  %v6653_v45 = vpop.f32.mrf.mxu0 }
 0x201   : > { %v2836_v55 = vmax.f32 %v2480_v25, 0.0  ;;  %v6616_v36 = vmax.f32 %v6538_v60, %v3791_v46  ;;  %v3071_v54 = vsel %vm261_vm2, %v2709_v32, 0.0  ;;  %v3649_v52 = vsel %vm261_vm2, %v2709_v32, -inf  ;;  %v6625_v60 = vpop.f32.mrf.mxu1 }
 0x202   : > { %v3070_v48 = vadd.f32 %v3069_v18, %v3068_v63  ;;  %v3648_v27 = vmax.f32 %v3646_v9, %v3647_v34  ;;  %v2837_v44 = vmax.f32 %v2483_v4, 0.0  ;;  %v1984_v37 = vadd.f32 %v6293_v40, %v6482_v21 }
 0x203   : > { %v1976_v13 = vadd.f32 %v6293_v40, %v6498_v14  ;;  %v3280_v28 = vrot.slane %v6602_v19, 4  ;;  %v2835_v61 = vmax.f32 %v2475_v8, 0.0  ;;  %v3858_v43 = vrot.slane %v6609_v0, 4  ;;  %v6646_v49 = vpop.f32.mrf.mxu1 }
 0x204   : > { %v3072_v42 = vadd.f32 %v3071_v54, %v3070_v48  ;;  %v3650_v31 = vmax.f32 %v3648_v27, %v3649_v52  ;;  %v3345_v20 = vsel %vm261_vm2, %v2836_v55, 0.0  ;;  %v2496_v35 = vadd.f32 %v6293_v40, %v6494_v39 }
 0x205   : > { %v2488_v21 = vadd.f32 %v6293_v40, %v6512_v50  ;;  %v6636_v14 = vsel %vm261_vm2, %v2836_v55, -inf  ;;  %v1987_v5 = vadd.f32 %v6293_v40, %v6516_v1  ;;  %v6641_v33 = vsel %vm261_vm2, %v2837_v44, 0.0 }
 0x206   : > { %v3073_v58 = vrot.slane %v3072_v42, 4  ;;  %v3651_v47 = vrot.slane %v3650_v31, 4  ;;  %v2712_v3 = vmax.f32 %v1984_v37, 0.0  ;;  %v2710_v25 = vmax.f32 %v1976_v13, 0.0  ;;  %v6667_v37 = vpop.f32.mrf.mxu0 }
 0x207   : > { %v3343_v50 = vsel %vm261_vm2, %v2835_v61, 0.0  ;;  %v1979_v46 = vadd.f32 %v6293_v40, %v6526_v15  ;;  %v6649_v32 = vsel %vm261_vm2, %v2837_v44, -inf  ;;  %v2840_v22 = vmax.f32 %v2496_v35, 0.0 }
 0x208   : > { %v3074_v39 = vadd.f32 %v3073_v58, %v3072_v42  ;;  %v3652_v51 = vmax.f32 %v3650_v31, %v3651_v47  ;;  %v2838_v1 = vmax.f32 %v2488_v21, 0.0  ;;  %v2491_v4 = vadd.f32 %v6293_v40, %v6542_v56  ;;  %v6660_v56 = vpop.f32.mrf.mxu1 }
 0x209   : > { %v2713_v63 = vmax.f32 %v1987_v5, 0.0  ;;  %v2711_v9 = vmax.f32 %v1979_v46, 0.0  ;;  %v3344_v8 = vadd.f32 %v3343_v50, %v6579_v59  ;;  %v3921_v15 = vsel %vm261_vm2, %v2835_v61, -inf }
 0x20a   : > { %v3075_v38 = vrot.slane %v3074_v39, 2  ;;  %v3653_v7 = vrot.slane %v3652_v51, 2  ;;  %v3082_v23 = vsel %vm261_vm2, %v2712_v3, 0.0  ;;  %v2839_v18 = vmax.f32 %v2491_v4, 0.0 }
 0x20b   : > { %v3660_v54 = vsel %vm261_vm2, %v2712_v3, -inf  ;;  %v3079_v48 = vsel %vm261_vm2, %v2710_v25, 0.0  ;;  %v3657_v27 = vsel %vm261_vm2, %v2710_v25, -inf  ;;  %v2499_v52 = vadd.f32 %v6293_v40, %v6522_v26 }
 0x20c   : > { %v3076_v34 = vadd.f32 %v3075_v38, %v3074_v39  ;;  %v3654_v55 = vmax.f32 %v3652_v51, %v3653_v7  ;;  %v3080_v59 = vsel %vm261_vm2, %v2711_v9, 0.0  ;;  %v3658_v44 = vsel %vm261_vm2, %v2711_v9, -inf  ;;  %v6676_v39 = vpop.f32.mrf.mxu1  ;;  %v6679_v38 = vpop.f32.mrf.mxu0 }
 0x20d   : > { %v3081_v31 = vadd.f32 %v3080_v59, %v3079_v48  ;;  %v3659_v61 = vmax.f32 %v3657_v27, %v3658_v44  ;;  %v3358_v35 = vsel %vm261_vm2, %v2840_v22, 0.0  ;;  %v3355_v21 = vsel %vm261_vm2, %v2838_v1, 0.0 }
 0x20e   : > { %v3077_v13 = vrot.slane %v3076_v34, 1  ;;  %v3655_v42 = vrot.slane %v3654_v55, 1  ;;  %v3356_v58 = vsel %vm261_vm2, %v2839_v18, 0.0  ;;  %v3934_v47 = vsel %vm261_vm2, %v2839_v18, -inf  ;;  %v6696_v59 = vpop.f32.mrf.mxu1 }
 0x20f   : > { %v3933_v3 = vsel %vm261_vm2, %v2838_v1, -inf  ;;  %v2000_v25 = vadd.f32 %v6293_v40, %v6546_v16  ;;  %v3936_v51 = vsel %vm261_vm2, %v2840_v22, -inf  ;;  %v2841_v50 = vmax.f32 %v2499_v52, 0.0 }
 0x210   : > { %v3078_v5 = vadd.f32 %v3077_v13, %v3076_v34  ;;  %v3656_v26 = vmax.f32 %v3654_v55, %v3655_v42  ;;  %v3357_v46 = vadd.f32 %v3356_v58, %v3355_v21  ;;  %v3935_v4 = vmax.f32 %v3933_v3, %v3934_v47  ;;  %v6718_v21 = vpop.f32.mrf.mxu1 }
 0x211   : > { %v3083_v1 = vadd.f32 %v3082_v23, %v3081_v31  ;;  %v3661_v18 = vmax.f32 %v3659_v61, %v3660_v54  ;;  %v6689_v16 = vadd.f32 %v3345_v20, %v3344_v8  ;;  %v3922_v34 = vmax.f32 %v6583_v29, %v3921_v15  ;;  %v6704_v8 = vpop.f32.mrf.mxu0 }
 0x212   : > { %v6683_v7 = vsel %vm3434_vm4, %v3078_v5, %v6280_v57  ;;  %v6687_v9 = vsel %vm3434_vm4, %v3656_v26, %v6283_v17  ;;  %v3359_v22 = vadd.f32 %v3358_v35, %v3357_v46  ;;  %v3937_v55 = vmax.f32 %v3935_v4, %v3936_v51 }
 0x213   : > { %v3084_v48 = vsel %vm261_vm2, %v2713_v63, 0.0  ;;  %v3662_v27 = vsel %vm261_vm2, %v2713_v63, -inf  ;;  %v2716_v52 = vmax.f32 %v2000_v25, 0.0  ;;  %v1992_v57 = vadd.f32 %v6293_v40, %v6562_v41 }
 0x214   : > { %v3360_v17 = vsel %vm261_vm2, %v2841_v50, 0.0  ;;  %v3938_v23 = vsel %vm261_vm2, %v2841_v50, -inf  ;;  %v2512_v20 = vadd.f32 %v6293_v40, %v6558_v2  ;;  %v2504_v29 = vadd.f32 %v6293_v40, %v6571_v6 }
 0x215   : > { %v2714_v15 = vmax.f32 %v1992_v57, 0.0  ;;  %v3085_v63 = vadd.f32 %v3084_v48, %v3083_v1  ;;  %v3663_v54 = vmax.f32 %v3661_v18, %v3662_v27  ;;  %v3361_v44 = vadd.f32 %v3360_v17, %v3359_v22 }
 0x216   : > { %v2842_v13 = vmax.f32 %v2504_v29, 0.0  ;;  %v3939_v41 = vmax.f32 %v3937_v55, %v3938_v23  ;;  %v1995_v42 = vadd.f32 %v6293_v40, %v6589_v11  ;;  %v2507_v31 = vadd.f32 %v6293_v40, %v6606_v30 }
 0x217   : > { %v6711_v61 = vmax.f32 %v3922_v34, %v6636_v14  ;;  %v3090_v2 = vsel %vm261_vm2, %v2716_v52, 0.0  ;;  %v2003_v6 = vadd.f32 %v6293_v40, %v6575_v24  ;;  %v2515_v35 = vadd.f32 %v6293_v40, %v6585_v53  ;;  %v6724_v14 = vpop.f32.mrf.mxu0  ;;  %v6731_v34 = vpop.f32.mrf.mxu1 }
 0x218   : > { %v3086_v58 = vsel %vm261_vm2, %v2714_v15, 0.0  ;;  %v3664_v11 = vsel %vm261_vm2, %v2714_v15, -inf  ;;  %v3362_v47 = vsel %vm261_vm2, %v2842_v13, 0.0  ;;  %v3940_v30 = vsel %vm261_vm2, %v2842_v13, -inf }
 0x219   : > { %v3668_v5 = vsel %vm261_vm2, %v2716_v52, -inf  ;;  %v2844_v26 = vmax.f32 %v2512_v20, 0.0  ;;  %v3087_v3 = vadd.f32 %v3086_v58, %v3085_v63  ;;  %v3665_v24 = vmax.f32 %v3663_v54, %v3664_v11  ;;  %v6739_v52 = vpop.f32.mrf.mxu0 }
 0x21a   : > { %v3363_v25 = vadd.f32 %v3362_v47, %v3361_v44  ;;  %v3941_v51 = vmax.f32 %v3939_v41, %v3940_v30  ;;  %v2715_v53 = vmax.f32 %v1995_v42, 0.0  ;;  %v2843_v50 = vmax.f32 %v2507_v31, 0.0  ;;  %v6749_v44 = vpop.f32.mrf.mxu1 }
 0x21b   : > { %v2717_v46 = vmax.f32 %v2003_v6, 0.0  ;;  %v2845_v4 = vmax.f32 %v2515_v35, 0.0  ;;  %v2016_v1 = vadd.f32 %v6293_v40, %v6613_v62  ;;  %v2528_v18 = vadd.f32 %v6293_v40, %v6625_v60  ;;  %v6751_v6 = vpop.f32.mrf.mxu0 }
 0x21c   : > { %v3088_v22 = vsel %vm261_vm2, %v2715_v53, 0.0  ;;  %v3666_v55 = vsel %vm261_vm2, %v2715_v53, -inf  ;;  %v2008_v48 = vadd.f32 %v6293_v40, %v6633_v10  ;;  %v2520_v27 = vadd.f32 %v6293_v40, %v6646_v49 }
 0x21d   : > { %v3089_v57 = vadd.f32 %v3088_v22, %v3087_v3  ;;  %v3667_v17 = vmax.f32 %v3665_v24, %v3666_v55  ;;  %v3364_v62 = vsel %vm261_vm2, %v2843_v50, 0.0  ;;  %v3942_v60 = vsel %vm261_vm2, %v2843_v50, -inf }
 0x21e   : > { %v3366_v23 = vsel %vm261_vm2, %v2844_v26, 0.0  ;;  %v3944_v20 = vsel %vm261_vm2, %v2844_v26, -inf  ;;  %v3365_v29 = vadd.f32 %v3364_v62, %v3363_v25  ;;  %v3943_v15 = vmax.f32 %v3941_v51, %v3942_v60  ;;  %v6760_v25 = vpop.f32.mrf.mxu1 }
 0x21f   : > { %v3091_v63 = vadd.f32 %v3090_v2, %v3089_v57  ;;  %v3669_v54 = vmax.f32 %v3667_v17, %v3668_v5  ;;  %v2720_v10 = vmax.f32 %v2016_v1, 0.0  ;;  %v6747_v49 = vadd.f32 %v6293_v40, %v6653_v45  ;;  %v6772_v1 = vpop.f32.mrf.mxu0 }
 0x220   : > { %v3367_v13 = vadd.f32 %v3366_v23, %v3365_v29  ;;  %v3945_v41 = vmax.f32 %v3943_v15, %v3944_v20  ;;  %v2848_v42 = vmax.f32 %v2528_v18, 0.0  ;;  %v2846_v31 = vmax.f32 %v2520_v27, 0.0  ;;  %v2551_v29 = vpop.f32.mrf.mxu1 }
 0x221   : > { %v3092_v35 = vsel %vm261_vm2, %v2717_v46, 0.0  ;;  %v3670_v58 = vsel %vm261_vm2, %v2717_v46, -inf  ;;  %v3368_v2 = vsel %vm261_vm2, %v2845_v4, 0.0  ;;  %v2718_v11 = vmax.f32 %v2008_v48, 0.0  ;;  %v6768_v46 = vld [vmem:[%s7025_s2] ss:$0 sm:$0xff] }
 0x222   : > { %v3946_v47 = vsel %vm261_vm2, %v2845_v4, -inf  ;;  %v3093_v30 = vadd.f32 %v3092_v35, %v3091_v63  ;;  %v3671_v40 = vmax.f32 %v3669_v54, %v3670_v58  ;;  %v3369_v45 = vadd.f32 %v3368_v2, %v3367_v13  ;;  %v6789_v54 = vpop.f32.mrf.mxu0  ;;  %v6798_v2 = vpop.f32.mrf.mxu1 }
 0x223   : > { %v3098_v5 = vsel %vm261_vm2, %v2720_v10, 0.0  ;;  %v3370_v26 = vsel %vm261_vm2, %v2846_v31, 0.0  ;;  %v3947_v3 = vmax.f32 %v3945_v41, %v3946_v47  ;;  %v3948_v24 = vsel %vm261_vm2, %v2846_v31, -inf }
 0x224   : > { %v3676_v51 = vsel %vm261_vm2, %v2720_v10, -inf  ;;  %v3374_v53 = vsel %vm261_vm2, %v2848_v42, 0.0  ;;  %v2721_v50 = vmax.f32 %v6747_v49, 0.0  ;;  %v2531_v4 = vadd.f32 %v6768_v46, %v6660_v56 }
 0x225   : > { %v3094_v18 = vsel %vm261_vm2, %v2718_v11, 0.0  ;;  %v3672_v22 = vsel %vm261_vm2, %v2718_v11, -inf  ;;  %v2011_v55 = vadd.f32 %v6768_v46, %v6667_v37  ;;  %v2523_v48 = vadd.f32 %v6768_v46, %v6676_v39 }
 0x226   : > { %v3095_v27 = vadd.f32 %v3094_v18, %v3093_v30  ;;  %v3673_v57 = vmax.f32 %v3671_v40, %v3672_v22  ;;  %v3371_v17 = vadd.f32 %v3370_v26, %v3369_v45  ;;  %v3949_v62 = vmax.f32 %v3947_v3, %v3948_v24  ;;  %v6800_v45 = vpop.f32.mrf.mxu0 }
 0x227   : > { %v2719_v60 = vmax.f32 %v2011_v55, 0.0  ;;  %v2847_v23 = vmax.f32 %v2523_v48, 0.0  ;;  %v2032_v56 = vadd.f32 %v6768_v46, %v6679_v38  ;;  %v2024_v20 = vadd.f32 %v6768_v46, %v6704_v8 }
 0x228   : > { %v3952_v15 = vsel %vm261_vm2, %v2848_v42, -inf  ;;  %v2849_v63 = vmax.f32 %v2531_v4, 0.0  ;;  %v2544_v37 = vadd.f32 %v6768_v46, %v6696_v59  ;;  %v2536_v39 = vadd.f32 %v6768_v46, %v6718_v21 }
 0x229   : > { %v3096_v10 = vsel %vm261_vm2, %v2719_v60, 0.0  ;;  %v3674_v49 = vsel %vm261_vm2, %v2719_v60, -inf  ;;  %v3372_v38 = vsel %vm261_vm2, %v2847_v23, 0.0  ;;  %v3950_v8 = vsel %vm261_vm2, %v2847_v23, -inf  ;;  %v6816_v60 = vpop.f32.mrf.mxu0 }
 0x22a   : > { %v3097_v13 = vadd.f32 %v3096_v10, %v3095_v27  ;;  %v3675_v41 = vmax.f32 %v3673_v57, %v3674_v49  ;;  %v3373_v42 = vadd.f32 %v3372_v38, %v3371_v17  ;;  %v3951_v31 = vmax.f32 %v3949_v62, %v3950_v8  ;;  %v6811_v27 = vpop.f32.mrf.mxu1 }
 0x22b   : > { %v3100_v35 = vsel %vm261_vm2, %v2721_v50, 0.0  ;;  %v2724_v59 = vmax.f32 %v2032_v56, 0.0  ;;  %v2722_v58 = vmax.f32 %v2024_v20, 0.0  ;;  %v2035_v21 = vadd.f32 %v6768_v46, %v6724_v14 }
 0x22c   : > { %v3099_v11 = vadd.f32 %v3098_v5, %v3097_v13  ;;  %v3677_v47 = vmax.f32 %v3675_v41, %v3676_v51  ;;  %v3375_v30 = vadd.f32 %v3374_v53, %v3373_v42  ;;  %v3953_v40 = vmax.f32 %v3951_v31, %v3952_v15  ;;  %v6827_v8 = vpop.f32.mrf.mxu1  ;;  %v2055_v41 = vpop.f32.mrf.mxu0 }
 0x22d   : > { %v3678_v26 = vsel %vm261_vm2, %v2721_v50, -inf  ;;  %v3376_v3 = vsel %vm261_vm2, %v2849_v63, 0.0  ;;  %v3954_v24 = vsel %vm261_vm2, %v2849_v63, -inf  ;;  %v2850_v4 = vmax.f32 %v2536_v39, 0.0 }
 0x22e   : > { %v2852_v18 = vmax.f32 %v2544_v37, 0.0  ;;  %v3101_v22 = vadd.f32 %v3100_v35, %v3099_v11  ;;  %v3679_v55 = vmax.f32 %v3677_v47, %v3678_v26  ;;  %v3377_v48 = vadd.f32 %v3376_v3, %v3375_v30 }
 0x22f   : > { %v6807_v14 = vadd.f32 %v6641_v33, %v6689_v16  ;;  %v3106_v5 = vsel %vm261_vm2, %v2724_v59, 0.0  ;;  %v3378_v51 = vsel %vm261_vm2, %v2850_v4, 0.0  ;;  %v3955_v53 = vmax.f32 %v3953_v40, %v3954_v24  ;;  %v2567_v40 = vpop.f32.mrf.mxu1 }
 0x230   : > { %v3684_v50 = vsel %vm261_vm2, %v2724_v59, -inf  ;;  %v3102_v57 = vsel %vm261_vm2, %v2722_v58, 0.0  ;;  %v3956_v17 = vsel %vm261_vm2, %v2850_v4, -inf  ;;  %v2725_v62 = vmax.f32 %v2035_v21, 0.0 }
 0x231   : > { %v3680_v23 = vsel %vm261_vm2, %v2722_v58, -inf  ;;  %v2547_v33 = vadd.f32 %v6768_v46, %v6731_v34  ;;  %v2027_v16 = vadd.f32 %v6768_v46, %v6739_v52  ;;  %v2539_v56 = vadd.f32 %v6768_v46, %v6749_v44 }
 0x232   : > { %v3382_v20 = vsel %vm261_vm2, %v2852_v18, 0.0  ;;  %v3103_v15 = vadd.f32 %v3102_v57, %v3101_v22  ;;  %v3681_v63 = vmax.f32 %v3679_v55, %v3680_v23  ;;  %v3379_v37 = vadd.f32 %v3378_v51, %v3377_v48 }
 0x233   : > { %v3957_v39 = vmax.f32 %v3955_v53, %v3956_v17  ;;  %v2723_v10 = vmax.f32 %v2027_v16, 0.0  ;;  %v2851_v49 = vmax.f32 %v2539_v56, 0.0  ;;  %v2552_v38 = vadd.f32 %v6768_v46, %v2551_v29 }
 0x234   : > { %v3960_v34 = vsel %vm261_vm2, %v2852_v18, -inf  ;;  %v3108_v13 = vsel %vm261_vm2, %v2725_v62, 0.0  ;;  %v2048_v52 = vadd.f32 %v6768_v46, %v6751_v6  ;;  %v2040_v44 = vadd.f32 %v6768_v46, %v6772_v1  ;;  %v4659_v18 = vpop.f32.mrf.mxu0 }
 0x235   : > { %v2853_v42 = vmax.f32 %v2547_v33, 0.0  ;;  %v3104_v31 = vsel %vm261_vm2, %v2723_v10, 0.0  ;;  %v3682_v35 = vsel %vm261_vm2, %v2723_v10, -inf  ;;  %v2560_v29 = vadd.f32 %v6768_v46, %v6760_v25  ;;  %v4787_v33 = vpop.f32.mrf.mxu1 }
 0x236   : > { %v3105_v59 = vadd.f32 %v3104_v31, %v3103_v15  ;;  %v3683_v58 = vmax.f32 %v3681_v63, %v3682_v35  ;;  %v3380_v21 = vsel %vm261_vm2, %v2851_v49, 0.0  ;;  %v3958_v11 = vsel %vm261_vm2, %v2851_v49, -inf  ;;  %v2058_v15 = vpop.f32.mrf.mxu0 }
 0x237   : > { %v3686_v6 = vsel %vm261_vm2, %v2725_v62, -inf  ;;  %v3381_v47 = vadd.f32 %v3380_v21, %v3379_v37  ;;  %v3959_v30 = vmax.f32 %v3957_v39, %v3958_v11  ;;  %v2854_v1 = vmax.f32 %v2552_v38, 0.0 }
 0x238   : > { %v3107_v26 = vadd.f32 %v3106_v5, %v3105_v59  ;;  %v3685_v3 = vmax.f32 %v3683_v58, %v3684_v50  ;;  %v2726_v24 = vmax.f32 %v2040_v44, 0.0  ;;  %v2051_v4 = vadd.f32 %v6768_v46, %v6789_v54  ;;  %v6864_v59 = vpop.f32.mrf.mxu0 }
 0x239   : > { %v3383_v25 = vadd.f32 %v3382_v20, %v3381_v47  ;;  %v3961_v22 = vmax.f32 %v3959_v30, %v3960_v34  ;;  %v2728_v55 = vmax.f32 %v2048_v52, 0.0  ;;  %v2856_v48 = vmax.f32 %v2560_v29, 0.0 }
 0x23a   : > { %v3384_v51 = vsel %vm261_vm2, %v2853_v42, 0.0  ;;  %v3962_v53 = vsel %vm261_vm2, %v2853_v42, -inf  ;;  %v3109_v57 = vadd.f32 %v3108_v13, %v3107_v26  ;;  %v3687_v17 = vmax.f32 %v3685_v3, %v3686_v6 }
 0x23b   : > { %v3385_v62 = vadd.f32 %v3384_v51, %v3383_v25  ;;  %v3386_v23 = vsel %vm261_vm2, %v2854_v1, 0.0  ;;  %v3963_v5 = vmax.f32 %v3961_v22, %v3962_v53  ;;  %v3964_v50 = vsel %vm261_vm2, %v2854_v1, -inf  ;;  %v2071_v51 = vpop.f32.mrf.mxu0 }
 0x23c   : > { %v3110_v54 = vsel %vm261_vm2, %v2726_v24, 0.0  ;;  %v3688_v16 = vsel %vm261_vm2, %v2726_v24, -inf  ;;  %v2563_v56 = vadd.f32 %v6768_v46, %v6798_v2  ;;  %v2043_v20 = vadd.f32 %v6768_v46, %v6800_v45  ;;  %v2570_v45 = vpop.f32.mrf.mxu1 }
 0x23d   : > { %v3111_v63 = vadd.f32 %v3110_v54, %v3109_v57  ;;  %v3689_v37 = vmax.f32 %v3687_v17, %v3688_v16  ;;  %v2729_v39 = vmax.f32 %v2051_v4, 0.0  ;;  %v2555_v10 = vadd.f32 %v6768_v46, %v6811_v27 }
 0x23e   : > { %v3114_v49 = vsel %vm261_vm2, %v2728_v55, 0.0  ;;  %v3387_v38 = vadd.f32 %v3386_v23, %v3385_v62  ;;  %v3965_v34 = vmax.f32 %v3963_v5, %v3964_v50  ;;  %v2727_v13 = vmax.f32 %v2043_v20, 0.0  ;;  %v4790_v24 = vpop.f32.mrf.mxu1 }
 0x23f   : > { %v3692_v52 = vsel %vm261_vm2, %v2728_v55, -inf  ;;  %v2857_v44 = vmax.f32 %v2563_v56, 0.0  ;;  %v2855_v42 = vmax.f32 %v2555_v10, 0.0  ;;  %v2064_v2 = vadd.f32 %v6768_v46, %v6816_v60  ;;  %v4663_v10 = vpop.f32.mrf.mxu0 }
 0x240   : > { %v3112_v31 = vsel %vm261_vm2, %v2727_v13, 0.0  ;;  %v3690_v35 = vsel %vm261_vm2, %v2727_v13, -inf  ;;  %v2056_v29 = vadd.f32 %v6768_v46, %v2055_v41  ;;  %v2568_v27 = vadd.f32 %v6768_v46, %v2567_v40  ;;  %v2583_v20 = vpop.f32.mrf.mxu1 }
 0x241   : > { %v3113_v58 = vadd.f32 %v3112_v31, %v3111_v63  ;;  %v3691_v21 = vmax.f32 %v3689_v37, %v3690_v35  ;;  %v3388_v11 = vsel %vm261_vm2, %v2855_v42, 0.0  ;;  %v3966_v6 = vsel %vm261_vm2, %v2855_v42, -inf }
 0x242   : > { %v3390_v47 = vsel %vm261_vm2, %v2856_v48, 0.0  ;;  %v3968_v60 = vsel %vm261_vm2, %v2856_v48, -inf  ;;  %v3389_v30 = vadd.f32 %v3388_v11, %v3387_v38  ;;  %v3967_v1 = vmax.f32 %v3965_v34, %v3966_v6 }
 0x243   : > { %v3116_v26 = vsel %vm261_vm2, %v2729_v39, 0.0  ;;  %v3115_v3 = vadd.f32 %v3114_v49, %v3113_v58  ;;  %v3693_v41 = vmax.f32 %v3691_v21, %v3692_v52  ;;  %v2576_v40 = vadd.f32 %v6768_v46, %v6827_v8 }
 0x244   : > { %v3391_v4 = vadd.f32 %v3390_v47, %v3389_v30  ;;  %v3969_v25 = vmax.f32 %v3967_v1, %v3968_v60  ;;  %v2732_v22 = vmax.f32 %v2064_v2, 0.0  ;;  %v2858_v55 = vmax.f32 %v2568_v27, 0.0 }
 0x245   : > { %v3694_v53 = vsel %vm261_vm2, %v2729_v39, -inf  ;;  %v3392_v57 = vsel %vm261_vm2, %v2857_v44, 0.0  ;;  %v2730_v48 = vmax.f32 %v2056_v29, 0.0  ;;  %v2067_v17 = vadd.f32 %v6768_v46, %v4659_v18  ;;  %v4791_v29 = vpop.f32.mrf.mxu1 }
 0x246   : > { %v3970_v62 = vsel %vm261_vm2, %v2857_v44, -inf  ;;  %v3117_v23 = vadd.f32 %v3116_v26, %v3115_v3  ;;  %v3695_v5 = vmax.f32 %v3693_v41, %v3694_v53  ;;  %v3393_v50 = vadd.f32 %v3392_v57, %v3391_v4 }
 0x247   : > { %v2860_v54 = vmax.f32 %v2576_v40, 0.0  ;;  %v3394_v8 = vsel %vm261_vm2, %v2858_v55, 0.0  ;;  %v3971_v16 = vmax.f32 %v3969_v25, %v3970_v62  ;;  %v3972_v56 = vsel %vm261_vm2, %v2858_v55, -inf  ;;  %v2586_v25 = vpop.f32.mrf.mxu1 }
 0x248   : > { %v6881_v63 = vmax.f32 %v6711_v61, %v6649_v32  ;;  %v3122_v37 = vsel %vm261_vm2, %v2732_v22, 0.0  ;;  %v3700_v18 = vsel %vm261_vm2, %v2732_v22, -inf  ;;  %v2579_v39 = vadd.f32 %v6768_v46, %v4787_v33 }
 0x249   : > { %v3118_v49 = vsel %vm261_vm2, %v2730_v48, 0.0  ;;  %v3696_v38 = vsel %vm261_vm2, %v2730_v48, -inf  ;;  %v2059_v34 = vadd.f32 %v6768_v46, %v2058_v15  ;;  %v2571_v13 = vadd.f32 %v6768_v46, %v2570_v45  ;;  %v2074_v15 = vpop.f32.mrf.mxu0 }
 0x24a   : > { %v3119_v52 = vadd.f32 %v3118_v49, %v3117_v23  ;;  %v3697_v44 = vmax.f32 %v3695_v5, %v3696_v38  ;;  %v3395_v42 = vadd.f32 %v3394_v8, %v3393_v50  ;;  %v3973_v32 = vmax.f32 %v3971_v16, %v3972_v56 }
 0x24b   : > { %v3398_v61 = vsel %vm261_vm2, %v2860_v54, 0.0  ;;  %v2733_v2 = vmax.f32 %v2067_v17, 0.0  ;;  %v2731_v31 = vmax.f32 %v2059_v34, 0.0  ;;  %v2859_v35 = vmax.f32 %v2571_v13, 0.0  ;;  %v4666_v57 = vpop.f32.mrf.mxu0 }
 0x24c   : > { %v3976_v33 = vsel %vm261_vm2, %v2860_v54, -inf  ;;  %v2861_v27 = vmax.f32 %v2579_v39, 0.0  ;;  %v2072_v58 = vadd.f32 %v6768_v46, %v2071_v51  ;;  %v2584_v21 = vadd.f32 %v6768_v46, %v2583_v20  ;;  %v4794_v20 = vpop.f32.mrf.mxu1 }
 0x24d   : > { %v3120_v45 = vsel %vm261_vm2, %v2731_v31, 0.0  ;;  %v3698_v11 = vsel %vm261_vm2, %v2731_v31, -inf  ;;  %v3396_v6 = vsel %vm261_vm2, %v2859_v35, 0.0  ;;  %v3974_v47 = vsel %vm261_vm2, %v2859_v35, -inf  ;;  %v2087_v38 = vpop.f32.mrf.mxu0 }
 0x24e   : > { %v3121_v60 = vadd.f32 %v3120_v45, %v3119_v52  ;;  %v3699_v30 = vmax.f32 %v3697_v44, %v3698_v11  ;;  %v3397_v1 = vadd.f32 %v3396_v6, %v3395_v42  ;;  %v3975_v26 = vmax.f32 %v3973_v32, %v3974_v47 }
 0x24f   : > { %v3124_v3 = vsel %vm261_vm2, %v2733_v2, 0.0  ;;  %v3702_v41 = vsel %vm261_vm2, %v2733_v2, -inf  ;;  %v2080_v40 = vadd.f32 %v6768_v46, %v6864_v59  ;;  %v2592_v4 = vadd.f32 %v6768_v46, %v4790_v24  ;;  %v4667_v6 = vpop.f32.mrf.mxu0 }
 0x250   : > { %v3123_v22 = vadd.f32 %v3122_v37, %v3121_v60  ;;  %v3701_v55 = vmax.f32 %v3699_v30, %v3700_v18  ;;  %v3399_v51 = vadd.f32 %v3398_v61, %v3397_v1  ;;  %v3977_v53 = vmax.f32 %v3975_v26, %v3976_v33 }
 0x251   : > { %v3400_v48 = vsel %vm261_vm2, %v2861_v27, 0.0  ;;  %v3978_v17 = vsel %vm261_vm2, %v2861_v27, -inf  ;;  %v2734_v62 = vmax.f32 %v2072_v58, 0.0  ;;  %v2862_v23 = vmax.f32 %v2584_v21, 0.0 }
 0x252   : > { %v3125_v5 = vadd.f32 %v3124_v3, %v3123_v22  ;;  %v3703_v50 = vmax.f32 %v3701_v55, %v3702_v41  ;;  %v3401_v54 = vadd.f32 %v3400_v48, %v3399_v51  ;;  %v3979_v8 = vmax.f32 %v3977_v53, %v3978_v17 }
 0x253   : > { %v6908_v59 = vadd.f32 %v3280_v28, %v6602_v19  ;;  %v3349_v24 = vrot.slane %v6807_v14, 4  ;;  %v3402_v16 = vsel %vm261_vm2, %v2862_v23, 0.0  ;;  %v3980_v56 = vsel %vm261_vm2, %v2862_v23, -inf }
 0x254   : > { %v3927_v37 = vrot.slane %v6881_v63, 4  ;;  %v2736_v18 = vmax.f32 %v2080_v40, 0.0  ;;  %v2864_v39 = vmax.f32 %v2592_v4, 0.0  ;;  %v2083_v49 = vadd.f32 %v6768_v46, %v4663_v10  ;;  %v2599_v10 = vpop.f32.mrf.mxu1 }
 0x255   : > { %v3126_v34 = vsel %vm261_vm2, %v2734_v62, 0.0  ;;  %v3704_v13 = vsel %vm261_vm2, %v2734_v62, -inf  ;;  %v2075_v19 = vadd.f32 %v6768_v46, %v2074_v15  ;;  %v2587_v28 = vadd.f32 %v6768_v46, %v2586_v25  ;;  %v2090_v62 = vpop.f32.mrf.mxu0 }
 0x256   : > { %v3127_v52 = vadd.f32 %v3126_v34, %v3125_v5  ;;  %v3705_v44 = vmax.f32 %v3703_v50, %v3704_v13  ;;  %v3403_v42 = vadd.f32 %v3402_v16, %v3401_v54  ;;  %v3981_v32 = vmax.f32 %v3979_v8, %v3980_v56  ;;  %v4795_v4 = vpop.f32.mrf.mxu1 }
 0x257   : > { %v2595_v61 = vadd.f32 %v6768_v46, %v4791_v29  ;;  %v2735_v2 = vmax.f32 %v2075_v19, 0.0  ;;  %v2863_v31 = vmax.f32 %v2587_v28, 0.0  ;;  %v2088_v35 = vadd.f32 %v6768_v46, %v2087_v38 }
 0x258   : > { %v3130_v33 = vsel %vm261_vm2, %v2736_v18, 0.0  ;;  %v3708_v27 = vsel %vm261_vm2, %v2736_v18, -inf  ;;  %v3406_v58 = vsel %vm261_vm2, %v2864_v39, 0.0  ;;  %v2737_v21 = vmax.f32 %v2083_v49, 0.0 }
 0x259   : > { %v3128_v15 = vsel %vm261_vm2, %v2735_v2, 0.0  ;;  %v3706_v45 = vsel %vm261_vm2, %v2735_v2, -inf  ;;  %v2096_v11 = vadd.f32 %v6768_v46, %v4666_v57  ;;  %v2600_v29 = vadd.f32 %v6768_v46, %v2599_v10 }
 0x25a   : > { %v3129_v47 = vadd.f32 %v3128_v15, %v3127_v52  ;;  %v3707_v60 = vmax.f32 %v3705_v44, %v3706_v45  ;;  %v3404_v30 = vsel %vm261_vm2, %v2863_v31, 0.0  ;;  %v3982_v1 = vsel %vm261_vm2, %v2863_v31, -inf }
 0x25b   : > { %v2865_v26 = vmax.f32 %v2595_v61, 0.0  ;;  %v3405_v3 = vadd.f32 %v3404_v30, %v3403_v42  ;;  %v3983_v41 = vmax.f32 %v3981_v32, %v3982_v1  ;;  %v2738_v40 = vmax.f32 %v2088_v35, 0.0 }
 0x25c   : > { %v3984_v25 = vsel %vm261_vm2, %v2864_v39, -inf  ;;  %v3132_v22 = vsel %vm261_vm2, %v2737_v21, 0.0  ;;  %v3131_v55 = vadd.f32 %v3130_v33, %v3129_v47  ;;  %v3709_v51 = vmax.f32 %v3707_v60, %v3708_v27  ;;  %v2602_v39 = vpop.f32.mrf.mxu1 }
 0x25d   : > { %v3710_v53 = vsel %vm261_vm2, %v2737_v21, -inf  ;;  %v3407_v57 = vadd.f32 %v3406_v58, %v3405_v3  ;;  %v3985_v48 = vmax.f32 %v3983_v41, %v3984_v25  ;;  %v2866_v17 = vmax.f32 %v2600_v29, 0.0 }
 0x25e   : > { %v2608_v23 = vadd.f32 %v6768_v46, %v4794_v20  ;;  %v3133_v5 = vadd.f32 %v3132_v22, %v3131_v55  ;;  %v3711_v50 = vmax.f32 %v3709_v51, %v3710_v53  ;;  %v2099_v54 = vadd.f32 %v6768_v46, %v4667_v6 }
 0x25f   : > { %v3408_v8 = vsel %vm261_vm2, %v2865_v26, 0.0  ;;  %v3986_v16 = vsel %vm261_vm2, %v2865_v26, -inf  ;;  %v2740_v56 = vmax.f32 %v2096_v11, 0.0  ;;  %v3134_v18 = vsel %vm261_vm2, %v2738_v40, 0.0 }
 0x260   : > { %v3712_v49 = vsel %vm261_vm2, %v2738_v40, -inf  ;;  %v3409_v38 = vadd.f32 %v3408_v8, %v3407_v57  ;;  %v3987_v34 = vmax.f32 %v3985_v48, %v3986_v16  ;;  %v2091_v13 = vadd.f32 %v6768_v46, %v2090_v62 }
 0x261   : > { %v3135_v19 = vadd.f32 %v3134_v18, %v3133_v5  ;;  %v3713_v20 = vmax.f32 %v3711_v50, %v3712_v49  ;;  %v3410_v28 = vsel %vm261_vm2, %v2866_v17, 0.0  ;;  %v3988_v52 = vsel %vm261_vm2, %v2866_v17, -inf }
 0x262   : > { %v2611_v44 = vadd.f32 %v6768_v46, %v4795_v4  ;;  %v2739_v42 = vmax.f32 %v2091_v13, 0.0  ;;  %v2603_v32 = vadd.f32 %v6768_v46, %v2602_v39  ;;  %v3282_v61 = vrot.slane %v6908_v59, 2 }
 0x263   : > { %v3859_v2 = vmax.f32 %v6609_v0, %v3858_v43  ;;  %v3350_v31 = vadd.f32 %v3349_v24, %v6807_v14  ;;  %v2741_v35 = vmax.f32 %v2099_v54, 0.0  ;;  %v5066_v10 = vmov 0.0  }
 0x264   : > { %262 = vst.msk [vmem:[#allocation2] sm:$0xff] %vm261_vm2, %v5066_v10  ;;  %263 = vst.msk [vmem:[#allocation3] sm:$0xff] %vm261_vm2, %v5066_v10  ;;  %v3411_v33 = vadd.f32 %v3410_v28, %v3409_v38  ;;  %v3989_v27 = vmax.f32 %v3987_v34, %v3988_v52  ;;  %v3136_v46 = vsel %vm261_vm2, %v2739_v42, 0.0  ;;  %v3714_v58 = vsel %vm261_vm2, %v2739_v42, -inf }
 0x265   : > { %v2868_v21 = vmax.f32 %v2608_v23, 0.0  ;;  %v3137_v15 = vadd.f32 %v3136_v46, %v3135_v19  ;;  %v3715_v45 = vmax.f32 %v3713_v20, %v3714_v58  ;;  %v2867_v0 = vmax.f32 %v2603_v32, 0.0 }
 0x266   : > { %v3928_v43 = vmax.f32 %v6881_v63, %v3927_v37  ;;  %v3138_v14 = vsel %vm261_vm2, %v2740_v56, 0.0  ;;  %v3716_v24 = vsel %vm261_vm2, %v2740_v56, -inf  ;;  %v2869_v11 = vmax.f32 %v2611_v44, 0.0 }
 0x267   : > { %v3139_v29 = vadd.f32 %v3138_v14, %v3137_v15  ;;  %v3717_v6 = vmax.f32 %v3715_v45, %v3716_v24  ;;  %v3412_v47 = vsel %vm261_vm2, %v2867_v0, 0.0  ;;  %v3990_v60 = vsel %vm261_vm2, %v2867_v0, -inf }
 0x268   : > { %v3140_v30 = vsel %vm261_vm2, %v2741_v35, 0.0  ;;  %v3718_v1 = vsel %vm261_vm2, %v2741_v35, -inf  ;;  %v3413_v26 = vadd.f32 %v3412_v47, %v3411_v33  ;;  %v3991_v3 = vmax.f32 %v3989_v27, %v3990_v60 }
 0x269   : > { %v3414_v41 = vsel %vm261_vm2, %v2868_v21, 0.0  ;;  %v3992_v63 = vsel %vm261_vm2, %v2868_v21, -inf  ;;  %v3141_v37 = vadd.f32 %v3140_v30, %v3139_v29  ;;  %v3719_v40 = vmax.f32 %v3717_v6, %v3718_v1 }
 0x26a   : > { %v3860_v4 = vrot.slane %v3859_v2, 2  ;;  %v3351_v25 = vrot.slane %v3350_v31, 2  ;;  %v3415_v22 = vadd.f32 %v3414_v41, %v3413_v26  ;;  %v3993_v55 = vmax.f32 %v3991_v3, %v3992_v63 }
 0x26b   : > { %v3416_v51 = vsel %vm261_vm2, %v2869_v11, 0.0  ;;  %v3994_v53 = vsel %vm261_vm2, %v2869_v11, -inf  ;;  %v3142_v57 = vrot.slane %v3141_v37, 4  ;;  %v3720_v48 = vrot.slane %v3719_v40, 4  ;;  %v2870_v6 = vld [vmem:[#allocation2] sm:$0xff]  ;;  %v3449_v30 = vld [vmem:[#allocation3] sm:$0xff] }
 0x26c   : > { %v3929_v17 = vrot.slane %v3928_v43, 2  ;;  %v3417_v62 = vadd.f32 %v3416_v51, %v3415_v22  ;;  %v3995_v23 = vmax.f32 %v3993_v55, %v3994_v53  ;;  %v3283_v5 = vadd.f32 %v3282_v61, %v6908_v59  ;;  %v4402_v55 = vld [vmem:[%s7026_s3] ss:$0 sm:$0xff] }
 0x26d   : > { %v3143_v50 = vadd.f32 %v3142_v57, %v3141_v37  ;;  %v3721_v54 = vmax.f32 %v3719_v40, %v3720_v48  ;;  %v3215_v8 = vrot.slane %v6592_v12, 1  ;;  %v3861_v16 = vmax.f32 %v3859_v2, %v3860_v4  ;;  %v4403_v57 = vld [vmem:[%s7027_s4] ss:$0 sm:$0xff] }
 0x26e   : > { %v3418_v56 = vrot.slane %v3417_v62, 4  ;;  %v3996_v18 = vrot.slane %v3995_v23, 4  ;;  %v3793_v39 = vrot.slane %v6616_v36, 1  ;;  %v3352_v49 = vadd.f32 %v3351_v25, %v3350_v31 }
 0x26f   : > { %v3144_v38 = vrot.slane %v3143_v50, 2  ;;  %v3722_v34 = vrot.slane %v3721_v54, 2  ;;  %v3930_v13 = vmax.f32 %v3928_v43, %v3929_v17  ;;  %v3284_v28 = vrot.slane %v3283_v5, 1 }
 0x270   : > { %v3419_v19 = vadd.f32 %v3418_v56, %v3417_v62  ;;  %v3997_v20 = vmax.f32 %v3995_v23, %v3996_v18  ;;  %v3216_v59 = vadd.f32 %v3215_v8, %v6592_v12  ;;  %v3862_v42 = vrot.slane %v3861_v16, 1 }
 0x271   : > { %v3145_v52 = vadd.f32 %v3144_v38, %v3143_v50  ;;  %v3723_v44 = vmax.f32 %v3721_v54, %v3722_v34  ;;  %v3794_v2 = vmax.f32 %v6616_v36, %v3793_v39  ;;  %v3353_v35 = vrot.slane %v3352_v49, 1 }
 0x272   : > { %v3420_v32 = vrot.slane %v3419_v19, 2  ;;  %v3998_v61 = vrot.slane %v3997_v20, 2  ;;  %v3931_v27 = vrot.slane %v3930_v13, 1  ;;  %v3285_v58 = vadd.f32 %v3284_v28, %v3283_v5 }
 0x273   : > { %v3146_v10 = vrot.slane %v3145_v52, 1  ;;  %v3724_v33 = vrot.slane %v3723_v44, 1  ;;  %v3863_v45 = vmax.f32 %v3861_v16, %v3862_v42  ;;  %v3354_v43 = vadd.f32 %v3353_v35, %v3352_v49 }
 0x274   : > { %v3421_v31 = vadd.f32 %v3420_v32, %v3419_v19  ;;  %v3999_v46 = vmax.f32 %v3997_v20, %v3998_v61  ;;  %v3932_v24 = vmax.f32 %v3930_v13, %v3931_v27 }
 0x275   : > { %v3147_v21 = vadd.f32 %v3146_v10, %v3145_v52  ;;  %v3725_v15 = vmax.f32 %v3723_v44, %v3724_v33 }
 0x276   : > { %v3422_v0 = vrot.slane %v3421_v31, 1  ;;  %v4000_v12 = vrot.slane %v3999_v46, 1 }
 0x277   : > { %v3437_v14 = vsel %vm3436_vm5, %v3147_v21, %v6683_v7  ;;  %v4012_v36 = vsel %vm3436_vm5, %v3725_v15, %v6687_v9 }
 0x278   : > { %v3439_v11 = vsel %vm3438_vm6, %v3216_v59, %v3437_v14  ;;  %v4013_v29 = vsel %vm3438_vm6, %v3794_v2, %v4012_v36  ;;  %v3423_v47 = vadd.f32 %v3422_v0, %v3421_v31  ;;  %v4001_v1 = vmax.f32 %v3999_v46, %v4000_v12 }
 0x279   : > { %v3441_v60 = vsel %vm3440_vm7, %v3285_v58, %v3439_v11  ;;  %v4014_v26 = vsel %vm3440_vm7, %v3863_v45, %v4013_v29 }
 0x27a   : > { %v3443_v3 = vsel %vm3442_vm8, %v3354_v43, %v3441_v60  ;;  %v4015_v41 = vsel %vm3442_vm8, %v3932_v24, %v4014_v26 }
 0x27b   : > { %v3445_v63 = vsel %vm3444_vm9, %v3423_v47, %v3443_v3  ;;  %v4016_v37 = vsel %vm3444_vm9, %v4001_v1, %v4015_v41 }
 0x27c   : > { %v3447_v40 = vadd.f32 %v3445_v63, %v2870_v6  ;;  %v4018_v7 = vmax.f32 %v3449_v30, %v4016_v37 }
 0x27e   : > { %3448 = vst.msk [vmem:[#allocation2] sm:$0xff] %vm261_vm2, %v3447_v40  ;;  %4019 = vst.msk [vmem:[#allocation3] sm:$0xff] %vm261_vm2, %v4018_v7 }
 0x285   : > { %v4023_v9 = vld [vmem:[#allocation2] sm:$0xff]  ;;  %v4025_v25 = vld [vmem:[#allocation3] sm:$0xff] }
 0x286   : > { %v4024_v4 = vmul.f32 0.00390625, %v4023_v9 }
 0x288   : > { %v4026_v22 = vadd.f32 %v4025_v25, %v4024_v4 }
 0x28a   : > { %4028 = vrot.lane.b32.xlu0 %v4026_v22, %s5067_s7  ;;  %s5068_s7 = smov [#allocation4]  }
 0x28b   : > { %s4992_s10 = sshll.u32 %s5068_s7, 4  ;;  %s4993_s10 = int_to_ptr.vmem [resolvable:$false] %s4992_s10 }
 0x28c   : > { %s4994_s21 = scalar_lea.vmem %s4993_s10, 256  ;;  %p4995_p1 = scmp.lt.s32.totalorder %s4064_s16, %s4993_s10 }
 0x28d   : > { %p4996_p2 = scmp.lt.s32.totalorder %s4994_s21, %s4988_s29 }
 0x28f   : > { %p4997_p3 = por %p4996_p2, %p4995_p1 }
 0x291   : > { %p4998_p5 = pnand %p4997_p3, %p4991_p0 }
 0x2fc   : > { %v4029_v51 = vpop.permute.xlu0 %4028 }
 0x2fd   : > { %v4031_v53 = vsel %vm261_vm2, %v4026_v22, %v4029_v51 }
 0x2fe   : > { %v4039_v48 = vmul.f32 %v4402_v55, %v4031_v53 }
 0x300   : > { %v4047_v17 = vadd.f32 %v4403_v57, %v4039_v48 }
 0x302   : > { %4048 = vst [vmem:[%s243_s15] sm:$0xff] %v4047_v17 }
 0x303   : > { %5001 = shalt.err (!%p4998_p5)
}
 0x304   : > { %s5002_s9 = scalar_lea.hbm %s4061_s25, 128  ;;  %s5006_s12 = scalar_lea.hbm %s7028_s5, 256 }
 0x305   : > { %p5003_p6 = scmp.ne.s32.totalorder %s4061_s25, %s5002_s9  ;;  %p5007_p10 = scmp.lt.s32.totalorder %s4061_s25, %s7028_s5 }
 0x306   : > { %p5008_p11 = scmp.lt.s32.totalorder %s5006_s12, %s5002_s9 }
 0x307   : > { %p5004_p7 = pnand %p5003_p6, %p5139_p4 }
 0x308   : > { %p5009_p12 = por %p5008_p11, %p5007_p10 }
 0x309   : > { %p5005_p9 = pneg %p5004_p7 }
 0x30b   : > { %p5010_p13 = pnand %p5009_p12, %p5005_p9 }
 0x30d   : > { %5013 = shalt.err (!%p5010_p13)
}
 0x30e   : > { %4800 = dma.vmem_to_hbm [thread:$0]  (%p5139_p4), %s4064_s16, 128, %s4061_s25, %s4050_s27  }
 0x30f PF: > { %p4806_p0 = scmp.ge.s32.totalorder %s5064_s23, 2  ;;  %s4075_s15 = sand.u32 1, %s5044_s18  }
 0x310   : > { %s4076_s17 = scalar_lea.sflag [#allocation5], %s4075_s15 }
 0x311   : > { %p4803_p1 = pnand %p4806_p0, %p5146_p8 }
 0x313   : > { %p4804_p2 = pneg %p4803_p1 }
 0x315   : > { %5039 = dma.done.wait (%p4804_p2), %s4076_s17, 128  }
 0x316   : > { %5041 = vsyncadd (%p4804_p2), %s4076_s17, 4294967168  ;;  %s18_s23 = sadd.s32 1, %s5064_s23   ;;  %s7060_s18 = smov %s5048_s19 }
 0x317   : > { %p15_p3 = scmp.ge.s32.totalorder %s18_s23, 4   ;;  %s7061_s19 = smov %s5052_s20 }
 0x318   : > { %s7062_s20 = smov %s5152_s6  ;;  %s7063_s21 = smov %s5060_s22 }
 0x319   : > { %s7064_s22 = smov %s7066_s26  ;;  %17 = sbr.rel (!%p15_p3) target bundleno = 4 (0x4), region = 83 }
 0x31e   :  { %4081 = vsyncpa [#allocation5], 1 }
 0x31f   :  { %4083 = vsyncpa [#allocation5 + $0x1], 1 }

</bundles_post_ra>
